<compile_context>
chip_gen: v5e
topology: v5e:2x2
jax: 0.10.0
libtpu: 0.0.40
codegen_flags: <defaults>
</compile_context>

<pallas_src>
import math

import jax
import jax.numpy as jnp
from jax import lax
from jax.experimental import pallas as pl
from jax.experimental.pallas import tpu as pltpu

# ----------------------- model hyper-parameters (small) ----------------------
N_NODE = 128          # args.n_node (user vocabulary size)
EMB = 32              # args.embSize
BATCH = 2
SEQ = 8
LAYERS = 2            # args.layer (hypergraph propagation layers)
N_HEADS = 8
HEAD_DIM = EMB // N_HEADS
BL = BATCH * SEQ              # flattened sequence positions (16)
C = N_HEADS * BL              # (head, key-position) lane axis width (128)
ATTN_SCALE = 1.0 / math.sqrt(HEAD_DIM)
BN_SCALE = 1.0 / math.sqrt(1.0 + 1e-5)   # eval-mode BatchNorm1d, default stats

_VMEM = pl.BlockSpec(memory_space=pltpu.MemorySpace.VMEM)


# ------------------------------ fused kernel ---------------------------------
def _didp_kernel(seq_ref, h_ref, a_ref, nslab_ref, smw_ref, qkv_ref, wo_ref,
                 bias_ref, masks_ref, out_ref):
    f32 = jnp.float32
    bf16 = jnp.bfloat16

    # ---------------- unpack packed operand slabs ------------------------------
    nslab = nslab_ref[...]                         # [N, 4E] bf16
    uemb = nslab[:, 0 * EMB:1 * EMB]               # user_embedding.weight
    gemb = nslab[:, 1 * EMB:2 * EMB]               # gnn.embedding.weight
    wsoc = nslab[:, 2 * EMB:3 * EMB]               # linear_social.weight (torch [N,E])
    wdif = nslab[:, 3 * EMB:4 * EMB]               # linear_diff.weight   (torch [N,E])

    w1 = smw_ref[0][:EMB, :]                       # GCN W1 [E, 2E] bf16
    w2 = smw_ref[1][:, :EMB]                       # GCN W2 [2E, E] bf16
    wf = smw_ref[2][:EMB, :EMB]                    # folded diff_fuse weight [E, E]

    bias = bias_ref[...]                           # [8, N] f32
    b1 = bias[0:1, :2 * EMB]
    b2 = bias[1:2, :EMB]
    bf_b = bias[2:3, :EMB]
    b_pred = bias[3:4, :]                          # b_social + b_diff (folded)

    group_sum = masks_ref[0]                       # [C, C] bf16 per-head sum matrix
    hm_rep = masks_ref[1]                          # [C, 128] bf16
    head_mask2 = hm_rep[:, :2 * EMB].astype(f32)   # [C, 2E] head block-diag (x2)
    rep = hm_rep[:, 2 * EMB:2 * EMB + BL]          # [C, BL] key replication (bf16)
    attn_bias = masks_ref[2][:BL, :].astype(f32)   # [BL, C] 0 / -inf same-batch mask
    block_tril = masks_ref[2][BL:2 * BL, :BL]      # [BL, BL] per-batch lower-tri (bf16)

    # ---------------- hypergraph_learning: acc = u0 + sum_k l2norm(H^k u0) ----
    h = h_ref[...]                                 # [N, N] bf16
    u = uemb.astype(f32)
    hg_uemb = u
    for _ in range(LAYERS):
        u = jnp.dot(h, u.astype(bf16), preferred_element_type=f32)
        inv = lax.rsqrt(jnp.maximum(jnp.sum(u * u, axis=1, keepdims=True), 1e-24))
        hg_uemb = hg_uemb + u * inv                # [N, E] f32

    # ---------------- GraphNN: 2x GCNConv (dense A_hat) + eval BatchNorm ------
    a = a_ref[...]                                 # [N, N] bf16
    g = jnp.dot(gemb, w1, preferred_element_type=f32)
    g = jnp.dot(a, g.astype(bf16), preferred_element_type=f32) + b1
    g = jnp.dot(g.astype(bf16), w2, preferred_element_type=f32)
    g = jnp.dot(a, g.astype(bf16), preferred_element_type=f32) + b2
    social_emb = g * BN_SCALE                      # [N, E] f32

    # ---------------- sequence gathers as one-hot matmuls ---------------------
    ids = seq_ref[...]                             # [BL, 1] int32
    node_iota = lax.broadcasted_iota(jnp.int32, (BL, N_NODE), 1)
    onehot = (ids == node_iota).astype(bf16)       # [BL, N]
    cas_seq = jnp.dot(onehot, hg_uemb.astype(bf16), preferred_element_type=f32)
    soc_seq = jnp.dot(onehot, social_emb.astype(bf16), preferred_element_type=f32)

    # ---------------- diff_fuse ------------------------------------------------
    # TODO(synk): diff_model / cas_reverse_model (external diffusion nets),
    # apply_noise2, reconstruction/SSL losses and the undefined
    # social_model_output1 of the reference are stubbed with social_seq_emb;
    # concat([stub, social_seq_emb]) @ Wf is therefore folded to soc_seq @ (Wf0+Wf1).
    smo2 = jnp.dot(soc_seq.astype(bf16), wf, preferred_element_type=f32) + bf_b

    # ---------------- batched multi-head self-attention -----------------------
    # Lane c of the C=128 axis <-> (head h = c // BL, key position j = c % BL).
    # TODO(synk): reference TransformerBlock internals unavailable; standard
    # unmasked scaled-dot-product self-attention + output projection is used.
    def mha(x, wq_pad, wkv, wo_pad):
        x_b = x.astype(bf16)
        q_pad = jnp.dot(x_b, wq_pad, preferred_element_type=f32)          # [BL, 2E]
        kv = jnp.dot(x_b, wkv, preferred_element_type=f32)                # [BL, 2E]
        kv_bd = (jnp.dot(rep, kv.astype(bf16), preferred_element_type=f32)
                 * head_mask2).astype(bf16)                               # [C, 2E]
        s = lax.dot_general(q_pad.astype(bf16), kv_bd, (((1,), (1,)), ((), ())),
                            preferred_element_type=f32) * ATTN_SCALE
        s = s + attn_bias                                                 # [BL, C]
        s = s - jnp.max(s, axis=-1, keepdims=True)  # per-row const: softmax-invariant
        e = jnp.exp(s)
        denom = jnp.dot(e.astype(bf16), group_sum, preferred_element_type=f32)
        p = e / denom                                                     # grouped softmax
        av = jnp.dot(p.astype(bf16), kv_bd, preferred_element_type=f32)   # [BL, 2E]
        return jnp.dot(av.astype(bf16), wo_pad, preferred_element_type=f32)

    social_cas = mha(smo2, qkv_ref[0], qkv_ref[1], wo_ref[0])             # [BL, E]
    diff_cas = mha(cas_seq, qkv_ref[2], qkv_ref[3], wo_ref[1])            # [BL, E]

    # ---------------- prediction heads (transpose-free) ------------------------
    # cas @ emb^T + Linear(cas) == cas @ (emb + W_linear)^T + b_linear
    ms = (social_emb + wsoc.astype(f32)).astype(bf16)                     # [N, E]
    md = (hg_uemb + wdif.astype(f32)).astype(bf16)                        # [N, E]
    pred = lax.dot_general(social_cas.astype(bf16), ms, (((1,), (1,)), ((), ())),
                           preferred_element_type=f32)
    pred = pred + lax.dot_general(diff_cas.astype(bf16), md, (((1,), (1,)), ((), ())),
                                  preferred_element_type=f32) + b_pred    # [BL, N]

    # ---------------- previous-user mask (-inf for seen users and user 0) ------
    appeared = jnp.dot(block_tril, onehot, preferred_element_type=f32) > 0.0
    masked = appeared | (node_iota == 0)
    out_ref[...] = pred + jnp.where(masked, -jnp.inf, 0.0)                # [BL, N]


# ------------------------------- JAX wrapper ----------------------------------
def didp_forward(seq, packed):
    b, l = seq.shape
    seq2d = seq.reshape(b * l, 1).astype(jnp.int32)
    cost = pl.CostEstimate(flops=10_000_000, transcendentals=4608,
                           bytes_accessed=270_000)
    return pl.pallas_call(
        _didp_kernel,
        out_shape=jax.ShapeDtypeStruct((b * l, N_NODE), jnp.float32),
        in_specs=[_VMEM] * 9,
        out_specs=_VMEM,
        cost_estimate=cost,
    )(seq2d, packed['h'], packed['a'], packed['node_slab'], packed['small_w'],
      packed['attn_qkv'], packed['attn_out'], packed['bias'], packed['masks'])


# ------------------------------ parameter init --------------------------------
def init_params(key):
    stdv = 1.0 / math.sqrt(EMB)               # DIDP.reset_parameters: U(-stdv, stdv)
    keys = jax.random.split(key, 20)

    def u(k, shape):
        return jax.random.uniform(k, shape, jnp.float32, -stdv, stdv)

    return {
        'user_emb': u(keys[0], (N_NODE, EMB)),
        'gnn_emb':  u(keys[1], (N_NODE, EMB)),
        # GCNConv weights stored input-major [in, out]; biases stored 2D.
        'W1': u(keys[2], (EMB, 2 * EMB)), 'b1': u(keys[3], (1, 2 * EMB)),
        'W2': u(keys[4], (2 * EMB, EMB)), 'b2': u(keys[5], (1, EMB)),
        # diff_fuse Linear(2E -> E) stored pre-transposed as [2E, E].
        'Wf': u(keys[6], (2 * EMB, EMB)), 'bf': u(keys[7], (1, EMB)),
        'Wq_s': u(keys[8], (EMB, EMB)), 'Wk_s': u(keys[9], (EMB, EMB)),
        'Wv_s': u(keys[10], (EMB, EMB)), 'Wo_s': u(keys[11], (EMB, EMB)),
        'Wq_c': u(keys[12], (EMB, EMB)), 'Wk_c': u(keys[13], (EMB, EMB)),
        'Wv_c': u(keys[14], (EMB, EMB)), 'Wo_c': u(keys[15], (EMB, EMB)),
        # linear_social / linear_diff kept in torch [out=N, in=E] layout.
        'W_social': u(keys[16], (N_NODE, EMB)), 'b_social': u(keys[17], (1, N_NODE)),
        'W_diff': u(keys[18], (N_NODE, EMB)), 'b_diff': u(keys[19], (1, N_NODE)),
    }


def build_masks():
    """Compile-time-constant attention/masking matrices, packed in one bf16 slab."""
    f32 = jnp.float32
    c = jnp.arange(C)
    e = jnp.arange(EMB)
    i = jnp.arange(BL)
    group_sum = ((c[:, None] // BL) == (c[None, :] // BL)).astype(f32)        # [C,C]
    head_mask = ((e[None, :] // HEAD_DIM) == (c[:, None] // BL)).astype(f32)  # [C,E]
    head_mask2 = jnp.concatenate([head_mask, head_mask], axis=1)              # [C,2E]
    rep = ((c[:, None] % BL) == i[None, :]).astype(f32)                       # [C,BL]
    same_batch = (i[:, None] // SEQ) == ((c[None, :] % BL) // SEQ)            # [BL,C]
    attn_bias = jnp.where(same_batch, 0.0, -jnp.inf)                          # [BL,C]
    block_tril = (((i[:, None] // SEQ) == (i[None, :] // SEQ))
                  & ((i[None, :] % SEQ) <= (i[:, None] % SEQ))).astype(f32)   # [BL,BL]
    m1 = jnp.zeros((C, C), f32).at[:, :2 * EMB].set(head_mask2)
    m1 = m1.at[:, 2 * EMB:2 * EMB + BL].set(rep)
    m2 = jnp.zeros((C, C), f32).at[:BL, :].set(attn_bias)
    m2 = m2.at[BL:2 * BL, :BL].set(block_tril)
    return jnp.stack([group_sum, m1, m2]).astype(jnp.bfloat16)                # [3,C,C]


def pack_inputs(params, h_item, a_norm):
    """Pack parameters into a few bf16/f32 slabs (fewer, larger prologue DMAs)."""
    bf = jnp.bfloat16
    f32 = jnp.float32

    node_slab = jnp.concatenate(
        [params['user_emb'], params['gnn_emb'],
         params['W_social'], params['W_diff']], axis=1).astype(bf)            # [N,4E]

    w1p = jnp.zeros((2 * EMB, 2 * EMB), f32).at[:EMB, :].set(params['W1'])
    w2p = jnp.zeros((2 * EMB, 2 * EMB), f32).at[:, :EMB].set(params['W2'])
    wf_fold = params['Wf'][:EMB, :] + params['Wf'][EMB:, :]                   # folded
    wfp = jnp.zeros((2 * EMB, 2 * EMB), f32).at[:EMB, :EMB].set(wf_fold)
    small_w = jnp.stack([w1p, w2p, wfp]).astype(bf)                           # [3,2E,2E]

    zeros_e = jnp.zeros((EMB, EMB), f32)

    def q_pad(wq):                       # -> [E, 2E], q result in lanes 0:E
        return jnp.concatenate([wq, zeros_e], axis=1)

    def kv_cat(wk, wv):                  # -> [E, 2E], k | v
        return jnp.concatenate([wk, wv], axis=1)

    def o_pad(wo):                       # -> [2E, E], consumes only the v half
        return jnp.concatenate([zeros_e, wo], axis=0)

    attn_qkv = jnp.stack([q_pad(params['Wq_s']), kv_cat(params['Wk_s'], params['Wv_s']),
                          q_pad(params['Wq_c']), kv_cat(params['Wk_c'], params['Wv_c'])]
                         ).astype(bf)                                         # [4,E,2E]
    attn_out = jnp.stack([o_pad(params['Wo_s']), o_pad(params['Wo_c'])]).astype(bf)

    bias = jnp.zeros((8, N_NODE), f32)
    bias = bias.at[0, :2 * EMB].set(params['b1'].reshape(-1))
    bias = bias.at[1, :EMB].set(params['b2'].reshape(-1))
    bias = bias.at[2, :EMB].set(params['bf'].reshape(-1))
    bias = bias.at[3, :].set((params['b_social'] + params['b_diff']).reshape(-1))

    return {
        'h': h_item.astype(bf), 'a': a_norm.astype(bf),
        'node_slab': node_slab, 'small_w': small_w,
        'attn_qkv': attn_qkv, 'attn_out': attn_out,
        'bias': bias, 'masks': build_masks(),
    }


def build_graphs(key):
    k1, k2 = jax.random.split(key)
    # synthetic dense hypergraph propagation operator H_Item (row-normalized)
    h = (jax.random.uniform(k1, (N_NODE, N_NODE)) > 0.9).astype(jnp.float32)
    h = h + jnp.eye(N_NODE, dtype=jnp.float32)
    h = h / jnp.sum(h, axis=1, keepdims=True)
    # social graph: symmetric adjacency, GCN normalization D^-1/2 (A+I) D^-1/2
    a = (jax.random.uniform(k2, (N_NODE, N_NODE)) > 0.95).astype(jnp.float32)
    a = jnp.maximum(a, a.T) + jnp.eye(N_NODE, dtype=jnp.float32)
    dinv = 1.0 / jnp.sqrt(jnp.sum(a, axis=1))
    a_norm = a * dinv[:, None] * dinv[None, :]
    return h, a_norm


if __name__ == "__main__":
    key = jax.random.PRNGKey(0)
    kp, kg, ks = jax.random.split(key, 3)
    params = init_params(kp)
    h_item, a_norm = build_graphs(kg)
    packed = pack_inputs(params, h_item, a_norm)
    seq = jax.random.randint(ks, (BATCH, SEQ), 0, N_NODE)   # user-id sequences

    fwd = jax.jit(didp_forward)
    out = fwd(seq, packed)
    jax.block_until_ready(out)
    assert out.shape == (BATCH * SEQ, N_NODE), out.shape
    assert bool(jnp.isfinite(out).any())
    print("KERNEL_OK")
</pallas_src>

<mosaic_0001>
module attributes {stable_mosaic.version = 11 : i64} {
  func.func @_didp_kernel(%arg0: memref<16x1xi32, #tpu.memory_space<vmem>>, %arg1: memref<128x128xbf16, #tpu.memory_space<vmem>>, %arg2: memref<128x128xbf16, #tpu.memory_space<vmem>>, %arg3: memref<128x128xbf16, #tpu.memory_space<vmem>>, %arg4: memref<3x64x64xbf16, #tpu.memory_space<vmem>>, %arg5: memref<4x32x64xbf16, #tpu.memory_space<vmem>>, %arg6: memref<2x64x32xbf16, #tpu.memory_space<vmem>>, %arg7: memref<8x128xf32, #tpu.memory_space<vmem>>, %arg8: memref<3x128x128xbf16, #tpu.memory_space<vmem>>, %arg9: memref<16x128xf32, #tpu.memory_space<vmem>>) attributes {dimension_semantics = [], scalar_prefetch = 0 : i64, scratch_operands = 0 : i64, tpu.core_type = #tpu.core_type<tc>} {
    %c0 = arith.constant 0 : index
    %c0_0 = arith.constant 0 : index
    %0 = vector.load %arg3[%c0, %c0_0] : memref<128x128xbf16, #tpu.memory_space<vmem>>, vector<128x128xbf16>
    %1 = vector.extract_strided_slice %0 {offsets = [0, 0], sizes = [128, 32], strides = [1, 1]} : vector<128x128xbf16> to vector<128x32xbf16>
    %2 = vector.extract_strided_slice %0 {offsets = [0, 32], sizes = [128, 32], strides = [1, 1]} : vector<128x128xbf16> to vector<128x32xbf16>
    %3 = vector.extract_strided_slice %0 {offsets = [0, 64], sizes = [128, 32], strides = [1, 1]} : vector<128x128xbf16> to vector<128x32xbf16>
    %4 = vector.extract_strided_slice %0 {offsets = [0, 96], sizes = [128, 32], strides = [1, 1]} : vector<128x128xbf16> to vector<128x32xbf16>
    %c0_1 = arith.constant 0 : index
    %c0_2 = arith.constant 0 : index
    %c0_3 = arith.constant 0 : index
    %5 = vector.load %arg4[%c0_1, %c0_2, %c0_3] : memref<3x64x64xbf16, #tpu.memory_space<vmem>>, vector<1x64x64xbf16>
    %6 = vector.shape_cast %5 : vector<1x64x64xbf16> to vector<64x64xbf16>
    %7 = vector.extract_strided_slice %6 {offsets = [0, 0], sizes = [32, 64], strides = [1, 1]} : vector<64x64xbf16> to vector<32x64xbf16>
    %c1 = arith.constant 1 : index
    %c0_4 = arith.constant 0 : index
    %c0_5 = arith.constant 0 : index
    %8 = vector.load %arg4[%c1, %c0_4, %c0_5] : memref<3x64x64xbf16, #tpu.memory_space<vmem>>, vector<1x64x64xbf16>
    %9 = vector.shape_cast %8 : vector<1x64x64xbf16> to vector<64x64xbf16>
    %10 = vector.extract_strided_slice %9 {offsets = [0, 0], sizes = [64, 32], strides = [1, 1]} : vector<64x64xbf16> to vector<64x32xbf16>
    %c2 = arith.constant 2 : index
    %c0_6 = arith.constant 0 : index
    %c0_7 = arith.constant 0 : index
    %11 = vector.load %arg4[%c2, %c0_6, %c0_7] : memref<3x64x64xbf16, #tpu.memory_space<vmem>>, vector<1x64x64xbf16>
    %12 = vector.shape_cast %11 : vector<1x64x64xbf16> to vector<64x64xbf16>
    %13 = vector.extract_strided_slice %12 {offsets = [0, 0], sizes = [32, 32], strides = [1, 1]} : vector<64x64xbf16> to vector<32x32xbf16>
    %c0_8 = arith.constant 0 : index
    %c0_9 = arith.constant 0 : index
    %14 = vector.load %arg7[%c0_8, %c0_9] : memref<8x128xf32, #tpu.memory_space<vmem>>, vector<8x128xf32>
    %15 = vector.extract_strided_slice %14 {offsets = [0, 0], sizes = [1, 64], strides = [1, 1]} : vector<8x128xf32> to vector<1x64xf32>
    %16 = vector.extract_strided_slice %14 {offsets = [1, 0], sizes = [1, 32], strides = [1, 1]} : vector<8x128xf32> to vector<1x32xf32>
    %17 = vector.extract_strided_slice %14 {offsets = [2, 0], sizes = [1, 32], strides = [1, 1]} : vector<8x128xf32> to vector<1x32xf32>
    %18 = vector.extract_strided_slice %14 {offsets = [3, 0], sizes = [1, 128], strides = [1, 1]} : vector<8x128xf32> to vector<1x128xf32>
    %c0_10 = arith.constant 0 : index
    %c0_11 = arith.constant 0 : index
    %c0_12 = arith.constant 0 : index
    %19 = vector.load %arg8[%c0_10, %c0_11, %c0_12] : memref<3x128x128xbf16, #tpu.memory_space<vmem>>, vector<1x128x128xbf16>
    %20 = vector.shape_cast %19 : vector<1x128x128xbf16> to vector<128x128xbf16>
    %c1_13 = arith.constant 1 : index
    %c0_14 = arith.constant 0 : index
    %c0_15 = arith.constant 0 : index
    %21 = vector.load %arg8[%c1_13, %c0_14, %c0_15] : memref<3x128x128xbf16, #tpu.memory_space<vmem>>, vector<1x128x128xbf16>
    %22 = vector.shape_cast %21 : vector<1x128x128xbf16> to vector<128x128xbf16>
    %23 = vector.extract_strided_slice %22 {offsets = [0, 0], sizes = [128, 64], strides = [1, 1]} : vector<128x128xbf16> to vector<128x64xbf16>
    %24 = arith.extf %23 : vector<128x64xbf16> to vector<128x64xf32>
    %25 = vector.extract_strided_slice %22 {offsets = [0, 64], sizes = [128, 16], strides = [1, 1]} : vector<128x128xbf16> to vector<128x16xbf16>
    %c2_16 = arith.constant 2 : index
    %c0_17 = arith.constant 0 : index
    %c0_18 = arith.constant 0 : index
    %26 = vector.load %arg8[%c2_16, %c0_17, %c0_18] : memref<3x128x128xbf16, #tpu.memory_space<vmem>>, vector<1x128x128xbf16>
    %27 = vector.shape_cast %26 : vector<1x128x128xbf16> to vector<128x128xbf16>
    %28 = vector.extract_strided_slice %27 {offsets = [0, 0], sizes = [16, 128], strides = [1, 1]} : vector<128x128xbf16> to vector<16x128xbf16>
    %29 = arith.extf %28 : vector<16x128xbf16> to vector<16x128xf32>
    %c2_19 = arith.constant 2 : index
    %c0_20 = arith.constant 0 : index
    %c0_21 = arith.constant 0 : index
    %30 = vector.load %arg8[%c2_19, %c0_20, %c0_21] : memref<3x128x128xbf16, #tpu.memory_space<vmem>>, vector<1x128x128xbf16>
    %31 = vector.shape_cast %30 : vector<1x128x128xbf16> to vector<128x128xbf16>
    %32 = vector.extract_strided_slice %31 {offsets = [16, 0], sizes = [16, 16], strides = [1, 1]} : vector<128x128xbf16> to vector<16x16xbf16>
    %c0_22 = arith.constant 0 : index
    %c0_23 = arith.constant 0 : index
    %33 = vector.load %arg1[%c0_22, %c0_23] : memref<128x128xbf16, #tpu.memory_space<vmem>>, vector<128x128xbf16>
    %34 = arith.extf %1 : vector<128x32xbf16> to vector<128x32xf32>
    %35 = arith.truncf %34 : vector<128x32xf32> to vector<128x32xbf16>
    %cst = arith.constant dense<0.000000e+00> : vector<128x32xf32>
    %36 = tpu.matmul %33, %35, %cst {dimension_numbers = #tpu.dot_dimension_numbers<[1], [0], [0], [1], [0, 0, 1, 1], [], []>} : vector<128x128xbf16>, vector<128x32xbf16>, vector<128x32xf32> -> vector<128x32xf32>
    %37 = arith.mulf %36, %36 : vector<128x32xf32>
    %cst_24 = arith.constant dense<0.000000e+00> : vector<128xf32>
    %38 = vector.multi_reduction <add>, %37, %cst_24 [1] : vector<128x32xf32> to vector<128xf32>
    %39 = vector.shape_cast %38 : vector<128xf32> to vector<128x1xf32>
    %cst_25 = arith.constant 1.000000e-24 : f32
    %40 = vector.broadcast %cst_25 : f32 to vector<128x1xf32>
    %41 = arith.maximumf %39, %40 : vector<128x1xf32>
    %42 = math.rsqrt %41 : vector<128x1xf32>
    %43 = vector.broadcast %42 : vector<128x1xf32> to vector<128x32xf32>
    %44 = arith.mulf %36, %43 : vector<128x32xf32>
    %45 = arith.addf %34, %44 : vector<128x32xf32>
    %46 = arith.truncf %36 : vector<128x32xf32> to vector<128x32xbf16>
    %cst_26 = arith.constant dense<0.000000e+00> : vector<128x32xf32>
    %47 = tpu.matmul %33, %46, %cst_26 {dimension_numbers = #tpu.dot_dimension_numbers<[1], [0], [0], [1], [0, 0, 1, 1], [], []>} : vector<128x128xbf16>, vector<128x32xbf16>, vector<128x32xf32> -> vector<128x32xf32>
    %48 = arith.mulf %47, %47 : vector<128x32xf32>
    %cst_27 = arith.constant dense<0.000000e+00> : vector<128xf32>
    %49 = vector.multi_reduction <add>, %48, %cst_27 [1] : vector<128x32xf32> to vector<128xf32>
    %50 = vector.shape_cast %49 : vector<128xf32> to vector<128x1xf32>
    %cst_28 = arith.constant 1.000000e-24 : f32
    %51 = vector.broadcast %cst_28 : f32 to vector<128x1xf32>
    %52 = arith.maximumf %50, %51 : vector<128x1xf32>
    %53 = math.rsqrt %52 : vector<128x1xf32>
    %54 = vector.broadcast %53 : vector<128x1xf32> to vector<128x32xf32>
    %55 = arith.mulf %47, %54 : vector<128x32xf32>
    %56 = arith.addf %45, %55 : vector<128x32xf32>
    %c0_29 = arith.constant 0 : index
    %c0_30 = arith.constant 0 : index
    %57 = vector.load %arg2[%c0_29, %c0_30] : memref<128x128xbf16, #tpu.memory_space<vmem>>, vector<128x128xbf16>
    %cst_31 = arith.constant dense<0.000000e+00> : vector<128x64xf32>
    %58 = tpu.matmul %2, %7, %cst_31 {dimension_numbers = #tpu.dot_dimension_numbers<[1], [0], [0], [1], [0, 0, 1, 1], [], []>} : vector<128x32xbf16>, vector<32x64xbf16>, vector<128x64xf32> -> vector<128x64xf32>
    %59 = arith.truncf %58 : vector<128x64xf32> to vector<128x64xbf16>
    %cst_32 = arith.constant dense<0.000000e+00> : vector<128x64xf32>
    %60 = tpu.matmul %57, %59, %cst_32 {dimension_numbers = #tpu.dot_dimension_numbers<[1], [0], [0], [1], [0, 0, 1, 1], [], []>} : vector<128x128xbf16>, vector<128x64xbf16>, vector<128x64xf32> -> vector<128x64xf32>
    %61 = vector.broadcast %15 : vector<1x64xf32> to vector<128x64xf32>
    %62 = arith.addf %60, %61 : vector<128x64xf32>
    %63 = arith.truncf %62 : vector<128x64xf32> to vector<128x64xbf16>
    %cst_33 = arith.constant dense<0.000000e+00> : vector<128x32xf32>
    %64 = tpu.matmul %63, %10, %cst_33 {dimension_numbers = #tpu.dot_dimension_numbers<[1], [0], [0], [1], [0, 0, 1, 1], [], []>} : vector<128x64xbf16>, vector<64x32xbf16>, vector<128x32xf32> -> vector<128x32xf32>
    %65 = arith.truncf %64 : vector<128x32xf32> to vector<128x32xbf16>
    %cst_34 = arith.constant dense<0.000000e+00> : vector<128x32xf32>
    %66 = tpu.matmul %57, %65, %cst_34 {dimension_numbers = #tpu.dot_dimension_numbers<[1], [0], [0], [1], [0, 0, 1, 1], [], []>} : vector<128x128xbf16>, vector<128x32xbf16>, vector<128x32xf32> -> vector<128x32xf32>
    %67 = vector.broadcast %16 : vector<1x32xf32> to vector<128x32xf32>
    %68 = arith.addf %66, %67 : vector<128x32xf32>
    %cst_35 = arith.constant 0.999994993 : f32
    %69 = vector.broadcast %cst_35 : f32 to vector<128x32xf32>
    %70 = arith.mulf %68, %69 : vector<128x32xf32>
    %c0_36 = arith.constant 0 : index
    %c0_37 = arith.constant 0 : index
    %71 = vector.load %arg0[%c0_36, %c0_37] : memref<16x1xi32, #tpu.memory_space<vmem>>, vector<16x1xi32>
    %72 = tpu.iota {dimensions = array<i32: 1>} : vector<16x128xi32>
    %73 = vector.broadcast %71 : vector<16x1xi32> to vector<16x128xi32>
    %74 = arith.cmpi eq, %73, %72 : vector<16x128xi32>
    %75 = arith.extui %74 : vector<16x128xi1> to vector<16x128xi32>
    %76 = arith.sitofp %75 : vector<16x128xi32> to vector<16x128xf32>
    %77 = arith.truncf %76 : vector<16x128xf32> to vector<16x128xbf16>
    %78 = arith.truncf %56 : vector<128x32xf32> to vector<128x32xbf16>
    %cst_38 = arith.constant dense<0.000000e+00> : vector<16x32xf32>
    %79 = tpu.matmul %77, %78, %cst_38 {dimension_numbers = #tpu.dot_dimension_numbers<[1], [0], [0], [1], [0, 0, 1, 1], [], []>} : vector<16x128xbf16>, vector<128x32xbf16>, vector<16x32xf32> -> vector<16x32xf32>
    %80 = arith.truncf %70 : vector<128x32xf32> to vector<128x32xbf16>
    %cst_39 = arith.constant dense<0.000000e+00> : vector<16x32xf32>
    %81 = tpu.matmul %77, %80, %cst_39 {dimension_numbers = #tpu.dot_dimension_numbers<[1], [0], [0], [1], [0, 0, 1, 1], [], []>} : vector<16x128xbf16>, vector<128x32xbf16>, vector<16x32xf32> -> vector<16x32xf32>
    %82 = arith.truncf %81 : vector<16x32xf32> to vector<16x32xbf16>
    %cst_40 = arith.constant dense<0.000000e+00> : vector<16x32xf32>
    %83 = tpu.matmul %82, %13, %cst_40 {dimension_numbers = #tpu.dot_dimension_numbers<[1], [0], [0], [1], [0, 0, 1, 1], [], []>} : vector<16x32xbf16>, vector<32x32xbf16>, vector<16x32xf32> -> vector<16x32xf32>
    %84 = vector.broadcast %17 : vector<1x32xf32> to vector<16x32xf32>
    %85 = arith.addf %83, %84 : vector<16x32xf32>
    %c0_41 = arith.constant 0 : index
    %c0_42 = arith.constant 0 : index
    %c0_43 = arith.constant 0 : index
    %86 = vector.load %arg5[%c0_41, %c0_42, %c0_43] : memref<4x32x64xbf16, #tpu.memory_space<vmem>>, vector<1x32x64xbf16>
    %87 = vector.shape_cast %86 : vector<1x32x64xbf16> to vector<32x64xbf16>
    %c1_44 = arith.constant 1 : index
    %c0_45 = arith.constant 0 : index
    %c0_46 = arith.constant 0 : index
    %88 = vector.load %arg5[%c1_44, %c0_45, %c0_46] : memref<4x32x64xbf16, #tpu.memory_space<vmem>>, vector<1x32x64xbf16>
    %89 = vector.shape_cast %88 : vector<1x32x64xbf16> to vector<32x64xbf16>
    %c0_47 = arith.constant 0 : index
    %c0_48 = arith.constant 0 : index
    %c0_49 = arith.constant 0 : index
    %90 = vector.load %arg6[%c0_47, %c0_48, %c0_49] : memref<2x64x32xbf16, #tpu.memory_space<vmem>>, vector<1x64x32xbf16>
    %91 = vector.shape_cast %90 : vector<1x64x32xbf16> to vector<64x32xbf16>
    %92 = arith.truncf %85 : vector<16x32xf32> to vector<16x32xbf16>
    %cst_50 = arith.constant dense<0.000000e+00> : vector<16x64xf32>
    %93 = tpu.matmul %92, %87, %cst_50 {dimension_numbers = #tpu.dot_dimension_numbers<[1], [0], [0], [1], [0, 0, 1, 1], [], []>} : vector<16x32xbf16>, vector<32x64xbf16>, vector<16x64xf32> -> vector<16x64xf32>
    %cst_51 = arith.constant dense<0.000000e+00> : vector<16x64xf32>
    %94 = tpu.matmul %92, %89, %cst_51 {dimension_numbers = #tpu.dot_dimension_numbers<[1], [0], [0], [1], [0, 0, 1, 1], [], []>} : vector<16x32xbf16>, vector<32x64xbf16>, vector<16x64xf32> -> vector<16x64xf32>
    %95 = arith.truncf %94 : vector<16x64xf32> to vector<16x64xbf16>
    %cst_52 = arith.constant dense<0.000000e+00> : vector<128x64xf32>
    %96 = tpu.matmul %25, %95, %cst_52 {dimension_numbers = #tpu.dot_dimension_numbers<[1], [0], [0], [1], [0, 0, 1, 1], [], []>} : vector<128x16xbf16>, vector<16x64xbf16>, vector<128x64xf32> -> vector<128x64xf32>
    %97 = arith.mulf %96, %24 : vector<128x64xf32>
    %98 = arith.truncf %97 : vector<128x64xf32> to vector<128x64xbf16>
    %99 = arith.truncf %93 : vector<16x64xf32> to vector<16x64xbf16>
    %cst_53 = arith.constant dense<0.000000e+00> : vector<16x128xf32>
    %100 = tpu.matmul %99, %98, %cst_53 {dimension_numbers = #tpu.dot_dimension_numbers<[1], [1], [0], [0], [0, 0, 1, 0], [], []>} : vector<16x64xbf16>, vector<128x64xbf16>, vector<16x128xf32> -> vector<16x128xf32>
    %cst_54 = arith.constant 5.000000e-01 : f32
    %101 = vector.broadcast %cst_54 : f32 to vector<16x128xf32>
    %102 = arith.mulf %100, %101 : vector<16x128xf32>
    %103 = arith.addf %102, %29 : vector<16x128xf32>
    %cst_55 = arith.constant dense<0xFF800000> : vector<16xf32>
    %104 = vector.multi_reduction <maximumf>, %103, %cst_55 [1] : vector<16x128xf32> to vector<16xf32>
    %105 = vector.shape_cast %104 : vector<16xf32> to vector<16x1xf32>
    %106 = vector.broadcast %105 : vector<16x1xf32> to vector<16x128xf32>
    %107 = arith.subf %103, %106 : vector<16x128xf32>
    %108 = math.exp %107 : vector<16x128xf32>
    %109 = arith.truncf %108 : vector<16x128xf32> to vector<16x128xbf16>
    %cst_56 = arith.constant dense<0.000000e+00> : vector<16x128xf32>
    %110 = tpu.matmul %109, %20, %cst_56 {dimension_numbers = #tpu.dot_dimension_numbers<[1], [0], [0], [1], [0, 0, 1, 1], [], []>} : vector<16x128xbf16>, vector<128x128xbf16>, vector<16x128xf32> -> vector<16x128xf32>
    %111 = arith.divf %108, %110 : vector<16x128xf32>
    %112 = arith.truncf %111 : vector<16x128xf32> to vector<16x128xbf16>
    %cst_57 = arith.constant dense<0.000000e+00> : vector<16x64xf32>
    %113 = tpu.matmul %112, %98, %cst_57 {dimension_numbers = #tpu.dot_dimension_numbers<[1], [0], [0], [1], [0, 0, 1, 1], [], []>} : vector<16x128xbf16>, vector<128x64xbf16>, vector<16x64xf32> -> vector<16x64xf32>
    %114 = arith.truncf %113 : vector<16x64xf32> to vector<16x64xbf16>
    %cst_58 = arith.constant dense<0.000000e+00> : vector<16x32xf32>
    %115 = tpu.matmul %114, %91, %cst_58 {dimension_numbers = #tpu.dot_dimension_numbers<[1], [0], [0], [1], [0, 0, 1, 1], [], []>} : vector<16x64xbf16>, vector<64x32xbf16>, vector<16x32xf32> -> vector<16x32xf32>
    %c2_59 = arith.constant 2 : index
    %c0_60 = arith.constant 0 : index
    %c0_61 = arith.constant 0 : index
    %116 = vector.load %arg5[%c2_59, %c0_60, %c0_61] : memref<4x32x64xbf16, #tpu.memory_space<vmem>>, vector<1x32x64xbf16>
    %117 = vector.shape_cast %116 : vector<1x32x64xbf16> to vector<32x64xbf16>
    %c3 = arith.constant 3 : index
    %c0_62 = arith.constant 0 : index
    %c0_63 = arith.constant 0 : index
    %118 = vector.load %arg5[%c3, %c0_62, %c0_63] : memref<4x32x64xbf16, #tpu.memory_space<vmem>>, vector<1x32x64xbf16>
    %119 = vector.shape_cast %118 : vector<1x32x64xbf16> to vector<32x64xbf16>
    %c1_64 = arith.constant 1 : index
    %c0_65 = arith.constant 0 : index
    %c0_66 = arith.constant 0 : index
    %120 = vector.load %arg6[%c1_64, %c0_65, %c0_66] : memref<2x64x32xbf16, #tpu.memory_space<vmem>>, vector<1x64x32xbf16>
    %121 = vector.shape_cast %120 : vector<1x64x32xbf16> to vector<64x32xbf16>
    %122 = arith.truncf %79 : vector<16x32xf32> to vector<16x32xbf16>
    %cst_67 = arith.constant dense<0.000000e+00> : vector<16x64xf32>
    %123 = tpu.matmul %122, %117, %cst_67 {dimension_numbers = #tpu.dot_dimension_numbers<[1], [0], [0], [1], [0, 0, 1, 1], [], []>} : vector<16x32xbf16>, vector<32x64xbf16>, vector<16x64xf32> -> vector<16x64xf32>
    %cst_68 = arith.constant dense<0.000000e+00> : vector<16x64xf32>
    %124 = tpu.matmul %122, %119, %cst_68 {dimension_numbers = #tpu.dot_dimension_numbers<[1], [0], [0], [1], [0, 0, 1, 1], [], []>} : vector<16x32xbf16>, vector<32x64xbf16>, vector<16x64xf32> -> vector<16x64xf32>
    %125 = arith.truncf %124 : vector<16x64xf32> to vector<16x64xbf16>
    %cst_69 = arith.constant dense<0.000000e+00> : vector<128x64xf32>
    %126 = tpu.matmul %25, %125, %cst_69 {dimension_numbers = #tpu.dot_dimension_numbers<[1], [0], [0], [1], [0, 0, 1, 1], [], []>} : vector<128x16xbf16>, vector<16x64xbf16>, vector<128x64xf32> -> vector<128x64xf32>
    %127 = arith.mulf %126, %24 : vector<128x64xf32>
    %128 = arith.truncf %127 : vector<128x64xf32> to vector<128x64xbf16>
    %129 = arith.truncf %123 : vector<16x64xf32> to vector<16x64xbf16>
    %cst_70 = arith.constant dense<0.000000e+00> : vector<16x128xf32>
    %130 = tpu.matmul %129, %128, %cst_70 {dimension_numbers = #tpu.dot_dimension_numbers<[1], [1], [0], [0], [0, 0, 1, 0], [], []>} : vector<16x64xbf16>, vector<128x64xbf16>, vector<16x128xf32> -> vector<16x128xf32>
    %cst_71 = arith.constant 5.000000e-01 : f32
    %131 = vector.broadcast %cst_71 : f32 to vector<16x128xf32>
    %132 = arith.mulf %130, %131 : vector<16x128xf32>
    %133 = arith.addf %132, %29 : vector<16x128xf32>
    %cst_72 = arith.constant dense<0xFF800000> : vector<16xf32>
    %134 = vector.multi_reduction <maximumf>, %133, %cst_72 [1] : vector<16x128xf32> to vector<16xf32>
    %135 = vector.shape_cast %134 : vector<16xf32> to vector<16x1xf32>
    %136 = vector.broadcast %135 : vector<16x1xf32> to vector<16x128xf32>
    %137 = arith.subf %133, %136 : vector<16x128xf32>
    %138 = math.exp %137 : vector<16x128xf32>
    %139 = arith.truncf %138 : vector<16x128xf32> to vector<16x128xbf16>
    %cst_73 = arith.constant dense<0.000000e+00> : vector<16x128xf32>
    %140 = tpu.matmul %139, %20, %cst_73 {dimension_numbers = #tpu.dot_dimension_numbers<[1], [0], [0], [1], [0, 0, 1, 1], [], []>} : vector<16x128xbf16>, vector<128x128xbf16>, vector<16x128xf32> -> vector<16x128xf32>
    %141 = arith.divf %138, %140 : vector<16x128xf32>
    %142 = arith.truncf %141 : vector<16x128xf32> to vector<16x128xbf16>
    %cst_74 = arith.constant dense<0.000000e+00> : vector<16x64xf32>
    %143 = tpu.matmul %142, %128, %cst_74 {dimension_numbers = #tpu.dot_dimension_numbers<[1], [0], [0], [1], [0, 0, 1, 1], [], []>} : vector<16x128xbf16>, vector<128x64xbf16>, vector<16x64xf32> -> vector<16x64xf32>
    %144 = arith.truncf %143 : vector<16x64xf32> to vector<16x64xbf16>
    %cst_75 = arith.constant dense<0.000000e+00> : vector<16x32xf32>
    %145 = tpu.matmul %144, %121, %cst_75 {dimension_numbers = #tpu.dot_dimension_numbers<[1], [0], [0], [1], [0, 0, 1, 1], [], []>} : vector<16x64xbf16>, vector<64x32xbf16>, vector<16x32xf32> -> vector<16x32xf32>
    %146 = arith.extf %3 : vector<128x32xbf16> to vector<128x32xf32>
    %147 = arith.addf %70, %146 : vector<128x32xf32>
    %148 = arith.truncf %147 : vector<128x32xf32> to vector<128x32xbf16>
    %149 = arith.extf %4 : vector<128x32xbf16> to vector<128x32xf32>
    %150 = arith.addf %56, %149 : vector<128x32xf32>
    %151 = arith.truncf %150 : vector<128x32xf32> to vector<128x32xbf16>
    %152 = arith.truncf %115 : vector<16x32xf32> to vector<16x32xbf16>
    %cst_76 = arith.constant dense<0.000000e+00> : vector<16x128xf32>
    %153 = tpu.matmul %152, %148, %cst_76 {dimension_numbers = #tpu.dot_dimension_numbers<[1], [1], [0], [0], [0, 0, 1, 0], [], []>} : vector<16x32xbf16>, vector<128x32xbf16>, vector<16x128xf32> -> vector<16x128xf32>
    %154 = arith.truncf %145 : vector<16x32xf32> to vector<16x32xbf16>
    %cst_77 = arith.constant dense<0.000000e+00> : vector<16x128xf32>
    %155 = tpu.matmul %154, %151, %cst_77 {dimension_numbers = #tpu.dot_dimension_numbers<[1], [1], [0], [0], [0, 0, 1, 0], [], []>} : vector<16x32xbf16>, vector<128x32xbf16>, vector<16x128xf32> -> vector<16x128xf32>
    %156 = arith.addf %153, %155 : vector<16x128xf32>
    %157 = vector.broadcast %18 : vector<1x128xf32> to vector<16x128xf32>
    %158 = arith.addf %156, %157 : vector<16x128xf32>
    %cst_78 = arith.constant dense<0.000000e+00> : vector<16x128xf32>
    %159 = tpu.matmul %32, %77, %cst_78 {dimension_numbers = #tpu.dot_dimension_numbers<[1], [0], [0], [1], [0, 0, 1, 1], [], []>} : vector<16x16xbf16>, vector<16x128xbf16>, vector<16x128xf32> -> vector<16x128xf32>
    %cst_79 = arith.constant 0.000000e+00 : f32
    %160 = vector.broadcast %cst_79 : f32 to vector<16x128xf32>
    %161 = arith.cmpf ogt, %159, %160 : vector<16x128xf32>
    %c0_i32 = arith.constant 0 : i32
    %162 = vector.broadcast %c0_i32 : i32 to vector<16x128xi32>
    %163 = arith.cmpi eq, %72, %162 : vector<16x128xi32>
    %164 = arith.ori %161, %163 : vector<16x128xi1>
    %cst_80 = arith.constant 0xFF800000 : f32
    %cst_81 = arith.constant 0.000000e+00 : f32
    %165 = vector.broadcast %cst_80 : f32 to vector<16x128xf32>
    %166 = vector.broadcast %cst_81 : f32 to vector<16x128xf32>
    %167 = arith.select %164, %165, %166 : vector<16x128xi1>, vector<16x128xf32>
    %168 = arith.addf %158, %167 : vector<16x128xf32>
    %c0_82 = arith.constant 0 : index
    %c0_83 = arith.constant 0 : index
    %169 = vector.load %arg9[%c0_82, %c0_83] : memref<16x128xf32, #tpu.memory_space<vmem>>, vector<16x128xf32>
    tpu.vector_store %arg9[%c0_82, %c0_83], %168 {strides = array<i32>} : memref<16x128xf32, #tpu.memory_space<vmem>>, vector<16x128xf32>,
    return
  }
}

</mosaic_0001>

<bundles_post_ra>
// kernel: didp_forward.1
= control target key start
LH: loop header
LB: loop body
LE: loop exit
PB: predicated region body
PF: predicated region fallthrough
CT: control target
= control target key end

     0   :  { %14 = vsyncpa [#allocation3], 0  ;;  %s5104_s0 = inlined_call_operand.vmem [shape: s32[16,1], index: 0, kind: input, shape index: {}]   ;;  %s5105_s1 = inlined_call_operand.hbm [shape: bf16[128,128], index: 1, kind: input, shape index: {}]   ;;  %s5106_s2 = inlined_call_operand.hbm [shape: bf16[128,128], index: 2, kind: input, shape index: {}]   ;;  %s5107_s3 = inlined_call_operand.hbm [shape: bf16[128,128], index: 3, kind: input, shape index: {}]   ;;  %s5108_s4 = inlined_call_operand.vmem [shape: bf16[3,64,64], index: 4, kind: input, shape index: {}]   ;;  %s5109_s5 = inlined_call_operand.hbm [shape: bf16[4,32,64], index: 5, kind: input, shape index: {}]   ;;  %s5110_s6 = inlined_call_operand.vmem [shape: bf16[2,64,32], index: 6, kind: input, shape index: {}]   ;;  %s5111_s7 = inlined_call_operand.vmem [shape: f32[8,128], index: 7, kind: input, shape index: {}]   ;;  %s5112_s8 = inlined_call_operand.hbm [shape: bf16[3,128,128], index: 8, kind: input, shape index: {}]   ;;  %s5113_s9 = inlined_call_operand.hbm [shape: f32[16,128], index: 9, kind: output, shape index: {}]  }
   0x1   :  { %15 = vsyncpa [#allocation6], 0 }
   0x2   :  { %16 = vsyncpa [#allocation9], 0 }
   0x3   :  { %17 = vsyncpa [#allocation4], 0  ;;  %s37_s11 = sshll.u32 %s5106_s2, 4  ;;  %s3259_s12 = smov [#allocation5]   ;;  %s38_s11 = int_to_ptr.hbm [resolvable:$true] %s37_s11 }
   0x4   :  { %s39_s13 = sshll.u32 %s3259_s12, 4  ;;  %s65_s16 = sshll.u32 %s5109_s5, 4  ;;  %s40_s13 = int_to_ptr.vmem [resolvable:$true] %s39_s13  ;;  %s66_s16 = int_to_ptr.hbm [resolvable:$true] %s65_s16 }
   0x5   :  { %s3260_s17 = smov 64   ;;  %s3261_s18 = smov 4  }
   0x6   :  { %45 = dma.hbm_to_vmem [thread:$0]  %s38_s11, 1024, %s40_s13, [#allocation6], %s3260_s17, %s3260_s17, %s3261_s18  }
   0x7   :  { %s3262_s19 = smov [#allocation8]   ;;  %s24_s2 = sshll.u32 %s5105_s1, 4  ;;  %s25_s2 = int_to_ptr.hbm [resolvable:$true] %s24_s2 }
   0x8   :  { %s67_s20 = sshll.u32 %s3262_s19, 4  ;;  %s50_s5 = sshll.u32 %s5107_s3, 4  ;;  %s68_s20 = int_to_ptr.vmem [resolvable:$true] %s67_s20  ;;  %s51_s5 = int_to_ptr.hbm [resolvable:$true] %s50_s5 }
   0x9   :  { %73 = dma.hbm_to_vmem [thread:$0]  %s66_s16, 1024, %s68_s20, [#allocation9], %s3260_s17, %s3260_s17, %s3261_s18  }
   0xa   :  { %s3263_s25 = smov [#allocation2]   ;;  %s3264_s27 = smov [#allocation7]  }
   0xb   :  { %s26_s26 = sshll.u32 %s3263_s25, 4  ;;  %s52_s28 = sshll.u32 %s3264_s27, 4  ;;  %s27_s26 = int_to_ptr.vmem [resolvable:$true] %s26_s26  ;;  %s53_s28 = int_to_ptr.vmem [resolvable:$true] %s52_s28 }
   0xc   :  { %32 = dma.hbm_to_vmem [thread:$0]  %s25_s2, 1024, %s27_s26, [#allocation3], %s3260_s17, %s3260_s17, %s3261_s18  }
   0xd   :  { %s82_s30 = sshll.u32 %s5112_s8, 4  ;;  %s3265_s10 = smov [#allocation10]   ;;  %s83_s30 = int_to_ptr.hbm [resolvable:$true] %s82_s30 }
   0xe   :  { %58 = dma.hbm_to_vmem [thread:$0]  %s51_s5, 1024, %s53_s28, [#allocation6], %s3260_s17, %s3260_s17, %s3261_s18  }
   0xf   :  { %s84_s3 = sshll.u32 %s3265_s10, 4  ;;  %s85_s3 = int_to_ptr.vmem [resolvable:$true] %s84_s3 }
  0x10   :  { %90 = dma.hbm_to_vmem [thread:$0]  %s83_s30, 3072, %s85_s3, [#allocation9], %s3260_s17, %s3260_s17, %s3261_s18  }
  0x11   :  { %3251 = dma.done.wait [#allocation3], 1024  }
  0x12   :  { %3252 = vsyncadd [#allocation3], 4294966272 }
  0x13   :  { %3253 = dma.done.wait [#allocation6], 2048  }
  0x14   :  { %3254 = vsyncadd [#allocation6], 4294965248 }
  0x15   :  { %3255 = dma.done.wait [#allocation9], 4096  }
  0x16   :  { %3256 = vsyncadd [#allocation9], 4294963200  ;;  %v2858_v0 = vld [vmem:[#allocation7 + $0x38] sm:$0xff]  ;;  %v2851_v1 = vld [vmem:[#allocation7] sm:$0xff]  ;;  %s3266_s8 = smov 96   ;;  %vm5142_vm0 = vcmask 261120  }
  0x17   :  { %v2855_v2 = vld [vmem:[#allocation7 + $0x20] sm:$0xff]  ;;  %331 = vmatpush.bf16.msra.mxu0 %v2858_v0  ;;  %998 = vrot.lane.b32.xlu0 %v2851_v1, %s3266_s8  ;;  %v2857_v3 = vld [vmem:[#allocation7 + $0x30] sm:$0xff]  ;;  %v2856_v5 = vld [vmem:[#allocation7 + $0x28] sm:$0xff]  ;;  %vm5143_vm1 = vcmask 523264   ;;  %s2504_s26 = sshll.u32 %s5113_s9, 4  ;;  %s3272_s27 = smov 128   ;;  %s2505_s26 = int_to_ptr.hbm [resolvable:$true] %s2504_s26 }
  0x18   :  { %v2853_v4 = vld [vmem:[#allocation7 + $0x10] sm:$0xff]  ;;  %1006 = vrot.lane.b32.xlu2 %v2855_v2, %s3266_s8  ;;  %v2852_v6 = vld [vmem:[#allocation7 + $0x8] sm:$0xff]  ;;  %v2854_v7 = vld [vmem:[#allocation7 + $0x18] sm:$0xff]  ;;  %s3273_s28 = smov 8  }
  0x19   :  { %1002 = vrot.lane.b32.xlu1 %v2853_v4, %s3266_s8  ;;  %v3349_v8 = vld [vmem:[#allocation2] sm:$0xff]  ;;  %v3352_v9 = vld [vmem:[#allocation2 + $0x8] sm:$0xff]  ;;  %v3355_v10 = vld [vmem:[#allocation2 + $0x10] sm:$0xff] }
  0x1a   :  { %v2860_v11 = vld [vmem:[%s5108_s4 + $0x8] sm:$0xff]  ;;  %v3361_v12 = vld [vmem:[#allocation2 + $0x18] sm:$0xff]  ;;  %v2859_v13 = vld [vmem:[%s5108_s4] sm:$0xff] }
  0x1b   :  { %332 = vmatpush.bf16.msra.mxu0 %v2857_v3  ;;  %1056 = vmatpush.bf16.msra.mxu2 %v2860_v11  ;;  %v3367_v14 = vld [vmem:[#allocation2 + $0x20] sm:$0xff]  ;;  %v3370_v15 = vld [vmem:[#allocation2 + $0x28] sm:$0xff]  ;;  %v3374_v17 = vld [vmem:[#allocation2 + $0x30] sm:$0xff] }
  0x1c   :  { %v3378_v19 = vld [vmem:[#allocation2 + $0x38] sm:$0xff]  ;;  %v2893_v11 = vld [vmem:[#allocation5 + $0x8] sm:$0xff] }
  0x1f   :  { %333 = vmatpush.bf16.msra.mxu0 %v2856_v5  ;;  %1000 = vrot.lane.b32.xlu0 %v2852_v6, %s3266_s8 }
  0x20   :  { %1008 = vrot.lane.b32.xlu2 %v2856_v5, %s3266_s8  ;;  %1057 = vmatpush.bf16.msra.mxu2 %v2859_v13  ;;  %v2894_v13 = vld [vmem:[#allocation5 + $0x10] sm:$0xff] }
  0x21   :  { %1004 = vrot.lane.b32.xlu1 %v2854_v7, %s3266_s8 }
  0x23   :  { %334 = vmatpush.bf16.msra.mxu0 %v2855_v2 }
  0x27   :  { %335 = vmatpush.bf16.msra.mxu0 %v2854_v7  ;;  %1010 = vrot.lane.b32.xlu0 %v2857_v3, %s3266_s8 }
  0x29   :  { %1012 = vrot.lane.b32.xlu1 %v2858_v0, %s3266_s8 }
  0x2b   :  { %336 = vmatpush.bf16.msra.mxu0 %v2853_v4 }
  0x2f   :  { %337 = vmatpush.bf16.msra.mxu0 %v2852_v6 }
  0x33   :  { %338 = vmatpush.bf16.msra.mxu0 %v2851_v1 }
  0x36   :  { %339 = vmatmul.bf16.vlgmr.msra.gmra.mxu0 %v3349_v8 }
  0x46   :  { %344 = vmatmul.bf16.gmra.mxu0 %v3352_v9 }
  0x56   :  { %349 = vmatmul.bf16.gmra.mxu0 %v3355_v10 }
  0x66   :  { %354 = vmatmul.bf16.gmra.mxu0 %v3361_v12 }
  0x72   :  { %v1007_v25 = vpop.permute.xlu2 %1006 }
  0x76   :  { %359 = vmatmul.bf16.gmra.mxu0 %v3367_v14 }
  0x7a   :  { %v1009_v28 = vpop.permute.xlu2 %1008 }
  0x86   :  { %364 = vmatmul.bf16.gmra.mxu0 %v3370_v15 }
  0x89   :  { %v999_v16 = vpop.permute.xlu0 %998 }
  0x8a   :  { %2603 = vmatmul.msk.bf16.vlgmr.msra.gmra.mxu2 %vm5142_vm0, %v999_v16 }
  0x8b   :  { %v1003_v20 = vpop.permute.xlu1 %1002 }
  0x91   :  { %v1001_v18 = vpop.permute.xlu0 %1000 }
  0x93   :  { %v1005_v22 = vpop.permute.xlu1 %1004 }
  0x96   :  { %369 = vmatmul.bf16.gmra.mxu0 %v3374_v17 }
  0x99   :  { %v1011_v31 = vpop.permute.xlu0 %1010 }
  0x9a   :  { %2604 = vmatmul.msk.bf16.gmra.mxu2 %vm5142_vm0, %v1001_v18  ;;  %v2895_v18 = vld [vmem:[#allocation5 + $0x18] sm:$0xff] }
  0x9b   :  { %v1013_v34 = vpop.permute.xlu1 %1012 }
  0xa6   :  { %374 = vmatmul.bf16.gmra.mxu0 %v3378_v19 }
  0xaa   :  { %2605 = vmatmul.msk.bf16.gmra.mxu2 %vm5142_vm0, %v1003_v20 }
  0xb3   :  { %v3382_v21 = vpop.f32.mrf.mxu0 }
  0xb4   :  { %5207 = vst [vmem:[#allocation16_spill] sm:$0xff] %v3382_v21 }
  0xba   :  { %2606 = vmatmul.msk.bf16.gmra.mxu2 %vm5142_vm0, %v1005_v22 }
  0xbb   :  { %v3385_v23 = vpop.f32.mrf.mxu0 }
  0xbc   :  { %5208 = vst [vmem:[#allocation17_spill] sm:$0xff] %v3385_v23  ;;  %v653_v57 = vpack.c.bf16 %v3385_v23, %v3382_v21 }
  0xc3   :  { %v3387_v24 = vpop.f32.mrf.mxu0 }
  0xc4   :  { %5209 = vst [vmem:[#allocation18_spill] sm:$0xff] %v3387_v24 }
  0xca   :  { %2607 = vmatmul.msk.bf16.gmra.mxu2 %vm5142_vm0, %v1007_v25 }
  0xcb   :  { %v3390_v26 = vpop.f32.mrf.mxu0 }
  0xcc   :  { %5210 = vst [vmem:[#allocation19_spill] sm:$0xff] %v3390_v26  ;;  %v654_v55 = vpack.c.bf16 %v3390_v26, %v3387_v24 }
  0xd3   :  { %v3392_v27 = vpop.f32.mrf.mxu0 }
  0xd4   :  { %5211 = vst [vmem:[#allocation20_spill] sm:$0xff] %v3392_v27 }
  0xda   :  { %2608 = vmatmul.msk.bf16.gmra.mxu2 %vm5142_vm0, %v1009_v28 }
  0xdb   :  { %v3395_v29 = vpop.f32.mrf.mxu0 }
  0xdc   :  { %5212 = vst [vmem:[#allocation21_spill] sm:$0xff] %v3395_v29  ;;  %v655_v54 = vpack.c.bf16 %v3395_v29, %v3392_v27 }
  0xe3   :  { %v3397_v30 = vpop.f32.mrf.mxu0 }
  0xe4   :  { %5213 = vst [vmem:[#allocation22_spill] sm:$0xff] %v3397_v30 }
  0xea   :  { %2609 = vmatmul.msk.bf16.gmra.mxu2 %vm5142_vm0, %v1011_v31  ;;  %v2896_v31 = vld [vmem:[#allocation5 + $0x20] sm:$0xff] }
  0xeb   :  { %v3400_v32 = vpop.f32.mrf.mxu0 }
  0xec   :  { %5214 = vst [vmem:[#allocation23_spill] sm:$0xff] %v3400_v32  ;;  %v656_v52 = vpack.c.bf16 %v3400_v32, %v3397_v30 }
  0xf3   :  { %v3402_v33 = vpop.f32.mrf.mxu0 }
  0xf4   :  { %5215 = vst [vmem:[#allocation24_spill] sm:$0xff] %v3402_v33  ;;  %v388_v20 = vmul.f32 %v3402_v33, %v3402_v33 }
  0xf6   :  { %v421_v22 = vsel %vm5142_vm0, %v388_v20, 0.0 }
  0xf7   :  { %422 = vadd.xlane.f32.xlu1 %v421_v22 }
  0xfa   :  { %2610 = vmatmul.msk.bf16.gmra.mxu2 %vm5142_vm0, %v1013_v34 }
  0xfb   :  { %v3405_v35 = vpop.f32.mrf.mxu0 }
  0xfc   :  { %5216 = vst [vmem:[#allocation25_spill] sm:$0xff] %v3405_v35  ;;  %v657_v51 = vpack.c.bf16 %v3405_v35, %v3402_v33 }
 0x103   :  { %v3407_v36 = vpop.f32.mrf.mxu0 }
 0x10b   :  { %v3409_v37 = vpop.f32.mrf.mxu0 }
 0x10c   :  { %v658_v49 = vpack.c.bf16 %v3409_v37, %v3407_v36  ;;  %v391_v28 = vmul.f32 %v3409_v37, %v3409_v37 }
 0x10d   :  { %v1059_v38 = vpop.f32.mrf.mxu2 }
 0x10e   :  { %v430_v34 = vsel %vm5142_vm0, %v391_v28, 0.0 }
 0x10f   :  { %431 = vadd.xlane.f32.xlu1 %v430_v34 }
 0x113   :  { %v3411_v39 = vpop.f32.mrf.mxu0 }
 0x115   :  { %v1061_v40 = vpop.f32.mrf.mxu2 }
 0x11b   :  { %v3413_v41 = vpop.f32.mrf.mxu0 }
 0x11c   :  { %v659_v48 = vpack.c.bf16 %v3413_v41, %v3411_v39 }
 0x11d   :  { %v1064_v42 = vpop.f32.mrf.mxu2 }
 0x123   :  { %v3415_v43 = vpop.f32.mrf.mxu0 }
 0x125   :  { %v1066_v44 = vpop.f32.mrf.mxu2 }
 0x12b   :  { %v3417_v45 = vpop.f32.mrf.mxu0 }
 0x12c   :  { %v660_v46 = vpack.c.bf16 %v3417_v45, %v3415_v43 }
 0x12d   :  { %v1069_v47 = vpop.f32.mrf.mxu2 }
 0x12e   :  { %661 = vmatpush.bf16.msra.mxu1 %v660_v46 }
 0x132   :  { %662 = vmatpush.bf16.msra.mxu1 %v659_v48  ;;  %v2897_v48 = vld [vmem:[#allocation5 + $0x28] sm:$0xff] }
 0x135   :  { %v1071_v50 = vpop.f32.mrf.mxu2 }
 0x136   :  { %663 = vmatpush.bf16.msra.mxu1 %v658_v49  ;;  %v1101_v7 = vpack.c.bf16 %v1071_v50, %v1069_v47  ;;  %v389_v49 = vmul.f32 %v3405_v35, %v3405_v35  ;;  %v394_v50 = vmul.f32 %v3415_v43, %v3415_v43 }
 0x13a   :  { %664 = vmatpush.bf16.msra.mxu1 %v657_v51  ;;  %v424_v51 = vsel %vm5142_vm0, %v389_v49, 0.0  ;;  %v385_v49 = vmul.f32 %v3395_v29, %v3395_v29 }
 0x13d   :  { %v1074_v53 = vpop.f32.mrf.mxu2 }
 0x13e   :  { %665 = vmatpush.bf16.msra.mxu1 %v656_v52  ;;  %v439_v52 = vsel %vm5142_vm0, %v394_v50, 0.0 }
 0x142   :  { %666 = vmatpush.bf16.msra.mxu1 %v655_v54 }
 0x145   :  { %v1076_v56 = vpop.f32.mrf.mxu2 }
 0x146   :  { %667 = vmatpush.bf16.msra.mxu1 %v654_v55  ;;  %v1102_v6 = vpack.c.bf16 %v1076_v56, %v1074_v53  ;;  %v2864_v53 = vld [vmem:[%s5108_s4 + $0x38] sm:$0xff]  ;;  %v387_v56 = vmul.f32 %v3400_v32, %v3400_v32 }
 0x147   :  { %1266 = vmatpush.bf16.msrb.mxu2 %v2864_v53 }
 0x14a   :  { %668 = vmatpush.bf16.msra.mxu1 %v653_v57  ;;  %v393_v57 = vmul.f32 %v3413_v41, %v3413_v41 }
 0x14d   :  { %669 = vmatmul.bf16.vlgmr.msra.gmra.mxu1 %v3349_v8  ;;  %v1079_v58 = vpop.f32.mrf.mxu2  ;;  %v1100_v8 = vpack.c.bf16 %v1066_v44, %v1064_v42  ;;  %v392_v42 = vmul.f32 %v3411_v39, %v3411_v39 }
 0x14f   :  { %v433_v46 = vsel %vm5142_vm0, %v392_v42, 0.0 }
 0x150   :  { %434 = vadd.xlane.f32.xlu1 %v433_v46 }
 0x155   :  { %v1081_v59 = vpop.f32.mrf.mxu2 }
 0x156   :  { %v1103_v5 = vpack.c.bf16 %v1081_v59, %v1079_v58  ;;  %v418_v58 = vsel %vm5142_vm0, %v387_v56, 0.0  ;;  %v436_v59 = vsel %vm5142_vm0, %v393_v57, 0.0  ;;  %v412_v56 = vsel %vm5142_vm0, %v385_v49, 0.0 }
 0x157   :  { %v383_v49 = vmul.f32 %v3390_v26, %v3390_v26 }
 0x158   :  { %440 = vadd.xlane.f32.xlu1 %v439_v52 }
 0x15d   :  { %674 = vmatmul.bf16.gmra.mxu1 %v3352_v9  ;;  %v1084_v60 = vpop.f32.mrf.mxu2  ;;  %v1099_v9 = vpack.c.bf16 %v1061_v40, %v1059_v38  ;;  %v386_v40 = vmul.f32 %v3397_v30, %v3397_v30 }
 0x15f   :  { %v415_v44 = vsel %vm5142_vm0, %v386_v40, 0.0 }
 0x165   :  { %v1086_v61 = vpop.f32.mrf.mxu2 }
 0x166   :  { %v1104_v4 = vpack.c.bf16 %v1086_v61, %v1084_v60 }
 0x16d   :  { %679 = vmatmul.bf16.gmra.mxu1 %v3355_v10  ;;  %v1089_v62 = vpop.f32.mrf.mxu2  ;;  %v2892_v10 = vld [vmem:[#allocation5] sm:$0xff] }
 0x175   :  { %v1091_v63 = vpop.f32.mrf.mxu2 }
 0x176   :  { %v1105_v3 = vpack.c.bf16 %v1091_v63, %v1089_v62  ;;  %v2898_v62 = vld [vmem:[#allocation5 + $0x30] sm:$0xff]  ;;  %v390_v63 = vmul.f32 %v3407_v36, %v3407_v36 }
 0x17d   :  { %684 = vmatmul.bf16.gmra.mxu1 %v3361_v12  ;;  %v1094_v0 = vpop.f32.mrf.mxu2  ;;  %v1385_v12 = vld [vmem:[%s5104_s0] sm:$0xff] }
 0x185   :  { %v1096_v1 = vpop.f32.mrf.mxu2 }
 0x186   :  { %v1106_v2 = vpack.c.bf16 %v1096_v1, %v1094_v0  ;;  %v395_v0 = vmul.f32 %v3417_v45, %v3417_v45  ;;  %v427_v1 = vsel %vm5142_vm0, %v390_v63, 0.0 }
 0x188   :  { %1156 = vmatpush.bf16.msra.mxu3 %v1106_v2  ;;  %v442_v2 = vsel %vm5142_vm0, %v395_v0, 0.0 }
 0x18c   :  { %1157 = vmatpush.bf16.msra.mxu3 %v1105_v3 }
 0x18d   :  { %689 = vmatmul.bf16.gmra.mxu1 %v3367_v14  ;;  %v3267_v14 = vmov 0  }
 0x18e   :  { %2935 = vset.pattern.permute.xlu2 %v3267_v14  ;;  %2936 = vset.pattern.permute.xlu0 %v3267_v14 }
 0x18f   :  { %1390 = vperm.xlu2 %2935, %v1385_v12  }
 0x190   :  { %1158 = vmatpush.bf16.msra.mxu3 %v1104_v4  ;;  %v2863_v4 = vld [vmem:[%s5108_s4 + $0x30] sm:$0xff] }
 0x191   :  { %1267 = vmatpush.bf16.msrb.mxu2 %v2863_v4 }
 0x194   :  { %1159 = vmatpush.bf16.msra.mxu3 %v1103_v5 }
 0x198   :  { %1160 = vmatpush.bf16.msra.mxu3 %v1102_v6 }
 0x19c   :  { %1161 = vmatpush.bf16.msra.mxu3 %v1101_v7 }
 0x19d   :  { %694 = vmatmul.bf16.gmra.mxu1 %v3370_v15 }
 0x1a0   :  { %1162 = vmatpush.bf16.msra.mxu3 %v1100_v8 }
 0x1a4   :  { %1163 = vmatpush.bf16.msra.mxu3 %v1099_v9  ;;  %v2862_v9 = vld [vmem:[%s5108_s4 + $0x28] sm:$0xff] }
 0x1a5   :  { %1268 = vmatpush.bf16.msrb.mxu2 %v2862_v9 }
 0x1a7   :  { %1164 = vmatmul.bf16.vlgmr.msra.gmra.mxu3 %v2892_v10 }
 0x1ad   :  { %699 = vmatmul.bf16.gmra.mxu1 %v3374_v17  ;;  %v1386_v17 = vld [vmem:[%s5104_s0 + $0x8] sm:$0xff] }
 0x1ae   :  { %1393 = vperm.xlu0 %2936, %v1386_v17  }
 0x1b7   :  { %1169 = vmatmul.bf16.gmra.mxu3 %v2893_v11  ;;  %v2861_v11 = vld [vmem:[%s5108_s4 + $0x20] sm:$0xff] }
 0x1b8   :  { %416 = vadd.xlane.f32.xlu2 %v415_v44  ;;  %1269 = vmatpush.bf16.msrb.mxu2 %v2861_v11  ;;  %v146_v44 = vld [vmem:[%s5111_s7] sm:$0xff] }
 0x1bd   :  { %704 = vmatmul.bf16.gmra.mxu1 %v3378_v19 }
 0x1c0   :  { %425 = vadd.xlane.f32.xlu2 %v424_v51 }
 0x1c7   :  { %1174 = vmatmul.bf16.gmra.mxu3 %v2894_v13  ;;  %v2899_v13 = vld [vmem:[#allocation5 + $0x38] sm:$0xff] }
 0x1c8   :  { %437 = vadd.xlane.f32.xlu2 %v436_v59  ;;  %v382_v59 = vmul.f32 %v3387_v24, %v3387_v24 }
 0x1ca   :  { %v3446_v15 = vpop.f32.mrf.mxu1  ;;  %v403_v0 = vsel %vm5142_vm0, %v382_v59, 0.0  ;;  %v380_v59 = vmul.f32 %v3382_v21, %v3382_v21 }
 0x1cb   :  { %5217 = vst [vmem:[#allocation26_spill] sm:$0xff] %v3446_v15 }
 0x1d0   :  { %443 = vadd.xlane.f32.xlu2 %v442_v2  ;;  %v384_v2 = vmul.f32 %v3392_v27, %v3392_v27 }
 0x1d2   :  { %v3448_v16 = vpop.f32.mrf.mxu1  ;;  %v409_v11 = vsel %vm5142_vm0, %v384_v2, 0.0 }
 0x1d3   :  { %5218 = vst [vmem:[#allocation27_spill] sm:$0xff] %v3448_v16  ;;  %v711_v2 = vmul.f32 %v3448_v16, %v3448_v16 }
 0x1d7   :  { %1179 = vmatmul.bf16.gmra.mxu3 %v2895_v18 }
 0x1d8   :  { %419 = vadd.xlane.f32.xlu0 %v418_v58 }
 0x1da   :  { %v3453_v19 = vpop.f32.mrf.mxu1 }
 0x1db   :  { %5219 = vst [vmem:[#allocation28_spill] sm:$0xff] %v3453_v19 }
 0x1e0   :  { %428 = vadd.xlane.f32.xlu0 %v427_v1 }
 0x1e2   :  { %v3458_v25 = vpop.f32.mrf.mxu1 }
 0x1e3   :  { %5220 = vst [vmem:[#allocation29_spill] sm:$0xff] %v3458_v25  ;;  %v713_v4 = vmul.f32 %v3458_v25, %v3458_v25 }
 0x1e7   :  { %1184 = vmatmul.bf16.gmra.mxu3 %v2896_v31 }
 0x1ea   :  { %v3463_v38 = vpop.f32.mrf.mxu1 }
 0x1eb   :  { %5221 = vst [vmem:[#allocation30_spill] sm:$0xff] %v3463_v38 }
 0x1f2   :  { %v3471_v47 = vpop.f32.mrf.mxu1 }
 0x1f3   :  { %5222 = vst [vmem:[#allocation31_spill] sm:$0xff] %v3471_v47 }
 0x1f7   :  { %1189 = vmatmul.bf16.gmra.mxu3 %v2897_v48  ;;  %v3541_v48 = vperm.slane %v146_v44, 0 }
 0x1fa   :  { %v3482_v54 = vpop.f32.mrf.mxu1 }
 0x1fb   :  { %5223 = vst [vmem:[#allocation32_spill] sm:$0xff] %v3482_v54  ;;  %v716_v55 = vmul.f32 %v3482_v54, %v3482_v54 }
 0x1fd   :  { %v744_v60 = vsel %vm5142_vm0, %v716_v55, 0.0 }
 0x1fe   :  { %745 = vadd.xlane.f32.xlu1 %v744_v60 }
 0x202   :  { %v3493_v61 = vpop.f32.mrf.mxu1 }
 0x203   :  { %5224 = vst [vmem:[#allocation33_spill] sm:$0xff] %v3493_v61  ;;  %v717_v6 = vmul.f32 %v3493_v61, %v3493_v61 }
 0x205   :  { %v747_v8 = vsel %vm5142_vm0, %v717_v6, 0.0 }
 0x206   :  { %748 = vadd.xlane.f32.xlu2 %v747_v8 }
 0x207   :  { %1194 = vmatmul.bf16.gmra.mxu3 %v2898_v62 }
 0x20a   :  { %v3501_v3 = vpop.f32.mrf.mxu1 }
 0x20b   :  { %5225 = vst [vmem:[#allocation34_spill] sm:$0xff] %v3501_v3  ;;  %v718_v5 = vmul.f32 %v3501_v3, %v3501_v3 }
 0x20d   :  { %v750_v7 = vsel %vm5142_vm0, %v718_v5, 0.0 }
 0x20e   :  { %751 = vadd.xlane.f32.xlu0 %v750_v7 }
 0x212   :  { %v3515_v10 = vpop.f32.mrf.mxu1 }
 0x213   :  { %5226 = vst [vmem:[#allocation35_spill] sm:$0xff] %v3515_v10  ;;  %v719_v12 = vmul.f32 %v3515_v10, %v3515_v10 }
 0x215   :  { %v753_v14 = vsel %vm5142_vm0, %v719_v12, 0.0  ;;  %v735_v12 = vsel %vm5142_vm0, %v713_v4, 0.0  ;;  %v1391_v4 = vpop.permute.xlu2 %1390 }
 0x216   :  { %754 = vadd.xlane.f32.xlu1 %v753_v14 }
 0x217   :  { %1199 = vmatmul.bf16.gmra.mxu3 %v2899_v13 }
 0x21a   :  { %v3523_v17 = vpop.f32.mrf.mxu1 }
 0x21b   :  { %v720_v18 = vmul.f32 %v3523_v17, %v3523_v17 }
 0x21d   :  { %v756_v20 = vsel %vm5142_vm0, %v720_v18, 0.0  ;;  %v714_v18 = vmul.f32 %v3463_v38, %v3463_v38 }
 0x21e   :  { %757 = vadd.xlane.f32.xlu2 %v756_v20  ;;  %v715_v20 = vmul.f32 %v3471_v47, %v3471_v47 }
 0x222   :  { %v3528_v22 = vpop.f32.mrf.mxu1 }
 0x223   :  { %5227 = vst [vmem:[#allocation36_spill] sm:$0xff] %v3528_v22  ;;  %v721_v28 = vmul.f32 %v3528_v22, %v3528_v22 }
 0x225   :  { %v759_v31 = vsel %vm5142_vm0, %v721_v28, 0.0  ;;  %v710_v28 = vmul.f32 %v3446_v15, %v3446_v15 }
 0x226   :  { %760 = vadd.xlane.f32.xlu0 %v759_v31 }
 0x227   :  { %v726_v44 = vsel %vm5142_vm0, %v710_v28, 0.0 }
 0x22a   :  { %v3533_v34 = vpop.f32.mrf.mxu1  ;;  %v1165_v40 = vpop.f32.mrf.mxu3 }
 0x22b   :  { %v722_v42 = vmul.f32 %v3533_v34, %v3533_v34  ;;  %v1166_v52 = vadd.f32 %v1165_v40, %v3541_v48  ;;  %v741_v40 = vsel %vm5142_vm0, %v715_v20, 0.0  ;;  %v417_v28 = vpop.xlane.xlu2 %416 }
 0x22d   :  { %v762_v46 = vsel %vm5142_vm0, %v722_v42, 0.0  ;;  %v738_v42 = vsel %vm5142_vm0, %v714_v18, 0.0  ;;  %v5231_v18 = vmov 0 }
 0x22e   :  { %763 = vadd.xlane.f32.xlu1 %v762_v46  ;;  %v712_v46 = vmul.f32 %v3453_v19, %v3453_v19 }
 0x232   :  { %v3545_v50 = vpop.f32.mrf.mxu1  ;;  %v1167_v51 = vpop.f32.mrf.mxu3 }
 0x233   :  { %v723_v53 = vmul.f32 %v3545_v50, %v3545_v50  ;;  %v1168_v55 = vadd.f32 %v1167_v51, %v3541_v48 }
 0x235   :  { %v1205_v57 = vpack.c.bf16 %v1168_v55, %v1166_v52  ;;  %v765_v58 = vsel %vm5142_vm0, %v723_v53, 0.0  ;;  %v732_v55 = vsel %vm5142_vm0, %v712_v46, 0.0  ;;  %v426_v46 = vpop.xlane.xlu2 %425 }
 0x236   :  { %413 = vadd.xlane.f32.xlu1 %v412_v56  ;;  %766 = vadd.xlane.f32.xlu2 %v765_v58  ;;  %v406_v56 = vsel %vm5142_vm0, %v383_v49, 0.0  ;;  %v381_v58 = vmul.f32 %v3385_v23, %v3385_v23 }
 0x237   :  { %2659 = vmatmul.msk.bf16.vlgmr.msrb.gmra.mxu2 %vm5143_vm1, %v1205_v57 }
 0x23a   :  { %v3556_v60 = vpop.f32.mrf.mxu1  ;;  %v1170_v62 = vpop.f32.mrf.mxu3 }
 0x23b   :  { %5228 = vst [vmem:[#allocation37_spill] sm:$0xff] %v3556_v60  ;;  %v724_v63 = vmul.f32 %v3556_v60, %v3556_v60  ;;  %v1171_v7 = vadd.f32 %v1170_v62, %v3541_v48 }
 0x23d   :  { %v768_v1 = vsel %vm5142_vm0, %v724_v63, 0.0  ;;  %v400_v63 = vsel %vm5142_vm0, %v381_v58, 0.0  ;;  %v3623_v58 = vmax.f32 %v417_v28, 1e-24 }
 0x23e   :  { %404 = vadd.xlane.f32.xlu1 %v403_v0  ;;  %769 = vadd.xlane.f32.xlu0 %v768_v1  ;;  %v397_v0 = vsel %vm5142_vm0, %v380_v59, 0.0  ;;  %v1387_v1 = vlaneseq }
 0x23f   :  { %vm527_vm10 = vweird.f32 %v3623_v58 }
 0x242   :  { %v3566_v5 = vpop.f32.mrf.mxu1  ;;  %v1172_v6 = vpop.f32.mrf.mxu3 }
 0x243   :  { %5229 = vst [vmem:[#allocation38_spill] sm:$0xff] %v3566_v5  ;;  %v725_v8 = vmul.f32 %v3566_v5, %v3566_v5  ;;  %v1173_v9 = vadd.f32 %v1172_v6, %v3541_v48 }
 0x245   :  { %v1206_v13 = vpack.c.bf16 %v1173_v9, %v1171_v7  ;;  %v771_v14 = vsel %vm5142_vm0, %v725_v8, 0.0  ;;  %v3602_v7 = vand.u32 127, %v1387_v1 }
 0x246   :  { %410 = vadd.xlane.f32.xlu0 %v409_v11  ;;  %772 = vadd.xlane.f32.xlu2 %v771_v14  ;;  %v729_v11 = vsel %vm5142_vm0, %v711_v2, 0.0  ;;  %v1394_v14 = vpop.permute.xlu0 %1393 }
 0x247   :  { %2660 = vmatmul.msk.bf16.gmra.mxu2 %vm5143_vm1, %v1206_v13  ;;  %736 = vadd.xlane.f32.xlu1 %v735_v12  ;;  %5230 = vst [vmem:[#allocation39_spill] sm:$0xff] %v3602_v7  ;;  %v423_v12 = vpop.xlane.xlu1 %422  ;;  %vm1395_vm2 = vcmp.eq.s32.totalorder %v1391_v4, %v3602_v7  ;;  %vm1396_vm3 = vcmp.eq.s32.totalorder %v1394_v14, %v3602_v7 }
 0x248   :  { %vm3610_vm4 = vmpackc.low %vm1396_vm3, %vm1395_vm2 }
 0x249   :  { %v5232_v18 = vsel %vm3610_vm4, 4294967295, %v5231_v18 }
 0x24a   :  { %v1175_v31 = vpop.f32.mrf.mxu3  ;;  %5233 = vst [vmem:[#allocation40_spill] sm:$0xff] %v5232_v18 }
 0x24b   :  { %v1176_v52 = vadd.f32 %v1175_v31, %v3541_v48 }
 0x24e   :  { %742 = vadd.xlane.f32.xlu0 %v741_v40  ;;  %739 = vadd.xlane.f32.xlu2 %v738_v42 }
 0x24f   :  { %727 = vadd.xlane.f32.xlu1 %v726_v44  ;;  %v432_v31 = vpop.xlane.xlu1 %431 }
 0x252   :  { %v1177_v51 = vpop.f32.mrf.mxu3 }
 0x253   :  { %v1178_v53 = vadd.f32 %v1177_v51, %v3541_v48  ;;  %v3617_v51 = vmax.f32 %v423_v12, 1e-24 }
 0x255   :  { %v1207_v57 = vpack.c.bf16 %v1178_v53, %v1176_v52  ;;  %3017 = vrsqrt.f32 %v3617_v51  ;;  %vm547_vm5 = vweird.f32 %v3617_v51 }
 0x256   :  { %733 = vadd.xlane.f32.xlu0 %v732_v55  ;;  %407 = vadd.xlane.f32.xlu2 %v406_v56  ;;  %v420_v55 = vpop.xlane.xlu0 %419  ;;  %v3620_v56 = vmax.f32 %v432_v31, 1e-24 }
 0x257   :  { %2661 = vmatmul.msk.bf16.gmra.mxu2 %vm5143_vm1, %v1207_v57  ;;  %v435_v52 = vpop.xlane.xlu1 %434  ;;  %v438_v57 = vpop.xlane.xlu2 %437 }
 0x258   :  { %3019 = vrsqrt.f32 %v3620_v56  ;;  %v3629_v2 = vmax.f32 %v435_v52, 1e-24  ;;  %vm577_vm8 = vweird.f32 %v3620_v56 }
 0x259   :  { %3021 = vrsqrt.f32 %v3623_v58 }
 0x25a   :  { %v1180_v62 = vpop.f32.mrf.mxu3  ;;  %3023 = vrsqrt.f32 %v3629_v2  ;;  %vm587_vm12 = vweird.f32 %v3629_v2 }
 0x25b   :  { %v1181_v8 = vadd.f32 %v1180_v62, %v3541_v48  ;;  %v3625_v59 = vpop.eup %3017 }
 0x25c   :  { %5234 = vst [vmem:[#allocation41_spill] sm:$0xff] %v3625_v59  ;;  %v542_v4 = vmul.f32 %v3625_v59, %v3617_v51  ;;  %vm548_vm6 = vweird.f32 %v3625_v59  ;;  %v5238_v51 = vmov 0 }
 0x25d   :  { %vm3694_vm7 = vmor %vm547_vm5, %vm548_vm6 }
 0x25e   :  { %401 = vadd.xlane.f32.xlu0 %v400_v63  ;;  %398 = vadd.xlane.f32.xlu2 %v397_v0  ;;  %v5239_v51 = vsel %vm3694_vm7, 4294967295, %v5238_v51 }
 0x25f   :  { %v441_v63 = vpop.xlane.xlu1 %440  ;;  %v444_v12 = vpop.xlane.xlu2 %443  ;;  %5240 = vst [vmem:[#allocation45_spill] sm:$0xff] %v5239_v51 }
 0x260   :  { %v3642_v14 = vmax.f32 %v441_v63, 1e-24 }
 0x262   :  { %v1182_v6 = vpop.f32.mrf.mxu3  ;;  %vm607_vm15 = vweird.f32 %v3642_v14 }
 0x263   :  { %v1183_v9 = vadd.f32 %v1182_v6, %v3541_v48 }
 0x265   :  { %v1208_v13 = vpack.c.bf16 %v1183_v9, %v1181_v8  ;;  %v3634_v8 = vmax.f32 %v426_v46, 1e-24  ;;  %v429_v9 = vpop.xlane.xlu0 %428  ;;  %v3651_v46 = vmax.f32 %v438_v57, 1e-24 }
 0x266   :  { %730 = vadd.xlane.f32.xlu2 %v729_v11  ;;  %v3636_v11 = vpop.eup %3019 }
 0x267   :  { %2662 = vmatmul.msk.bf16.gmra.mxu2 %vm5143_vm1, %v1208_v13  ;;  %v543_v13 = vmul.f32 %v3625_v59, %v542_v4  ;;  %3025 = vrsqrt.f32 %v3634_v8  ;;  %v3646_v31 = vpop.eup %3021  ;;  %vm578_vm9 = vweird.f32 %v3636_v11  ;;  %vm557_vm14 = vweird.f32 %v3634_v8 }
 0x268   :  { %3027 = vrsqrt.f32 %v3642_v14  ;;  %vm528_vm11 = vweird.f32 %v3646_v31  ;;  %vm3789_vm0 = vmor %vm577_vm8, %vm578_vm9 }
 0x269   :  { %vm3801_vm5 = vmor %vm527_vm10, %vm528_vm11 }
 0x26a   :  { %v1185_v20 = vpop.f32.mrf.mxu3 }
 0x26b   :  { %v1186_v42 = vadd.f32 %v1185_v20, %v3541_v48  ;;  %v572_v20 = vmul.f32 %v3636_v11, %v3620_v56 }
 0x26d   :  { %v573_v52 = vmul.f32 %v3636_v11, %v572_v20 }
 0x272   :  { %v1187_v40 = vpop.f32.mrf.mxu3 }
 0x273   :  { %v1188_v44 = vadd.f32 %v1187_v40, %v3541_v48  ;;  %v3648_v40 = vmax.f32 %v420_v55, 1e-24 }
 0x275   :  { %v1209_v49 = vpack.c.bf16 %v1188_v44, %v1186_v42  ;;  %v746_v42 = vpop.xlane.xlu1 %745  ;;  %v544_v44 = vmul.f32 0.5, %v543_v13  ;;  %3029 = vrsqrt.f32 %v3648_v40 }
 0x276   :  { %3031 = vrsqrt.f32 %v3651_v46  ;;  %v3668_v4 = vmax.f32 %v746_v42, 1e-24 }
 0x277   :  { %2663 = vmatmul.msk.bf16.gmra.mxu2 %vm5143_vm1, %v1209_v49  ;;  %v3653_v49 = vpop.eup %3023 }
 0x278   :  { %v3660_v63 = vpop.eup %3025  ;;  %v582_v57 = vmul.f32 %v3653_v49, %v3629_v2  ;;  %5235 = vst [vmem:[#allocation42_spill] sm:$0xff] %v3668_v4  ;;  %vm588_vm13 = vweird.f32 %v3653_v49 }
 0x279   :  { %v3674_v7 = vpop.eup %3027  ;;  %vm558_vm2 = vweird.f32 %v3660_v63  ;;  %vm3816_vm10 = vmor %vm587_vm12, %vm588_vm13 }
 0x27a   :  { %v1190_v53 = vpop.f32.mrf.mxu3  ;;  %vm608_vm3 = vweird.f32 %v3674_v7 }
 0x27b   :  { %v1191_v0 = vadd.f32 %v1190_v53, %v3541_v48  ;;  %v522_v53 = vmul.f32 %v3646_v31, %v3623_v58  ;;  %v3685_v16 = vpop.eup %3029  ;;  %vm3841_vm13 = vmor %vm607_vm15, %vm608_vm3  ;;  %vm5258_vm3 = vweird.f32 %v3651_v46 }
 0x27c   :  { %5236 = vst [vmem:[#allocation43_spill] sm:$0xff] %v3685_v16  ;;  %v3692_v23 = vpop.eup %3031  ;;  %v532_v19 = vmul.f32 %v3685_v16, %v3648_v40  ;;  %vm538_vm6 = vweird.f32 %v3685_v16 }
 0x27d   :  { %v523_v13 = vmul.f32 %v3646_v31, %v522_v53  ;;  %vm598_vm8 = vweird.f32 %v3692_v23 }
 0x27e   :  { %vm3869_vm11 = vmor %vm5258_vm3, %vm598_vm8 }
 0x281   :  { %v752_v55 = vpop.xlane.xlu0 %751 }
 0x282   :  { %v1192_v62 = vpop.f32.mrf.mxu3  ;;  %v3679_v42 = vmax.f32 %v752_v55, 1e-24 }
 0x283   :  { %v1193_v1 = vadd.f32 %v1192_v62, %v3541_v48  ;;  %v3658_v62 = vmax.f32 %v429_v9, 1e-24  ;;  %v552_v9 = vmul.f32 %v3660_v63, %v3634_v8 }
 0x285   :  { %v1210_v6 = vpack.c.bf16 %v1193_v1, %v1191_v0  ;;  %v3662_v0 = vmax.f32 %v444_v12, 1e-24  ;;  %v545_v1 = vsub.f32 1.5, %v544_v44  ;;  %3033 = vrsqrt.f32 %v3658_v62  ;;  %v749_v12 = vpop.xlane.xlu2 %748 }
 0x286   :  { %v553_v21 = vmul.f32 %v3660_v63, %v552_v9  ;;  %vm567_vm9 = vweird.f32 %v3658_v62 }
 0x287   :  { %2664 = vmatmul.msk.bf16.gmra.mxu2 %vm5143_vm1, %v1210_v6  ;;  %v574_v6 = vmul.f32 0.5, %v573_v52  ;;  %3035 = vrsqrt.f32 %v3662_v0  ;;  %v583_v52 = vmul.f32 %v3653_v49, %v582_v57  ;;  %v3688_v15 = vmul.f32 %v3625_v59, %v545_v1 }
 0x288   :  { %3037 = vrsqrt.f32 %v3668_v4  ;;  %v524_v57 = vmul.f32 0.5, %v523_v13  ;;  %v554_v38 = vmul.f32 0.5, %v553_v21  ;;  %v533_v21 = vmul.f32 %v3685_v16, %v532_v19 }
 0x289   :  { %5237 = vst [vmem:[#allocation44_spill] sm:$0xff] %v3688_v15  ;;  %v755_v55 = vpop.xlane.xlu1 %754  ;;  %3039 = vrsqrt.f32 %v3679_v42  ;;  %v584_v25 = vmul.f32 0.5, %v583_v52  ;;  %vm5263_vm8 = vweird.f32 %v3662_v0 }
 0x28a   :  { %v1195_v28 = vpop.f32.mrf.mxu3  ;;  %v525_v47 = vsub.f32 1.5, %v524_v57  ;;  %v555_v32 = vsub.f32 1.5, %v554_v38  ;;  %v534_v38 = vmul.f32 0.5, %v533_v21 }
 0x28b   :  { %v1196_v44 = vadd.f32 %v1195_v28, %v3541_v48  ;;  %v575_v28 = vsub.f32 1.5, %v574_v6  ;;  %v3703_v1 = vpop.eup %3033  ;;  %v3705_v6 = vmax.f32 %v749_v12, 1e-24  ;;  %v585_v29 = vsub.f32 1.5, %v584_v25 }
 0x28c   :  { %v3748_v25 = vmul.f32 %v3646_v31, %v525_v47  ;;  %v3770_v59 = vmul.f32 %v3660_v63, %v555_v32  ;;  %vm568_vm12 = vweird.f32 %v3703_v1 }
 0x28d   :  { %5241 = vst [vmem:[#allocation46_spill] sm:$0xff] %v3705_v6  ;;  %v3723_v52 = vmul.f32 %v3636_v11, %v575_v28  ;;  %v3760_v30 = vmul.f32 %v3653_v49, %v585_v29 }
 0x28e   :  { %5242 = vst [vmem:[#allocation47_spill] sm:$0xff] %v3748_v25 }
 0x291   :  { %v758_v28 = vpop.xlane.xlu2 %757 }
 0x292   :  { %v1197_v20 = vpop.f32.mrf.mxu3  ;;  %v3740_v57 = vmax.f32 %v758_v28, 1e-24 }
 0x293   :  { %v1198_v18 = vadd.f32 %v1197_v20, %v3541_v48  ;;  %v602_v20 = vmul.f32 %v3674_v7, %v3642_v14 }
 0x295   :  { %v1211_v53 = vpack.c.bf16 %v1198_v18, %v1196_v44  ;;  %v3700_v18 = vmax.f32 %v755_v55, 1e-24  ;;  %v3707_v44 = vpop.eup %3035  ;;  %v603_v9 = vmul.f32 %v3674_v7, %v602_v20 }
 0x296   :  { %v3720_v24 = vpop.eup %3037  ;;  %v612_v20 = vmul.f32 %v3707_v44, %v3662_v0  ;;  %vm618_vm15 = vweird.f32 %v3707_v44 }
 0x297   :  { %2665 = vmatmul.msk.bf16.gmra.mxu2 %vm5143_vm1, %v1211_v53  ;;  %v592_v53 = vmul.f32 %v3692_v23, %v3651_v46  ;;  %3041 = vrsqrt.f32 %v3700_v18  ;;  %v3735_v13 = vpop.eup %3039  ;;  %v604_v61 = vmul.f32 0.5, %v603_v9  ;;  %v851_v54 = vmul.f32 %v3720_v24, %v3668_v4 }
 0x298   :  { %3043 = vrsqrt.f32 %v3705_v6  ;;  %v613_v9 = vmul.f32 %v3707_v44, %v612_v20 }
 0x299   :  { %v761_v26 = vpop.xlane.xlu0 %760  ;;  %v593_v27 = vmul.f32 %v3692_v23, %v592_v53  ;;  %v871_v53 = vmul.f32 %v3735_v13, %v3679_v42  ;;  %v605_v3 = vsub.f32 1.5, %v604_v61  ;;  %v852_v20 = vmul.f32 %v3720_v24, %v851_v54 }
 0x29a   :  { %v1200_v55 = vpop.f32.mrf.mxu3  ;;  %v3718_v12 = vmax.f32 %v761_v26, 1e-24  ;;  %v562_v26 = vmul.f32 %v3703_v1, %v3658_v62  ;;  %v614_v5 = vmul.f32 0.5, %v613_v9  ;;  %v535_v61 = vsub.f32 1.5, %v534_v38 }
 0x29b   :  { %v1201_v29 = vadd.f32 %v1200_v55, %v3541_v48  ;;  %v853_v9 = vmul.f32 0.5, %v852_v20 }
 0x29c   :  { %3045 = vrsqrt.f32 %v3718_v12  ;;  %v563_v19 = vmul.f32 %v3703_v1, %v562_v26  ;;  %v594_v26 = vmul.f32 0.5, %v593_v27  ;;  %v872_v27 = vmul.f32 %v3735_v13, %v871_v53 }
 0x29d   :  { %3047 = vrsqrt.f32 %v3740_v57  ;;  %v3757_v28 = vpop.eup %3041 }
 0x29e   :  { %v3764_v10 = vpop.eup %3043  ;;  %v564_v33 = vmul.f32 0.5, %v563_v19  ;;  %v881_v32 = vmul.f32 %v3757_v28, %v3700_v18  ;;  %v595_v19 = vsub.f32 1.5, %v594_v26  ;;  %v615_v26 = vsub.f32 1.5, %v614_v5 }
 0x29f   :  { %v873_v20 = vmul.f32 0.5, %v872_v27 }
 0x2a0   :  { %v565_v38 = vsub.f32 1.5, %v564_v33  ;;  %v882_v2 = vmul.f32 %v3757_v28, %v881_v32 }
 0x2a1   :  { %v764_v47 = vpop.xlane.xlu1 %763  ;;  %v874_v60 = vsub.f32 1.5, %v873_v20  ;;  %v3937_v20 = vld [vmem:[#allocation7 + $0x38] sm:$0xff]  }
 0x2a2   :  { %v3767_v35 = vmax.f32 %v764_v47, 1e-24  ;;  %v1202_v15 = vpop.f32.mrf.mxu3  ;;  %v3775_v51 = vpop.eup %3045  ;;  %v861_v47 = vmul.f32 %v3764_v10, %v3705_v6  ;;  %v854_v6 = vsub.f32 1.5, %v853_v9  ;;  %v883_v46 = vmul.f32 0.5, %v882_v2  ;;  %5267 = vst [vmem:[#allocation51_spill] sm:$0xff] %v3937_v20 }
 0x2a3   :  { %v1203_v21 = vadd.f32 %v1202_v15, %v3541_v48  ;;  %v3779_v54 = vpop.eup %3047  ;;  %v3794_v48 = vmul.f32 %v3674_v7, %v605_v3  ;;  %v901_v3 = vmul.f32 %v3775_v51, %v3718_v12  ;;  %v5153_v2 = vunpack.c.l.bf16 %v3937_v20 }
 0x2a4   :  { %3049 = vrsqrt.f32 %v3767_v35  ;;  %v891_v56 = vmul.f32 %v3779_v54, %v3740_v57  ;;  %v862_v33 = vmul.f32 %v3764_v10, %v861_v47  ;;  %v5255_v47 = vmov 0 }
 0x2a5   :  { %v1212_v55 = vpack.c.bf16 %v1203_v21, %v1201_v29  ;;  %v3830_v21 = vmul.f32 %v3685_v16, %v535_v61  ;;  %v3846_v61 = vmul.f32 %v3692_v23, %v595_v19  ;;  %v902_v19 = vmul.f32 %v3775_v51, %v901_v3 }
 0x2a6   :  { %v892_v9 = vmul.f32 %v3779_v54, %v891_v56  ;;  %v863_v22 = vmul.f32 0.5, %v862_v33  ;;  %v610_v33 = vsel %vm3841_vm13, %v3674_v7, %v3794_v48  ;;  %v3925_v62 = vmul.f32 %v3720_v24, %v854_v6 }
 0x2a7   :  { %2666 = vmatmul.msk.bf16.gmra.mxu2 %vm5143_vm1, %v1212_v55  ;;  %vm3825_vm1 = vmor %vm557_vm14, %vm558_vm2  ;;  %5251 = vst [vmem:[#allocation48_spill] sm:$0xff] %v3830_v21  ;;  %vm5254_vm14 = vweird.f32 %v3648_v40  ;;  %v3874_v40 = vmul.f32 %v3703_v1, %v565_v38  ;;  %v884_v48 = vsub.f32 1.5, %v883_v46 }
 0x2a8   :  { %vm3856_vm2 = vmor %vm5254_vm14, %vm538_vm6  ;;  %5266 = vst [vmem:[#allocation50_spill] sm:$0xff] %v3925_v62  ;;  %v3960_v62 = vld [vmem:[#allocation7 + $0x10] sm:$0xff]  }
 0x2a9   :  { %v414_v5 = vpop.xlane.xlu1 %413  ;;  %v767_v55 = vpop.xlane.xlu2 %766  ;;  %v5256_v47 = vsel %vm3856_vm2, 4294967295, %v5255_v47  ;;  %vm3882_vm6 = vmor %vm567_vm9, %vm568_vm12 }
 0x2aa   :  { %v3835_v27 = vpop.eup %3049  ;;  %v3848_v4 = vmax.f32 %v414_v5, 1e-24  ;;  %v3850_v32 = vmax.f32 %v767_v55, 1e-24  ;;  %5257 = vst [vmem:[#allocation49_spill] sm:$0xff] %v5256_v47  ;;  %v616_v55 = vmul.f32 %v3707_v44, %v615_v26  ;;  %v590_v26 = vsel %vm3816_vm10, %v3653_v49, %v3760_v30  ;;  %vm3908_vm9 = vmor %vm5263_vm8, %vm618_vm15 }
 0x2ab   :  { %v911_v14 = vmul.f32 %v3835_v27, %v3767_v35  ;;  %v903_v30 = vmul.f32 0.5, %v902_v19  ;;  %v893_v49 = vmul.f32 0.5, %v892_v9  ;;  %v3935_v19 = vmul.f32 %v3735_v13, %v874_v60 }
 0x2ac   :  { %3051 = vrsqrt.f32 %v3848_v4  ;;  %v620_v8 = vsel %vm3908_vm9, %v3707_v44, %v616_v55  ;;  %v864_v9 = vsub.f32 1.5, %v863_v22  ;;  %vm916_vm10 = vweird.f32 %v3767_v35 }
 0x2ad   :  { %v912_v56 = vmul.f32 %v3835_v27, %v911_v14  ;;  %3053 = vrsqrt.f32 %v3850_v32  ;;  %vm917_vm12 = vweird.f32 %v3835_v27  ;;  %v904_v60 = vsub.f32 1.5, %v903_v30 }
 0x2ae   :  { %v894_v44 = vsub.f32 1.5, %v893_v49  ;;  %v636_v30 = vmul.f32 %v620_v8, %v3417_v45  ;;  %v3963_v49 = vmul.f32 %v3757_v28, %v884_v48  ;;  %v3967_v16 = vmul.f32 %v3764_v10, %v864_v9  ;;  %vm3976_vm13 = vmor %vm916_vm10, %vm917_vm12 }
 0x2af   :  { %v913_v58 = vmul.f32 0.5, %v912_v56  ;;  %v3981_v48 = vmul.f32 %v3775_v51, %v904_v60  ;;  %vm517_vm14 = vweird.f32 %v3848_v4  ;;  %vm926_vm15 = vweird.f32 %v3850_v32 }
 0x2b0   :  { %5268 = vst [vmem:[#allocation52_spill] sm:$0xff] %v3967_v16  ;;  %vm897_vm8 = vweird.f32 %v3779_v54  ;;  %v633_v16 = vmul.f32 %v590_v26, %v3411_v39 }
 0x2b1   :  { %v405_v56 = vpop.xlane.xlu1 %404  ;;  %v770_v14 = vpop.xlane.xlu0 %769  ;;  %v914_v38 = vsub.f32 1.5, %v913_v58  ;;  %v635_v58 = vmul.f32 %v610_v33, %v3415_v43  ;;  %v3970_v33 = vld [vmem:[#allocation7 + $0x30] sm:$0xff]  }
 0x2b2   :  { %v3939_v6 = vpop.eup %3051  ;;  %v3942_v0 = vmax.f32 %v405_v56, 1e-24  ;;  %v3944_v46 = vmax.f32 %v770_v14, 1e-24  ;;  %v5156_v56 = vunpack.c.h.bf16 %v3937_v20  ;;  %5269 = vst [vmem:[#allocation53_spill] sm:$0xff] %v3970_v33 }
 0x2b3   :  { %v3946_v7 = vpop.eup %3053  ;;  %v512_v22 = vmul.f32 %v3939_v6, %v3848_v4  ;;  %v915_v21 = vmul.f32 %v3835_v27, %v914_v38  ;;  %v3986_v38 = vmul.f32 %v3779_v54, %v894_v44  ;;  %v3992_v9 = vadd.f32 %v635_v58, %v5153_v2 }
 0x2b4   :  { %3055 = vrsqrt.f32 %v3942_v0  ;;  %v921_v55 = vmul.f32 %v3946_v7, %v3850_v32  ;;  %vm518_vm9 = vweird.f32 %v3939_v6  ;;  %v5158_v44 = vunpack.c.l.bf16 %v3970_v33 }
 0x2b5   :  { %v513_v14 = vmul.f32 %v3939_v6, %v512_v22  ;;  %3057 = vrsqrt.f32 %v3944_v46  ;;  %vm927_vm10 = vweird.f32 %v3946_v7  ;;  %vm4060_vm3 = vmor %vm517_vm14, %vm518_vm9  ;;  %v5280_v4 = vsel %vm3882_vm6, %v3703_v1, %v3874_v40 }
 0x2b6   :  { %v922_v43 = vmul.f32 %v3946_v7, %v921_v55  ;;  %vm4052_vm12 = vmor %vm926_vm15, %vm927_vm10  ;;  %vm5281_vm6 = vweird.f32 %v3740_v57  ;;  %v5284_v57 = vsel %vm3789_vm0, %v3636_v11, %v3723_v52 }
 0x2b7   :  { %v514_v8 = vmul.f32 0.5, %v513_v14  ;;  %v3998_v14 = vadd.f32 %v636_v30, %v5156_v56  ;;  %v919_v30 = vsel %vm3976_vm13, %v3835_v27, %v915_v21  ;;  %v5273_v21 = vsel %vm3869_vm11, %v3692_v23, %v3846_v61  ;;  %vm4099_vm14 = vmor %vm5281_vm6, %vm897_vm8 }
 0x2b8   :  { %v923_v35 = vmul.f32 0.5, %v922_v43  ;;  %v634_v27 = vmul.f32 %v5273_v21, %v3413_v41  ;;  %vm487_vm11 = vweird.f32 %v3942_v0  ;;  %vm936_vm13 = vweird.f32 %v3944_v46 }
 0x2b9   :  { %v411_v22 = vpop.xlane.xlu0 %410  ;;  %v773_v55 = vpop.xlane.xlu2 %772  ;;  %v515_v39 = vsub.f32 1.5, %v514_v8  ;;  %v962_v8 = vmul.f32 %v919_v30, %v3533_v34  ;;  %vm5285_vm8 = vweird.f32 %v3775_v51 }
 0x2ba   :  { %v4002_v47 = vpop.eup %3055  ;;  %v924_v58 = vsub.f32 1.5, %v923_v35  ;;  %v4006_v43 = vmax.f32 %v411_v22, 1e-24  ;;  %v4008_v2 = vmax.f32 %v773_v55, 1e-24  ;;  %v4010_v60 = vpop.f32.mrf.mxu2 }
 0x2bb   :  { %5272 = vst [vmem:[#allocation54_spill] sm:$0xff] %v4010_v60  ;;  %v737_v20 = vpop.xlane.xlu1 %736  ;;  %v4015_v56 = vpop.eup %3057  ;;  %v482_v26 = vmul.f32 %v4002_v47, %v3942_v0  ;;  %v4037_v60 = vld [vmem:[#allocation7 + $0x28] sm:$0xff]   ;;  %v4044_v41 = vmul.f32 %v3939_v6, %v515_v39  ;;  %vm488_vm15 = vweird.f32 %v4002_v47 }
 0x2bc   :  { %v4020_v35 = vmax.f32 %v737_v20, 1e-24  ;;  %v931_v22 = vmul.f32 %v4015_v56, %v3944_v46  ;;  %3059 = vrsqrt.f32 %v4006_v43  ;;  %v649_v20 = vadd.f32 %v633_v16, %v5158_v44  ;;  %5274 = vst [vmem:[#allocation55_spill] sm:$0xff] %v4037_v60 }
 0x2bd   :  { %v483_v45 = vmul.f32 %v4002_v47, %v482_v26  ;;  %3061 = vrsqrt.f32 %v4008_v2  ;;  %v925_v25 = vmul.f32 %v3946_v7, %v924_v58  ;;  %v5279_v58 = vunpack.c.h.bf16 %v3970_v33 }
 0x2be   :  { %v932_v55 = vmul.f32 %v4015_v56, %v931_v22  ;;  %3063 = vrsqrt.f32 %v4020_v35  ;;  %v5159_v39 = vunpack.c.l.bf16 %v4037_v60  ;;  %vm937_vm10 = vweird.f32 %v4015_v56 }
 0x2bf   :  { %v484_v61 = vmul.f32 0.5, %v483_v45  ;;  %v650_v30 = vadd.f32 %v634_v27, %v5279_v58  ;;  %v4070_v21 = vadd.f32 %v962_v8, %v649_v20  ;;  %v929_v20 = vsel %vm4052_vm12, %v3946_v7, %v925_v25  ;;  %vm4146_vm0 = vmor %vm936_vm13, %vm937_vm10 }
 0x2c0   :  { %v933_v5 = vmul.f32 0.5, %v932_v55  ;;  %v631_v55 = vmul.f32 %v5280_v4, %v3407_v36  ;;  %vm5286_vm12 = vweird.f32 %v3718_v12  ;;  %vm946_vm9 = vweird.f32 %v4008_v2  ;;  %v5305_v36 = vld [vmem:[#allocation38_spill] sm:$0xff] }
 0x2c1   :  { %v743_v26 = vpop.xlane.xlu0 %742  ;;  %v740_v22 = vpop.xlane.xlu2 %739  ;;  %v485_v40 = vsub.f32 1.5, %v484_v61  ;;  %v632_v61 = vmul.f32 %v5284_v57, %v3409_v37  ;;  %vm4123_vm6 = vmor %vm5286_vm12, %vm5285_vm8  ;;  %v963_v15 = vmul.f32 %v929_v20, %v3545_v50  ;;  %v899_v12 = vsel %vm4099_vm14, %v3779_v54, %v3986_v38 }
 0x2c2   :  { %v4078_v27 = vpop.eup %3059  ;;  %v934_v45 = vsub.f32 1.5, %v933_v5  ;;  %v4080_v58 = vmax.f32 %v743_v26, 1e-24  ;;  %v4082_v44 = vmax.f32 %v740_v22, 1e-24  ;;  %v4084_v23 = vpop.f32.mrf.mxu2  ;;  %v647_v4 = vadd.f32 %v631_v55, %v5159_v39  ;;  %vm4159_vm12 = vmor %vm487_vm11, %vm488_vm15  ;;  %v5304_v39 = vld [vmem:[#allocation46_spill] sm:$0xff] }
 0x2c3   :  { %v728_v32 = vpop.xlane.xlu1 %727  ;;  %v4089_v8 = vpop.eup %3061  ;;  %v502_v3 = vmul.f32 %v4078_v27, %v4006_v43  ;;  %v4140_v52 = vmul.f32 %v4002_v47, %v485_v40  ;;  %vm876_vm8 = vweird.f32 %v3679_v42  ;;  %vm877_vm14 = vweird.f32 %v3735_v13 }
 0x2c4   :  { %v4105_v25 = vmax.f32 %v728_v32, 1e-24  ;;  %v4107_v7 = vpop.eup %3063  ;;  %v941_v16 = vmul.f32 %v4089_v8, %v4008_v2  ;;  %3065 = vrsqrt.f32 %v4080_v58  ;;  %v935_v26 = vmul.f32 %v4015_v56, %v934_v45  ;;  %v5297_v2 = vld [vmem:[#allocation37_spill] sm:$0xff] }
 0x2c5   :  { %v503_v32 = vmul.f32 %v4078_v27, %v502_v3  ;;  %3067 = vrsqrt.f32 %v4082_v44  ;;  %v821_v11 = vmul.f32 %v4107_v7, %v4020_v35  ;;  %v5293_v45 = vunpack.c.h.bf16 %v4037_v60 }
 0x2c6   :  { %v942_v37 = vmul.f32 %v4089_v8, %v941_v16  ;;  %3069 = vrsqrt.f32 %v4105_v25  ;;  %v909_v55 = vsel %vm4123_vm6, %v3775_v51, %v3981_v48  ;;  %vm887_vm10 = vweird.f32 %v3757_v28 }
 0x2c7   :  { %v504_v22 = vmul.f32 0.5, %v503_v32  ;;  %v822_v38 = vmul.f32 %v4107_v7, %v821_v11  ;;  %v648_v20 = vadd.f32 %v632_v61, %v5293_v45  ;;  %vm947_vm11 = vweird.f32 %v4089_v8 }
 0x2c8   :  { %v943_v46 = vmul.f32 0.5, %v942_v37  ;;  %v4173_v3 = vadd.f32 %v963_v15, %v650_v30  ;;  %v960_v16 = vmul.f32 %v899_v12, %v3523_v17  ;;  %v939_v48 = vsel %vm4146_vm0, %v4015_v56, %v935_v26  ;;  %v5294_v15 = vld [vmem:[#allocation36_spill] sm:$0xff]  ;;  %vm4202_vm6 = vmor %vm946_vm9, %vm947_vm11 }
 0x2c9   :  { %v505_v0 = vsub.f32 1.5, %v504_v22  ;;  %v734_v1 = vpop.xlane.xlu0 %733  ;;  %v408_v40 = vpop.xlane.xlu2 %407  ;;  %vm508_vm15 = vweird.f32 %v4078_v27  ;;  %v961_v11 = vmul.f32 %v909_v55, %v5294_v15  ;;  %v823_v50 = vmul.f32 0.5, %v822_v38  ;;  %v4209_v22 = vld [vmem:[#allocation7 + $0x20] sm:$0xff]  }
 0x2ca   :  { %v4176_v57 = vpop.eup %3065  ;;  %v944_v61 = vsub.f32 1.5, %v943_v46  ;;  %v4178_v32 = vmax.f32 %v734_v1, 1e-24  ;;  %v4180_v5 = vmax.f32 %v408_v40, 1e-24  ;;  %v4182_v51 = vpop.f32.mrf.mxu2  ;;  %v964_v1 = vmul.f32 %v939_v48, %v5297_v2 }
 0x2cb   :  { %v4187_v37 = vpop.eup %3067  ;;  %v841_v30 = vmul.f32 %v4176_v57, %v4080_v58  ;;  %v4214_v45 = vmul.f32 %v4078_v27, %v505_v0  ;;  %vm5298_vm9 = vweird.f32 %v4006_v43  ;;  %v4230_v15 = vadd.f32 %v960_v16, %v647_v4 }
 0x2cc   :  { %v945_v12 = vmul.f32 %v4089_v8, %v944_v61  ;;  %v831_v26 = vmul.f32 %v4187_v37, %v4082_v44  ;;  %3071 = vrsqrt.f32 %v4178_v32  ;;  %v4211_v46 = vpop.eup %3069  ;;  %vm4221_vm0 = vmor %vm5298_vm9, %vm508_vm15  ;;  %vm857_vm13 = vweird.f32 %v3720_v24 }
 0x2cd   :  { %v842_v55 = vmul.f32 %v4176_v57, %v841_v30  ;;  %3073 = vrsqrt.f32 %v4180_v5  ;;  %v791_v61 = vmul.f32 %v4211_v46, %v4105_v25  ;;  %5301 = vst [vmem:[#allocation36_spill] sm:$0xff] %v4230_v15  ;;  %v5302_v30 = vld [vmem:[#allocation42_spill] sm:$0xff]  ;;  %v4237_v2 = vadd.f32 %v961_v11, %v648_v20 }
 0x2ce   :  { %v832_v38 = vmul.f32 %v4187_v37, %v831_v26  ;;  %v949_v43 = vsel %vm4202_vm6, %v4089_v8, %v945_v12  ;;  %vm867_vm9 = vweird.f32 %v3764_v10  ;;  %v824_v4 = vsub.f32 1.5, %v823_v50  ;;  %v5307_v50 = vld [vmem:[#allocation24_spill] sm:$0xff] }
 0x2cf   :  { %v843_v48 = vmul.f32 0.5, %v842_v55  ;;  %5303 = vst [vmem:[#allocation37_spill] sm:$0xff] %v4237_v2  ;;  %v792_v16 = vmul.f32 %v4211_v46, %v791_v61  ;;  %v965_v0 = vmul.f32 %v949_v43, %v5305_v36  ;;  %vm847_vm11 = vweird.f32 %v4176_v57  ;;  %v5310_v36 = vld [vmem:[#allocation44_spill] sm:$0xff] }
 0x2d0   :  { %v833_v17 = vmul.f32 0.5, %v832_v38  ;;  %v4251_v12 = vadd.f32 %v964_v1, %v3992_v9  ;;  %v5309_v38 = vld [vmem:[#allocation41_spill] sm:$0xff]  ;;  %vm837_vm6 = vweird.f32 %v4187_v37  ;;  %v5316_v42 = vsel %vm3825_vm1, %v3660_v63, %v3770_v59  ;;  %v5322_v59 = vld [vmem:[#allocation35_spill] sm:$0xff] }
 0x2d1   :  { %v844_v8 = vsub.f32 1.5, %v843_v48  ;;  %v402_v20 = vpop.xlane.xlu0 %401  ;;  %v399_v11 = vpop.xlane.xlu2 %398  ;;  %v5311_v61 = vsel %vm3694_vm7, %v5309_v38, %v5310_v36  ;;  %v793_v1 = vmul.f32 0.5, %v792_v16  ;;  %vm4275_vm7 = vmor %vm876_vm8, %vm877_vm14  ;;  %v5167_v16 = vunpack.c.h.bf16 %v4209_v22 }
 0x2d2   :  { %5306 = vst [vmem:[#allocation42_spill] sm:$0xff] %v4251_v12  ;;  %v629_v43 = vmul.f32 %v5311_v61, %v5307_v50  ;;  %v4259_v26 = vpop.eup %3071  ;;  %v834_v56 = vsub.f32 1.5, %v833_v17  ;;  %v4263_v48 = vmax.f32 %v402_v20, 1e-24  ;;  %v4265_v60 = vmax.f32 %v399_v11, 1e-24  ;;  %v4267_v9 = vpop.f32.mrf.mxu2 }
 0x2d3   :  { %v4269_v33 = vpop.eup %3073  ;;  %v811_v17 = vmul.f32 %v4259_v26, %v4178_v32  ;;  %v4283_v20 = vadd.f32 %v965_v0, %v3998_v14  ;;  %v5315_v11 = vld [vmem:[#allocation25_spill] sm:$0xff]  ;;  %vm5317_vm8 = vweird.f32 %v3700_v18  ;;  %v4303_v0 = vmul.f32 %v4107_v7, %v824_v4 }
 0x2d4   :  { %v630_v55 = vmul.f32 %v5316_v42, %v5315_v11  ;;  %vm4296_vm14 = vmor %vm5317_vm8, %vm887_vm10  ;;  %v492_v14 = vmul.f32 %v4269_v33, %v4180_v5  ;;  %3075 = vrsqrt.f32 %v4263_v48  ;;  %v4309_v63 = vmul.f32 %v4176_v57, %v844_v8  ;;  %v4323_v42 = vld [vmem:[#allocation7 + $0x18] sm:$0xff]  }
 0x2d5   :  { %5314 = vst [vmem:[#allocation46_spill] sm:$0xff] %v4283_v20  ;;  %v4312_v18 = vmul.f32 %v4187_v37, %v834_v56  ;;  %v812_v29 = vmul.f32 %v4259_v26, %v811_v17  ;;  %3077 = vrsqrt.f32 %v4265_v60  ;;  %vm827_vm10 = vweird.f32 %v4107_v7 }
 0x2d6   :  { %v493_v36 = vmul.f32 %v4269_v33, %v492_v14  ;;  %v794_v4 = vsub.f32 1.5, %v793_v1  ;;  %v1409_v61 = vpack.c.bf16 %v4283_v20, %v4251_v12  ;;  %v5320_v8 = vunpack.c.l.bf16 %v4209_v22 }
 0x2d7   :  { %v813_v56 = vmul.f32 0.5, %v812_v29  ;;  %vm817_vm15 = vweird.f32 %v4259_v26  ;;  %v646_v17 = vadd.f32 %v630_v55, %v5167_v16  ;;  %v879_v1 = vsel %vm4275_vm7, %v3735_v13, %v3935_v19  ;;  %v5321_v29 = vld [vmem:[#allocation34_spill] sm:$0xff] }
 0x2d8   :  { %v645_v11 = vadd.f32 %v629_v43, %v5320_v8  ;;  %v889_v43 = vsel %vm4296_vm14, %v3757_v28, %v3963_v49  ;;  %v494_v14 = vmul.f32 0.5, %v493_v36  ;;  %vm498_vm1 = vweird.f32 %v4269_v33  ;;  %1410 = vmatpush.bf16.msrb.mxu1 %v1409_v61  ;;  %v5323_v19 = vld [vmem:[#allocation22_spill] sm:$0xff]  ;;  %v5324_v28 = vld [vmem:[#allocation47_spill] sm:$0xff] }
 0x2d9   :  { %v958_v8 = vmul.f32 %v879_v1, %v5321_v29  ;;  %v959_v12 = vmul.f32 %v889_v43, %v5322_v59  ;;  %v814_v20 = vsub.f32 1.5, %v813_v56  ;;  %v731_v55 = vpop.xlane.xlu2 %730  ;;  %v5166_v50 = vunpack.c.l.bf16 %v4323_v42  ;;  %v5336_v29 = vld [vmem:[#allocation43_spill] sm:$0xff] }
 0x2da   :  { %v5169_v13 = vunpack.c.h.bf16 %v4323_v42  ;;  %v5325_v49 = vsel %vm3801_vm5, %v3646_v31, %v5324_v28  ;;  %v4349_v36 = vpop.eup %3075  ;;  %vm5326_vm7 = vweird.f32 %v5302_v30  ;;  %v495_v61 = vsub.f32 1.5, %v494_v14  ;;  %v4361_v1 = vpop.f32.mrf.mxu2 }
 0x2db   :  { %v627_v38 = vmul.f32 %v5325_v49, %v5323_v19  ;;  %vm4355_vm14 = vmor %vm5326_vm7, %vm857_vm13  ;;  %v4359_v56 = vmax.f32 %v731_v55, 1e-24  ;;  %v4363_v53 = vadd.f32 %v958_v8, %v645_v11  ;;  %v4365_v43 = vadd.f32 %v959_v12, %v646_v17  ;;  %v4367_v31 = vpop.eup %3077  ;;  %v5334_v12 = vld [vmem:[#allocation23_spill] sm:$0xff]  ;;  %v5337_v8 = vld [vmem:[#allocation48_spill] sm:$0xff] }
 0x2dc   :  { %vm5331_vm5 = vweird.f32 %v5304_v39  ;;  %v472_v14 = vmul.f32 %v4349_v36, %v4263_v48  ;;  %v4381_v11 = vmul.f32 %v4211_v46, %v794_v4  ;;  %v5338_v55 = vsel %vm3856_vm2, %v5336_v29, %v5337_v8  ;;  %v5349_v8 = vld [vmem:[#allocation50_spill] sm:$0xff]  ;;  %v5372_v29 = vld [vmem:[#allocation31_spill] sm:$0xff] }
 0x2dd   :  { %5329 = vst [vmem:[#allocation38_spill] sm:$0xff] %v4363_v53  ;;  %vm4373_vm8 = vmor %vm5331_vm5, %vm867_vm9  ;;  %v628_v19 = vmul.f32 %v5338_v55, %v5334_v12  ;;  %vm5339_vm9 = vweird.f32 %v4080_v58  ;;  %v4398_v28 = vmul.f32 %v4259_v26, %v814_v20  ;;  %v462_v4 = vmul.f32 %v4367_v31, %v4265_v60  ;;  %v5367_v58 = vld [vmem:[#allocation30_spill] sm:$0xff] }
 0x2de   :  { %5330 = vst [vmem:[#allocation24_spill] sm:$0xff] %v4365_v43  ;;  %vm4393_vm7 = vmor %vm5339_vm9, %vm847_vm11  ;;  %v5342_v49 = vpack.c.bf16 %v4173_v3, %v4070_v21  ;;  %3079 = vrsqrt.f32 %v4359_v56  ;;  %vm5343_vm11 = vweird.f32 %v4082_v44  ;;  %v496_v20 = vmul.f32 %v4269_v33, %v495_v61 }
 0x2df   :  { %vm4413_vm9 = vmor %vm5343_vm11, %vm837_vm6  ;;  %v473_v12 = vmul.f32 %v4349_v36, %v472_v14  ;;  %vm468_vm13 = vweird.f32 %v4367_v31  ;;  %v643_v17 = vadd.f32 %v627_v38, %v5166_v50  ;;  %vm5346_vm2 = vweird.f32 %v4180_v5  ;;  %v5351_v50 = vld [vmem:[#allocation32_spill] sm:$0xff] }
 0x2e0   :  { %1411 = vmatpush.bf16.msrb.mxu1 %v5342_v49  ;;  %vm4426_vm5 = vmor %vm5346_vm2, %vm498_vm1  ;;  %v463_v44 = vmul.f32 %v4367_v31, %v462_v4  ;;  %v1406_v61 = vpack.c.bf16 %v4365_v43, %v4363_v53  ;;  %v644_v14 = vadd.f32 %v628_v19, %v5169_v13  ;;  %v859_v38 = vsel %vm4355_vm14, %v3720_v24, %v5349_v8  ;;  %v5350_v49 = vld [vmem:[#allocation52_spill] sm:$0xff]  ;;  %v5355_v24 = vld [vmem:[#allocation33_spill] sm:$0xff] }
 0x2e1   :  { %v474_v55 = vmul.f32 0.5, %v473_v12  ;;  %v869_v5 = vsel %vm4373_vm8, %v3764_v10, %v5350_v49  ;;  %v956_v16 = vmul.f32 %v859_v38, %v5351_v50  ;;  %v5352_v4 = vld [vmem:[#allocation20_spill] sm:$0xff]  ;;  %v5353_v53 = vsel %vm4221_vm0, %v4078_v27, %v4214_v45  ;;  %v5356_v8 = vld [vmem:[#allocation21_spill] sm:$0xff] }
 0x2e2   :  { %v625_v19 = vmul.f32 %v5353_v53, %v5352_v4  ;;  %v464_v13 = vmul.f32 0.5, %v463_v44  ;;  %v5354_v59 = vpack.c.bf16 %v4237_v2, %v4230_v15  ;;  %v957_v12 = vmul.f32 %v869_v5, %v5355_v24  ;;  %v5379_v24 = vld [vmem:[#allocation18_spill] sm:$0xff] }
 0x2e3   :  { %v5357_v10 = vsel %vm4060_vm3, %v3939_v6, %v4044_v41  ;;  %v839_v27 = vsel %vm4413_vm9, %v4187_v37, %v4312_v18  ;;  %v500_v45 = vsel %vm4426_vm5, %v4269_v33, %v496_v20  ;;  %vm5358_vm0 = vweird.f32 %v4020_v35  ;;  %v4489_v18 = vpop.f32.mrf.mxu2 }
 0x2e4   :  { %1412 = vmatpush.bf16.msrb.mxu1 %v5354_v59  ;;  %v626_v50 = vmul.f32 %v5357_v10, %v5356_v8  ;;  %vm4471_vm6 = vmor %vm5358_vm0, %vm827_vm10  ;;  %v475_v34 = vsub.f32 1.5, %v474_v55  ;;  %v4475_v6 = vadd.f32 %v956_v16, %v643_v17  ;;  %v849_v41 = vsel %vm4393_vm7, %v4176_v57, %v4309_v63  ;;  %v3080_v37 = vpop.eup %3079  ;;  %v4496_v57 = vld [vmem:[#allocation7 + $0x8] sm:$0xff]  }
 0x2e5   :  { %vm5362_vm3 = vweird.f32 %v4178_v32  ;;  %v465_v35 = vsub.f32 1.5, %v464_v13  ;;  %v4491_v53 = vadd.f32 %v957_v12, %v644_v14  ;;  %v5366_v16 = vunpack.c.l.bf16 %v3960_v62  ;;  %v5381_v8 = vld [vmem:[#allocation19_spill] sm:$0xff] }
 0x2e6   :  { %5361 = vst [vmem:[#allocation45_spill] sm:$0xff] %v4475_v6  ;;  %vm4485_vm1 = vmor %vm5362_vm3, %vm817_vm15  ;;  %v954_v39 = vmul.f32 %v839_v27, %v5367_v58  ;;  %v476_v63 = vmul.f32 %v4349_v36, %v475_v34  ;;  %vm5368_vm15 = vweird.f32 %v4265_v60  ;;  %v801_v13 = vmul.f32 %v3080_v37, %v4359_v56  ;;  %v5393_v14 = vld [vmem:[#allocation27_spill] sm:$0xff] }
 0x2e7   :  { %5365 = vst [vmem:[#allocation41_spill] sm:$0xff] %v4491_v53  ;;  %v641_v30 = vadd.f32 %v625_v19, %v5366_v16  ;;  %vm4503_vm10 = vmor %vm5368_vm15, %vm468_vm13  ;;  %v5371_v20 = vunpack.c.h.bf16 %v3960_v62  ;;  %v955_v44 = vmul.f32 %v849_v41, %v5372_v29  ;;  %vm5373_vm8 = vweird.f32 %v4349_v36  ;;  %v4529_v19 = vld [vmem:[#allocation7] sm:$0xff]  }
 0x2e8   :  { %vm5374_vm14 = vweird.f32 %v4263_v48  ;;  %v466_v60 = vmul.f32 %v4367_v31, %v465_v35  ;;  %vm806_vm13 = vweird.f32 %v4359_v56  ;;  %1413 = vmatpush.bf16.msrb.mxu1 %v1406_v61  ;;  %v1405_v38 = vpack.c.bf16 %v4491_v53, %v4475_v6  ;;  %v5388_v35 = vld [vmem:[#allocation16_spill] sm:$0xff] }
 0x2e9   :  { %v642_v17 = vadd.f32 %v626_v50, %v5371_v20  ;;  %vm4515_vm7 = vmor %vm5374_vm14, %vm5373_vm8  ;;  %v4523_v55 = vadd.f32 %v954_v39, %v641_v30  ;;  %v802_v49 = vmul.f32 %v3080_v37, %v801_v13  ;;  %v5178_v4 = vunpack.c.l.bf16 %v4496_v57  ;;  %v5390_v30 = vld [vmem:[#allocation17_spill] sm:$0xff]  ;;  %v5392_v13 = vld [vmem:[#allocation26_spill] sm:$0xff] }
 0x2ea   :  { %v5175_v48 = vunpack.c.h.bf16 %v4496_v57  ;;  %v470_v59 = vsel %vm4503_vm10, %v4367_v31, %v466_v60  ;;  %v5380_v61 = vsel %vm4159_vm12, %v4002_v47, %v4140_v52  ;;  %v624_v10 = vmul.f32 %v500_v45, %v5381_v8 }
 0x2eb   :  { %5377 = vst [vmem:[#allocation44_spill] sm:$0xff] %v4523_v55  ;;  %v4525_v5 = vadd.f32 %v955_v44, %v642_v17  ;;  %v623_v12 = vmul.f32 %v5380_v61, %v5379_v24  ;;  %v819_v50 = vsel %vm4485_vm1, %v4259_v26, %v4398_v28  ;;  %v480_v27 = vsel %vm4515_vm7, %v4349_v36, %v476_v63  ;;  %v5386_v36 = vld [vmem:[#allocation28_spill] sm:$0xff]  ;;  %v5387_v28 = vld [vmem:[#allocation29_spill] sm:$0xff] }
 0x2ec   :  { %vm5382_vm5 = vweird.f32 %v4211_v46  ;;  %vm5383_vm2 = vweird.f32 %v4105_v25  ;;  %v803_v47 = vmul.f32 0.5, %v802_v49  ;;  %vm807_vm12 = vweird.f32 %v3080_v37  ;;  %1414 = vmatpush.bf16.msrb.mxu1 %v1405_v38 }
 0x2ed   :  { %5378 = vst [vmem:[#allocation25_spill] sm:$0xff] %v4525_v5  ;;  %vm4552_vm11 = vmor %vm5383_vm2, %vm5382_vm5  ;;  %v829_v52 = vsel %vm4471_vm6, %v4107_v7, %v4303_v0  ;;  %v640_v26 = vadd.f32 %v624_v10, %v5175_v48  ;;  %v952_v31 = vmul.f32 %v819_v50, %v5386_v36  ;;  %v5174_v25 = vunpack.c.l.bf16 %v4529_v19  ;;  %v1286_v7 = vpop.f32.mrf.mxu2 }
 0x2ee   :  { %v953_v45 = vmul.f32 %v829_v52, %v5387_v28  ;;  %v804_v34 = vsub.f32 1.5, %v803_v47  ;;  %v1404_v41 = vpack.c.bf16 %v4525_v5, %v4523_v55  ;;  %v639_v33 = vadd.f32 %v623_v12, %v5178_v4  ;;  %vm808_vm9 = vmor %vm806_vm13, %vm807_vm12  ;;  %v5396_v28 = vld [vmem:[#allocation54_spill] sm:$0xff]  ;;  %v4788_v55 = vld [vmem:[#allocation10 + $0x70] sm:$0xff]  }
 0x2ef   :  { %v621_v40 = vmul.f32 %v470_v59, %v5388_v35  ;;  %v5171_v16 = vunpack.c.h.bf16 %v4529_v19  ;;  %v622_v58 = vmul.f32 %v480_v27, %v5390_v30  ;;  %v799_v39 = vsel %vm4552_vm11, %v4211_v46, %v4381_v11  ;;  %v3100_v35 = vld [vmem:[#allocation5 + $0x18] sm:$0xff] }
 0x2f0   :  { %v4572_v0 = vadd.f32 %v953_v45, %v640_v26  ;;  %v805_v63 = vmul.f32 %v3080_v37, %v804_v34  ;;  %1415 = vmatpush.bf16.msrb.mxu1 %v1404_v41  ;;  %v4580_v32 = vadd.f32 %v952_v31, %v639_v33  ;;  %v950_v20 = vmul.f32 %v799_v39, %v5392_v13  ;;  %v3097_v34 = vld [vmem:[#allocation5] sm:$0xff]  ;;  %v3098_v41 = vld [vmem:[#allocation5 + $0x8] sm:$0xff]  ;;  %v3099_v33 = vld [vmem:[#allocation5 + $0x10] sm:$0xff] }
 0x2f1   :  { %v637_v56 = vadd.f32 %v621_v40, %v5174_v25  ;;  %v638_v44 = vadd.f32 %v622_v58, %v5171_v16  ;;  %v1313_v36 = vpack.c.bf16 %v4489_v18, %v4361_v1  ;;  %v1312_v31 = vpack.c.bf16 %v4267_v9, %v4182_v51  ;;  %v3101_v40 = vld [vmem:[#allocation5 + $0x20] sm:$0xff]  ;;  %v3102_v1 = vld [vmem:[#allocation5 + $0x28] sm:$0xff]  ;;  %v3103_v18 = vld [vmem:[#allocation5 + $0x30] sm:$0xff] }
 0x2f2   :  { %5389 = vst [vmem:[#allocation34_spill] sm:$0xff] %v4572_v0  ;;  %v809_v17 = vsel %vm808_vm9, %v3080_v37, %v805_v63  ;;  %v1403_v29 = vpack.c.bf16 %v4572_v0, %v4580_v32  ;;  %v1311_v45 = vpack.c.bf16 %v4084_v23, %v5396_v28  ;;  %v3104_v51 = vld [vmem:[#allocation5 + $0x38] sm:$0xff]  ;;  %v5170_v13 = vmov 1.0|1.0  }
 0x2f3   :  { %5391 = vst [vmem:[#allocation35_spill] sm:$0xff] %v4580_v32  ;;  %v951_v60 = vmul.f32 %v809_v17, %v5393_v14  ;;  %v4590_v46 = vadd.f32 %v950_v20, %v637_v56  ;;  %vm5408_vm0 = vcmask 261120   ;;  %vm1607_vm15 = vcmask 130048   ;;  %v4784_v0 = vld [vmem:[#allocation10 + $0x78] sm:$0xff]  }
 0x2f4   :  { %1416 = vmatpush.bf16.msrb.mxu1 %v1403_v29  ;;  %vm5409_vm6 = vmmov %vm5408_vm0  ;;  %v193_v5 = vunpack.c.h.bf16 %v4788_v55  ;;  %vm5412_vm10 = vcmask 523264  }
 0x2f5   :  { %5394 = vst [vmem:[#allocation22_spill] sm:$0xff] %v4590_v46  ;;  %v4592_v11 = vadd.f32 %v951_v60, %v638_v44  ;;  %v1288_v38 = vpop.f32.mrf.mxu2  ;;  %vm5410_vm3 = vmmov %vm5408_vm0 }
 0x2f6   :  { %v1314_v26 = vpack.c.bf16 %v1288_v38, %v1286_v7  ;;  %vm5411_vm1 = vmmov %vm5408_vm0 }
 0x2f7   :  { %5395 = vst [vmem:[#allocation47_spill] sm:$0xff] %v4592_v11  ;;  %v1402_v49 = vpack.c.bf16 %v4592_v11, %v4590_v46  ;;  %v4781_v11 = vld [vmem:[#allocation10] sm:$0xff]  ;;  %vm5413_vm8 = vmmov %vm5412_vm10 }
 0x2f8   :  { %vm5414_vm14 = vmmov %vm5413_vm8 }
 0x2f9   :  { %1417 = vmatpush.bf16.msrb.mxu1 %v1402_v49  ;;  %vm5415_vm7 = vmmov %vm5413_vm8 }
 0x2fa   :  { %vm5416_vm13 = vmmov %vm5415_vm7 }
 0x2fb   :  { %vm5417_vm5 = vmmov %vm5415_vm7 }
 0x2fc   :  { %2670 = vmatmul.msk.bf16.vlgmr.msrb.gmra.mxu1 %vm3610_vm4, %v5170_v13  ;;  %vm5418_vm2 = vmmov %vm5417_vm5 }
 0x2fd   :  { %v1291_v59 = vpop.f32.mrf.mxu2  ;;  %vm5419_vm11 = vmmov %vm5418_vm2 }
 0x2fe   :  { %vm5420_vm12 = vmmov %vm5418_vm2 }
 0x305   :  { %v1293_v37 = vpop.f32.mrf.mxu2 }
 0x306   :  { %v1315_v52 = vpack.c.bf16 %v1293_v37, %v1291_v59  ;;  %v4608_v59 = vld [vmem:[%s5111_s7] sm:$0xff] }
 0x307   :  { %v1319_v37 = vperm.slane %v4608_v59, 1 }
 0x30d   :  { %v1296_v24 = vpop.f32.mrf.mxu2 }
 0x315   :  { %v1298_v61 = vpop.f32.mrf.mxu2 }
 0x316   :  { %v1316_v47 = vpack.c.bf16 %v1298_v61, %v1296_v24 }
 0x31d   :  { %v1301_v12 = vpop.f32.mrf.mxu2 }
 0x325   :  { %v1303_v8 = vpop.f32.mrf.mxu2 }
 0x326   :  { %v1317_v54 = vpack.c.bf16 %v1303_v8, %v1301_v12 }
 0x32d   :  { %v1306_v10 = vpop.f32.mrf.mxu2 }
 0x335   :  { %v1308_v50 = vpop.f32.mrf.mxu2 }
 0x336   :  { %v1318_v27 = vpack.c.bf16 %v1308_v50, %v1306_v10 }
 0x338   :  { %1320 = vmatpush.bf16.msrb.mxu0 %v1318_v27 }
 0x33c   :  { %1321 = vmatpush.bf16.msrb.mxu0 %v1317_v54 }
 0x340   :  { %1322 = vmatpush.bf16.msrb.mxu0 %v1316_v47 }
 0x344   :  { %1323 = vmatpush.bf16.msrb.mxu0 %v1315_v52 }
 0x348   :  { %1324 = vmatpush.bf16.msrb.mxu0 %v1314_v26 }
 0x34c   :  { %1325 = vmatpush.bf16.msrb.mxu0 %v1313_v36 }
 0x350   :  { %1326 = vmatpush.bf16.msrb.mxu0 %v1312_v31 }
 0x354   :  { %1327 = vmatpush.bf16.msrb.mxu0 %v1311_v45 }
 0x357   :  { %1328 = vmatmul.bf16.vlgmr.msrb.gmra.mxu0 %v3097_v34 }
 0x367   :  { %1333 = vmatmul.bf16.gmra.mxu0 %v3098_v41 }
 0x377   :  { %1338 = vmatmul.bf16.gmra.mxu0 %v3099_v33 }
 0x387   :  { %1343 = vmatmul.bf16.gmra.mxu0 %v3100_v35 }
 0x397   :  { %1348 = vmatmul.bf16.gmra.mxu0 %v3101_v40 }
 0x3a7   :  { %1353 = vmatmul.bf16.gmra.mxu0 %v3102_v1 }
 0x3b7   :  { %1358 = vmatmul.bf16.gmra.mxu0 %v3103_v18 }
 0x3c7   :  { %1363 = vmatmul.bf16.gmra.mxu0 %v3104_v51 }
 0x3d4   :  { %v1329_v9 = vpop.f32.mrf.mxu0 }
 0x3dc   :  { %v1331_v7 = vpop.f32.mrf.mxu0 }
 0x3e4   :  { %v1334_v23 = vpop.f32.mrf.mxu0 }
 0x3ec   :  { %v1336_v30 = vpop.f32.mrf.mxu0 }
 0x3f4   :  { %v1339_v58 = vpop.f32.mrf.mxu0 }
 0x3fc   :  { %v1341_v39 = vpop.f32.mrf.mxu0 }
 0x3fd   :  { %v1342_v51 = vadd.f32 %v1341_v39, %v1319_v37  ;;  %v1332_v39 = vadd.f32 %v1331_v7, %v1319_v37 }
 0x404   :  { %v1344_v63 = vpop.f32.mrf.mxu0 }
 0x405   :  { %v1345_v1 = vadd.f32 %v1344_v63, %v1319_v37  ;;  %v1335_v63 = vadd.f32 %v1334_v23, %v1319_v37  ;;  %v2909_v23 = vld [vmem:[#allocation8 + $0x28] sm:$0xff] }
 0x406   :  { %1952 = vmatpush.bf16.msra.mxu2 %v2909_v23 }
 0x40c   :  { %v1346_v56 = vpop.f32.mrf.mxu0 }
 0x40d   :  { %v1347_v33 = vadd.f32 %v1346_v56, %v1319_v37  ;;  %v1337_v56 = vadd.f32 %v1336_v30, %v1319_v37  ;;  %v4651_v30 = vmul.f32 0.999995, %v1332_v39  ;;  %v2879_v39 = vld [vmem:[#allocation10 + $0x60] sm:$0xff] }
 0x40f   :  { %5406 = vst [vmem:[#allocation33_spill] sm:$0xff] %v4651_v30 }
 0x414   :  { %v1349_v17 = vpop.f32.mrf.mxu0 }
 0x415   :  { %v1350_v34 = vadd.f32 %v1349_v17, %v1319_v37  ;;  %v1340_v17 = vadd.f32 %v1339_v58, %v1319_v37  ;;  %v1330_v58 = vadd.f32 %v1329_v9, %v1319_v37  ;;  %v2908_v9 = vld [vmem:[#allocation8 + $0x20] sm:$0xff] }
 0x416   :  { %1953 = vmatpush.bf16.msra.mxu2 %v2908_v9 }
 0x417   :  { %v4631_v18 = vmul.f32 0.999995, %v1350_v34 }
 0x419   :  { %5399 = vst [vmem:[#allocation49_spill] sm:$0xff] %v4631_v18 }
 0x41c   :  { %v1351_v29 = vpop.f32.mrf.mxu0 }
 0x41d   :  { %v1352_v31 = vadd.f32 %v1351_v29, %v1319_v37  ;;  %v4633_v29 = vmul.f32 0.999995, %v1347_v33 }
 0x41f   :  { %v4627_v35 = vmul.f32 0.999995, %v1352_v31  ;;  %5400 = vst [vmem:[#allocation43_spill] sm:$0xff] %v4633_v29  ;;  %v2865_v31 = vld [vmem:[%s5108_s4 + $0x40] sm:$0xff] }
 0x421   :  { %5398 = vst [vmem:[#allocation23_spill] sm:$0xff] %v4627_v35 }
 0x424   :  { %v1354_v44 = vpop.f32.mrf.mxu0 }
 0x425   :  { %v1355_v26 = vadd.f32 %v1354_v44, %v1319_v37  ;;  %v1428_v44 = vpack.c.bf16 %v4627_v35, %v4631_v18 }
 0x427   :  { %v4625_v41 = vmul.f32 0.999995, %v1355_v26  ;;  %v2866_v26 = vld [vmem:[%s5108_s4 + $0x48] sm:$0xff]  ;;  %s3269_s4 = smov 32  }
 0x428   :  { %1469 = vmatpush.bf16.msra.mxu1 %v2866_v26  ;;  %v2881_v26 = vld [vmem:[#allocation10 + $0x70] sm:$0xff] }
 0x42c   :  { %v1356_v14 = vpop.f32.mrf.mxu0  ;;  %1470 = vmatpush.bf16.msra.mxu1 %v2865_v31 }
 0x42d   :  { %v1357_v54 = vadd.f32 %v1356_v14, %v1319_v37  ;;  %v4637_v14 = vmul.f32 0.999995, %v1345_v1  ;;  %v2903_v1 = vld [vmem:[#allocation8 + $0x18] sm:$0xff] }
 0x42f   :  { %v4621_v28 = vmul.f32 0.999995, %v1357_v54  ;;  %5401 = vst [vmem:[#allocation48_spill] sm:$0xff] %v4637_v14 }
 0x430   :  { %1542 = vmatpush.bf16.msrb.mxu1 %v2903_v1 }
 0x431   :  { %v1429_v40 = vpack.c.bf16 %v4621_v28, %v4625_v41 }
 0x434   :  { %v1359_v60 = vpop.f32.mrf.mxu0 }
 0x435   :  { %v1360_v10 = vadd.f32 %v1359_v60, %v1319_v37  ;;  %v4639_v60 = vmul.f32 0.999995, %v1342_v51  ;;  %v2900_v51 = vld [vmem:[#allocation8] sm:$0xff] }
 0x437   :  { %v4619_v36 = vmul.f32 0.999995, %v1360_v10  ;;  %5402 = vst [vmem:[#allocation50_spill] sm:$0xff] %v4639_v60  ;;  %v4655_v10 = vmul.f32 0.999995, %v1330_v58 }
 0x439   :  { %5407 = vst [vmem:[#allocation21_spill] sm:$0xff] %v4655_v10  ;;  %v1424_v7 = vpack.c.bf16 %v4651_v30, %v4655_v10 }
 0x43c   :  { %v1361_v38 = vpop.f32.mrf.mxu0 }
 0x43d   :  { %v1362_v12 = vadd.f32 %v1361_v38, %v1319_v37  ;;  %v1427_v38 = vpack.c.bf16 %v4633_v29, %v4637_v14  ;;  %v4796_v14 = vld [vmem:[#allocation10 + $0x68] sm:$0xff]  }
 0x43e   :  { %v191_v29 = vunpack.c.h.bf16 %v4796_v14  ;;  %v190_v35 = vunpack.c.l.bf16 %v4796_v14 }
 0x43f   :  { %v4615_v47 = vmul.f32 0.999995, %v1362_v12  ;;  %v4649_v12 = vmul.f32 0.999995, %v1335_v63  ;;  %v2878_v63 = vld [vmem:[#allocation10 + $0x58] sm:$0xff] }
 0x441   :  { %v1430_v45 = vpack.c.bf16 %v4615_v47, %v4619_v36  ;;  %5405 = vst [vmem:[#allocation20_spill] sm:$0xff] %v4649_v12 }
 0x444   :  { %v1364_v49 = vpop.f32.mrf.mxu0 }
 0x445   :  { %v1365_v24 = vadd.f32 %v1364_v49, %v1319_v37  ;;  %v4643_v49 = vmul.f32 0.999995, %v1340_v17  ;;  %v2875_v17 = vld [vmem:[#allocation10 + $0x40] sm:$0xff] }
 0x446   :  { %1591 = vrot.lane.b32.xlu0 %v2875_v17, %s3260_s17 }
 0x447   :  { %v4611_v50 = vmul.f32 0.999995, %v1365_v24  ;;  %5403 = vst [vmem:[#allocation52_spill] sm:$0xff] %v4643_v49  ;;  %v4645_v24 = vmul.f32 0.999995, %v1337_v56  ;;  %v2876_v56 = vld [vmem:[#allocation10 + $0x48] sm:$0xff] }
 0x448   :  { %1593 = vrot.lane.b32.xlu1 %v2876_v56, %s3260_s17 }
 0x449   :  { %5404 = vst [vmem:[#allocation32_spill] sm:$0xff] %v4645_v24 }
 0x44c   :  { %v1366_v61 = vpop.f32.mrf.mxu0 }
 0x44d   :  { %v1367_v8 = vadd.f32 %v1366_v61, %v1319_v37  ;;  %v1426_v61 = vpack.c.bf16 %v4639_v60, %v4643_v49  ;;  %v1419_v37 = vpop.f32.mrf.mxu1  ;;  %v5206_v60 = vunpack.c.l.bf16 %v4788_v55 }
 0x44e   :  { %1597 = vrot.lane.b32.xlu0 %v2878_v63, %s3260_s17 }
 0x44f   :  { %v4613_v27 = vmul.f32 0.999995, %v1367_v8  ;;  %v1425_v8 = vpack.c.bf16 %v4645_v24, %v4649_v12  ;;  %v5205_v12 = vunpack.c.l.bf16 %v4784_v0  ;;  %v5204_v24 = vunpack.c.h.bf16 %v4784_v0 }
 0x450   :  { %1599 = vrot.lane.b32.xlu1 %v2879_v39, %s3260_s17 }
 0x451   :  { %v1431_v52 = vpack.c.bf16 %v4613_v27, %v4611_v50 }
 0x453   :  { %1432 = vmatpush.bf16.msrb.mxu3 %v1431_v52 }
 0x455   :  { %v1421_v54 = vpop.f32.mrf.mxu1 }
 0x456   :  { %v4662_v52 = vpack.c.bf16 %v1421_v54, %v1419_v37  ;;  %v2882_v54 = vld [vmem:[#allocation10 + $0x78] sm:$0xff] }
 0x457   :  { %1433 = vmatpush.bf16.msrb.mxu3 %v1430_v45 }
 0x458   :  { %2806 = vmatmul.msk.bf16.vlgmr.msra.gmra.mxu2 %vm5408_vm0, %v4662_v52  ;;  %1605 = vrot.lane.b32.xlu1 %v2882_v54, %s3260_s17 }
 0x45b   :  { %1434 = vmatpush.bf16.msrb.mxu3 %v1429_v40  ;;  %v2901_v40 = vld [vmem:[#allocation8 + $0x8] sm:$0xff] }
 0x45f   :  { %1435 = vmatpush.bf16.msrb.mxu3 %v1428_v44  ;;  %v2902_v44 = vld [vmem:[#allocation8 + $0x10] sm:$0xff] }
 0x460   :  { %1543 = vmatpush.bf16.msrb.mxu1 %v2902_v44 }
 0x463   :  { %1436 = vmatpush.bf16.msrb.mxu3 %v1427_v38  ;;  %v2877_v38 = vld [vmem:[#allocation10 + $0x50] sm:$0xff] }
 0x464   :  { %1595 = vrot.lane.b32.xlu2 %v2877_v38, %s3260_s17 }
 0x467   :  { %1437 = vmatpush.bf16.msrb.mxu3 %v1426_v61  ;;  %v2880_v61 = vld [vmem:[#allocation10 + $0x68] sm:$0xff] }
 0x468   :  { %1601 = vrot.lane.b32.xlu0 %v2880_v61, %s3260_s17  ;;  %v4720_v61 = vld [vmem:[#allocation10 + $0x40] sm:$0xff]  }
 0x46b   :  { %1438 = vmatpush.bf16.msrb.mxu3 %v1425_v8  ;;  %v1447_v8 = vperm.slane %v4608_v59, 2 }
 0x46c   :  { %1603 = vrot.lane.b32.xlu2 %v2881_v26, %s3260_s17  ;;  %v4730_v26 = vld [vmem:[#allocation10 + $0x48] sm:$0xff]  }
 0x46f   :  { %1439 = vmatpush.bf16.msrb.mxu3 %v1424_v7 }
 0x472   :  { %2672 = vmatmul.msk.bf16.vlgmr.msrb.gmra.mxu3 %vm3610_vm4, %v5170_v13 }
 0x473   :  { %1516 = vmatpush.bf16.msra.mxu3 %v2901_v40 }
 0x477   :  { %1517 = vmatpush.bf16.msra.mxu3 %v2900_v51 }
 0x4ba   :  { %v4688_v59 = vpop.permute.xlu1 %1593 }
 0x4be   :  { %v4692_v40 = vpop.permute.xlu2 %1595 }
 0x4c2   :  { %v4700_v51 = vpop.permute.xlu1 %1599 }
 0x4c6   :  { %v4708_v17 = vpop.permute.xlu2 %1603 }
 0x4ca   :  { %v4712_v56 = vpop.permute.xlu1 %1605 }
 0x4f5   :  { %v1441_v45 = vpop.f32.mrf.mxu3 }
 0x4fd   :  { %v1443_v34 = vpop.f32.mrf.mxu3 }
 0x4fe   :  { %v1446_v33 = vpack.c.bf16 %v1443_v34, %v1441_v45 }
 0x500   :  { %2681 = vmatmul.msk.bf16.vlgmr.msra.gmra.mxu1 %vm5409_vm6, %v1446_v33  ;;  %v4684_v33 = vpop.permute.xlu0 %1591 }
 0x508   :  { %v4696_v1 = vpop.permute.xlu0 %1597 }
 0x510   :  { %v4704_v44 = vpop.permute.xlu0 %1601 }
 0x57d   :  { %v1472_v58 = vpop.f32.mrf.mxu1 }
 0x57e   :  { %v1473_v23 = vadd.f32 %v1472_v58, %v1447_v8  ;;  %v5172_v58 = vunpack.c.l.bf16 %v4720_v61 }
 0x585   :  { %v1474_v7 = vpop.f32.mrf.mxu1 }
 0x586   :  { %v1475_v9 = vadd.f32 %v1474_v7, %v1447_v8  ;;  %v5173_v8 = vunpack.c.h.bf16 %v4720_v61 }
 0x588   :  { %v1494_v37 = vpack.c.bf16 %v1475_v9, %v1473_v23 }
 0x58a   :  { %2690 = vmatmul.msk.bf16.vlgmr.msra.gmra.mxu3 %vm5410_vm3, %v1494_v37  ;;  %2699 = vmatmul.msk.bf16.vlgmr.msrb.gmra.mxu1 %vm5411_vm1, %v1494_v37 }
 0x607   :  { %v1545_v31 = vpop.f32.mrf.mxu1 }
 0x60d   :  { %v4716_v38 = vpop.f32.mrf.mxu3 }
 0x60f   :  { %v1547_v45 = vpop.f32.mrf.mxu1 }
 0x610   :  { %v1550_v34 = vpack.c.bf16 %v1547_v45, %v1545_v31  ;;  %v5176_v31 = vunpack.c.l.bf16 %v4730_v26  ;;  %v5177_v45 = vunpack.c.h.bf16 %v4730_v26 }
 0x612   :  { %1639 = vmatpush.bf16.msrb.mxu3 %v1550_v34 }
 0x615   :  { %2732 = vmatmul.msk.bf16.vlgmr.msrb.gmra.mxu3 %vm1607_vm15, %v4684_v33  ;;  %v4718_v63 = vpop.f32.mrf.mxu3 }
 0x625   :  { %2733 = vmatmul.msk.bf16.gmra.mxu3 %vm1607_vm15, %v4688_v59 }
 0x635   :  { %2734 = vmatmul.msk.bf16.gmra.mxu3 %vm1607_vm15, %v4692_v40 }
 0x645   :  { %2735 = vmatmul.msk.bf16.gmra.mxu3 %vm1607_vm15, %v4696_v1 }
 0x655   :  { %2736 = vmatmul.msk.bf16.gmra.mxu3 %vm1607_vm15, %v4700_v51 }
 0x665   :  { %2737 = vmatmul.msk.bf16.gmra.mxu3 %vm1607_vm15, %v4704_v44 }
 0x675   :  { %2738 = vmatmul.msk.bf16.gmra.mxu3 %vm1607_vm15, %v4708_v17 }
 0x685   :  { %2739 = vmatmul.msk.bf16.gmra.mxu3 %vm1607_vm15, %v4712_v56 }
 0x698   :  { %v1641_v39 = vpop.f32.mrf.mxu3 }
 0x699   :  { %v1681_v23 = vmul.f32 %v1641_v39, %v5172_v58 }
 0x6a0   :  { %v1643_v7 = vpop.f32.mrf.mxu3 }
 0x6a1   :  { %v1682_v9 = vmul.f32 %v1643_v7, %v5173_v8  ;;  %v4740_v7 = vld [vmem:[#allocation10 + $0x50] sm:$0xff]  }
 0x6a3   :  { %v4728_v37 = vpack.c.bf16 %v1682_v9, %v1681_v23  ;;  %v5180_v23 = vunpack.c.l.bf16 %v4740_v7  ;;  %v5181_v9 = vunpack.c.h.bf16 %v4740_v7 }
 0x6a8   :  { %v1646_v54 = vpop.f32.mrf.mxu3 }
 0x6a9   :  { %v1683_v13 = vmul.f32 %v1646_v54, %v5176_v31 }
 0x6b0   :  { %v1648_v34 = vpop.f32.mrf.mxu3 }
 0x6b1   :  { %v1684_v16 = vmul.f32 %v1648_v34, %v5177_v45  ;;  %v4750_v34 = vld [vmem:[#allocation10 + $0x58] sm:$0xff]  }
 0x6b3   :  { %v4738_v39 = vpack.c.bf16 %v1684_v16, %v1683_v13  ;;  %v5182_v16 = vunpack.c.l.bf16 %v4750_v34  ;;  %v5183_v13 = vunpack.c.h.bf16 %v4750_v34 }
 0x6b8   :  { %v1651_v58 = vpop.f32.mrf.mxu3 }
 0x6b9   :  { %v1685_v25 = vmul.f32 %v1651_v58, %v5180_v23 }
 0x6c0   :  { %v1653_v8 = vpop.f32.mrf.mxu3 }
 0x6c1   :  { %v1686_v48 = vmul.f32 %v1653_v8, %v5181_v9  ;;  %v4760_v8 = vld [vmem:[#allocation10 + $0x38] sm:$0xff]  ;;  %v4766_v9 = vld [vmem:[#allocation10 + $0x28] sm:$0xff] }
 0x6c2   :  { %1810 = vmatpush.bf16.msra.mxu0 %v4760_v8 }
 0x6c3   :  { %v4748_v54 = vpack.c.bf16 %v1686_v48, %v1685_v25  ;;  %v4763_v48 = vld [vmem:[#allocation10 + $0x30] sm:$0xff] }
 0x6c6   :  { %1811 = vmatpush.bf16.msra.mxu0 %v4763_v48 }
 0x6c8   :  { %v1656_v31 = vpop.f32.mrf.mxu3 }
 0x6c9   :  { %v1687_v4 = vmul.f32 %v1656_v31, %v5182_v16  ;;  %v4769_v31 = vld [vmem:[#allocation10 + $0x20] sm:$0xff] }
 0x6ca   :  { %1812 = vmatpush.bf16.msra.mxu0 %v4766_v9 }
 0x6ce   :  { %1813 = vmatpush.bf16.msra.mxu0 %v4769_v31 }
 0x6d0   :  { %v1658_v45 = vpop.f32.mrf.mxu3 }
 0x6d1   :  { %v1688_v46 = vmul.f32 %v1658_v45, %v5183_v13  ;;  %v4778_v13 = vld [vmem:[#allocation10 + $0x8] sm:$0xff] }
 0x6d3   :  { %v4758_v58 = vpack.c.bf16 %v1688_v46, %v1687_v4  ;;  %v4772_v4 = vld [vmem:[#allocation10 + $0x18] sm:$0xff]  ;;  %v4775_v46 = vld [vmem:[#allocation10 + $0x10] sm:$0xff] }
 0x6d4   :  { %1814 = vmatpush.bf16.msra.mxu0 %v4772_v4 }
 0x6d8   :  { %v1661_v23 = vpop.f32.mrf.mxu3  ;;  %1815 = vmatpush.bf16.msra.mxu0 %v4775_v46 }
 0x6dc   :  { %1816 = vmatpush.bf16.msra.mxu0 %v4778_v13 }
 0x6e0   :  { %v1663_v25 = vpop.f32.mrf.mxu3  ;;  %1817 = vmatpush.bf16.msra.mxu0 %v4781_v11 }
 0x6e8   :  { %v1666_v16 = vpop.f32.mrf.mxu3 }
 0x6f0   :  { %v1668_v45 = vpop.f32.mrf.mxu3 }
 0x6f8   :  { %v1671_v10 = vpop.f32.mrf.mxu3 }
 0x6f9   :  { %v1693_v15 = vmul.f32 %v1671_v10, %v5206_v60 }
 0x700   :  { %v1673_v30 = vpop.f32.mrf.mxu3 }
 0x701   :  { %v1694_v43 = vmul.f32 %v1673_v30, %v193_v5 }
 0x708   :  { %v1676_v32 = vpop.f32.mrf.mxu3 }
 0x709   :  { %v1695_v6 = vmul.f32 %v1676_v32, %v5205_v12  ;;  %v4805_v32 = vld [vmem:[#allocation10 + $0x60] sm:$0xff]   ;;  %v1703_v12 = vpack.c.bf16 %v1694_v43, %v1693_v15 }
 0x70a   :  { %v188_v30 = vunpack.c.l.bf16 %v4805_v32 }
 0x710   :  { %v1678_v49 = vpop.f32.mrf.mxu3 }
 0x711   :  { %v1696_v53 = vmul.f32 %v1678_v49, %v5204_v24  ;;  %v189_v49 = vunpack.c.h.bf16 %v4805_v32  ;;  %v1692_v24 = vmul.f32 %v1668_v45, %v191_v29 }
 0x713   :  { %v1704_v18 = vpack.c.bf16 %v1696_v53, %v1695_v6  ;;  %v1691_v6 = vmul.f32 %v1666_v16, %v190_v35  ;;  %v1690_v53 = vmul.f32 %v1663_v25, %v189_v49  ;;  %v1710_v16 = vsel %vm5419_vm11, %v4728_v37, 0  ;;  %v4835_v25 = vld [vmem:[#allocation10 + $0x80] sm:$0xff]   ;;  %vm5449_vm11 = vmmov %vm5418_vm2 }
 0x715   :  { %1855 = vmatpush.bf16.msrb.mxu0 %v1704_v18  ;;  %v1731_v2 = vsel %vm5412_vm10, %v1704_v18, 0  ;;  %v1702_v10 = vpack.c.bf16 %v1692_v24, %v1691_v6  ;;  %v1689_v18 = vmul.f32 %v1661_v23, %v188_v30  ;;  %v1719_v24 = vsel %vm5416_vm13, %v4758_v58, 0 }
 0x716   :  { %1733 = vmatpush.bf16.xpose.msra.mxu1 %v1731_v2  ;;  %v1728_v2 = vsel %vm5413_vm8, %v1703_v12, 0  ;;  %v1713_v23 = vsel %vm5418_vm2, %v4738_v39, 0  ;;  %vm5436_vm13 = vcmask 261120  }
 0x717   :  { %v1701_v60 = vpack.c.bf16 %v1690_v53, %v1689_v18  ;;  %v1725_v15 = vsel %vm5414_vm14, %v1702_v10, 0 }
 0x719   :  { %1856 = vmatpush.bf16.msrb.mxu0 %v1703_v12  ;;  %v1722_v43 = vsel %vm5415_vm7, %v1701_v60, 0  ;;  %v1716_v12 = vsel %vm5417_vm5, %v4748_v54, 0  ;;  %vm5435_vm7 = vmmov %vm5418_vm2 }
 0x71a   :  { %vm5448_vm5 = vmmov %vm5418_vm2 }
 0x71d   :  { %1857 = vmatpush.bf16.msrb.mxu0 %v1702_v10 }
 0x71e   :  { %1734 = vmatpush.bf16.xpose.msra.mxu1 %v1728_v2 }
 0x721   :  { %1858 = vmatpush.bf16.msrb.mxu0 %v1701_v60  ;;  %v1705_v60 = vpack.c.bf16 %v4718_v63, %v4716_v38  ;;  %v5421_v38 = vld [vmem:[#allocation51_spill] sm:$0xff] }
 0x722   :  { %v5422_v63 = vunpack.c.l.bf16 %v5421_v38  ;;  %v5423_v18 = vunpack.c.h.bf16 %v5421_v38  ;;  %v5432_v38 = vunpack.c.h.bf16 %v4496_v57 }
 0x724   :  { %v4847_v2 = vpack.i.bf16 %v5423_v18, %v5422_v63  ;;  %v5434_v18 = vunpack.c.h.bf16 %v4529_v19 }
 0x725   :  { %1859 = vmatpush.bf16.msrb.mxu0 %v4758_v58  ;;  %v2918_v58 = vunpack.c.l.bf16 %v4835_v25 }
 0x726   :  { %1735 = vmatpush.bf16.xpose.msra.mxu1 %v1725_v15  ;;  %v5424_v15 = vld [vmem:[#allocation53_spill] sm:$0xff] }
 0x729   :  { %1860 = vmatpush.bf16.msrb.mxu0 %v4748_v54 }
 0x72d   :  { %1861 = vmatpush.bf16.msrb.mxu0 %v4738_v39  ;;  %v2919_v39 = vunpack.c.h.bf16 %v4835_v25  ;;  %v5460_v25 = vunpack.c.l.bf16 %v3960_v62 }
 0x72e   :  { %1736 = vmatpush.bf16.xpose.msra.mxu1 %v1722_v43  ;;  %v5425_v43 = vunpack.c.l.bf16 %v5424_v15 }
 0x731   :  { %1862 = vmatpush.bf16.msrb.mxu0 %v4728_v37 }
 0x736   :  { %1737 = vmatpush.bf16.xpose.msra.mxu1 %v1719_v24  ;;  %v5426_v24 = vunpack.c.h.bf16 %v5424_v15 }
 0x73e   :  { %1738 = vmatpush.bf16.xpose.msra.mxu1 %v1716_v12  ;;  %v4855_v12 = vpack.i.bf16 %v5426_v24, %v5425_v43 }
 0x746   :  { %1739 = vmatpush.bf16.xpose.msra.mxu1 %v1713_v23  ;;  %v5427_v23 = vunpack.c.l.bf16 %v4209_v22 }
 0x74e   :  { %1740 = vmatpush.bf16.xpose.msra.mxu1 %v1710_v16  ;;  %v5428_v16 = vunpack.c.h.bf16 %v4209_v22  ;;  %v5433_v22 = vunpack.c.l.bf16 %v4529_v19  ;;  %v2907_v19 = vld [vmem:[%s5110_s6 + $0x18] sm:$0xff] }
 0x750   :  { %v4887_v15 = vpack.i.bf16 %v5434_v18, %v5433_v22 }
 0x755   :  { %2740 = vmatmul.msk.bf16.vlgmr.msra.gmra.mxu1 %vm5420_vm12, %v1705_v60  ;;  %v4863_v60 = vpack.i.bf16 %v5428_v16, %v5427_v23  ;;  %vm5450_vm12 = vmmov %vm5418_vm2 }
 0x756   :  { %1901 = vmatpush.bf16.msrb.mxu1 %v2907_v19 }
 0x7d2   :  { %v1742_v45 = vpop.f32.mrf.mxu1 }
 0x7d3   :  { %v1747_v54 = vmul.f32 0.5, %v1742_v45  ;;  %v5429_v45 = vunpack.c.l.bf16 %v4323_v42 }
 0x7d5   :  { %v1749_v6 = vadd.f32 %v2918_v58, %v1747_v54  ;;  %v5430_v54 = vunpack.c.h.bf16 %v4323_v42 }
 0x7d7   :  { %1751 = vmax.xlane.f32.xlu0 %v1749_v6 }
 0x7da   :  { %v1744_v53 = vpop.f32.mrf.mxu1 }
 0x7db   :  { %v1748_v37 = vmul.f32 0.5, %v1744_v53  ;;  %v4871_v53 = vpack.i.bf16 %v5430_v54, %v5429_v45 }
 0x7dd   :  { %v1750_v10 = vadd.f32 %v2919_v39, %v1748_v37  ;;  %v5431_v37 = vunpack.c.l.bf16 %v4496_v57 }
 0x7df   :  { %1753 = vmax.xlane.f32.xlu2 %v1750_v10  ;;  %v4879_v63 = vpack.i.bf16 %v5432_v38, %v5431_v37 }
 0x7f7   :  { %2938 = vrot.lane.b32.xlu2 %v4847_v2, %s3260_s17 }
 0x7ff   :  { %2953 = vrot.lane.b32.xlu2 %v4855_v12, %s3269_s4 }
 0x807   :  { %2968 = vrot.lane.b32.xlu2 %v4863_v60, %s3260_s17 }
 0x80f   :  { %2983 = vrot.lane.b32.xlu2 %v4871_v53, %s3269_s4 }
 0x817   :  { %2998 = vrot.lane.b32.xlu2 %v4879_v63, %s3260_s17 }
 0x81f   :  { %3013 = vrot.lane.b32.xlu2 %v4887_v15, %s3269_s4 }
 0x84a   :  { %v1752_v42 = vpop.xlane.xlu0 %1751 }
 0x84b   :  { %v1755_v43 = vsub.f32 %v1749_v6, %v1752_v42 }
 0x84d   :  { %v1757_v24 = vmul.f32 1.442695, %v1755_v43 }
 0x84f   :  { %3081 = vpow2.f32 %v1757_v24 }
 0x852   :  { %v1754_v23 = vpop.xlane.xlu2 %1753 }
 0x853   :  { %v1756_v16 = vsub.f32 %v1750_v10, %v1754_v23 }
 0x855   :  { %v1759_v57 = vmul.f32 1.442695, %v1756_v16  ;;  %v3082_v45 = vpop.eup %3081 }
 0x857   :  { %3083 = vpow2.f32 %v1759_v57 }
 0x85d   :  { %v3084_v54 = vpop.eup %3083 }
 0x85e   :  { %v1761_v37 = vpack.c.bf16 %v3084_v54, %v3082_v45 }
 0x860   :  { %1818 = vmatmul.bf16.vlgmr.msra.gmra.mxu0 %v1761_v37 }
 0x861   :  { %2117 = vmatpush.bf16.msra.mxu0 %v4760_v8 }
 0x865   :  { %2118 = vmatpush.bf16.msra.mxu0 %v4763_v48 }
 0x869   :  { %2119 = vmatpush.bf16.msra.mxu0 %v4766_v9 }
 0x86d   :  { %2120 = vmatpush.bf16.msra.mxu0 %v4769_v31 }
 0x871   :  { %2121 = vmatpush.bf16.msra.mxu0 %v4772_v4 }
 0x875   :  { %2122 = vmatpush.bf16.msra.mxu0 %v4775_v46 }
 0x879   :  { %2123 = vmatpush.bf16.msra.mxu0 %v4778_v13 }
 0x87d   :  { %2124 = vmatpush.bf16.msra.mxu0 %v4781_v11 }
 0x8dd   :  { %v1819_v6 = vpop.f32.mrf.mxu0 }
 0x8de   :  { %3085 = vrcp.f32 %v1819_v6  ;;  %v1835_v13 = vand.u32 2147483648, %v1819_v6  ;;  %vm1829_vm0 = vweird.f32 %v1819_v6  ;;  %v1833_v11 = vand.u32 2147483647, %v1819_v6 }
 0x8e0   :  { %v1836_v23 = vor.u32 1.1754944e-38, %v1835_v13  ;;  %vm1834_vm1 = vcmp.eq.f32.partialorder %v1833_v11, 8.507059e+37 }
 0x8e4   :  { %v3086_v8 = vpop.eup %3085 }
 0x8e5   :  { %v1825_v48 = vmul.f32 %v3086_v8, %v1819_v6  ;;  %v1821_v9 = vpop.f32.mrf.mxu0  ;;  %vm1830_vm9 = vweird.f32 %v3086_v8 }
 0x8e6   :  { %3087 = vrcp.f32 %v1821_v9  ;;  %vm1831_vm6 = vmor %vm1829_vm0, %vm1830_vm9  ;;  %v1850_v18 = vand.u32 2147483648, %v1821_v9  ;;  %v1848_v24 = vand.u32 2147483647, %v1821_v9  ;;  %vm1844_vm10 = vweird.f32 %v1821_v9 }
 0x8e7   :  { %v1826_v31 = vsub.f32 1.0, %v1825_v48  ;;  %vm5451_vm9 = vmmov %vm5418_vm2 }
 0x8e8   :  { %v1851_v37 = vor.u32 1.1754944e-38, %v1850_v18  ;;  %vm1849_vm14 = vcmp.eq.f32.partialorder %v1848_v24, 8.507059e+37  ;;  %vm5452_vm0 = vmmov %vm5418_vm2 }
 0x8e9   :  { %v1827_v10 = vmul.f32 %v3086_v8, %v1826_v31 }
 0x8eb   :  { %v1828_v38 = vadd.f32 %v3086_v8, %v1827_v10 }
 0x8ec   :  { %v3088_v4 = vpop.eup %3087 }
 0x8ed   :  { %v1840_v46 = vmul.f32 %v3088_v4, %v1821_v9  ;;  %v1832_v42 = vsel %vm1831_vm6, %v3086_v8, %v1828_v38  ;;  %vm1845_vm3 = vweird.f32 %v3088_v4  ;;  %v2906_v8 = vld [vmem:[%s5110_s6 + $0x10] sm:$0xff]  ;;  %v2905_v38 = vld [vmem:[%s5110_s6 + $0x8] sm:$0xff]  ;;  %v2904_v9 = vld [vmem:[%s5110_s6] sm:$0xff] }
 0x8ee   :  { %v1837_v57 = vsel %vm1834_vm1, %v1836_v23, %v1832_v42  ;;  %vm1846_vm8 = vmor %vm1844_vm10, %vm1845_vm3  ;;  %1902 = vmatpush.bf16.msrb.mxu1 %v2906_v8  ;;  %v5441_v8 = vunpack.c.l.bf16 %v4740_v7 }
 0x8ef   :  { %v1841_v22 = vsub.f32 1.0, %v1840_v46  ;;  %v1838_v31 = vmul.f32 %v3082_v45, %v1837_v57  ;;  %v2910_v45 = vld [vmem:[#allocation8 + $0x30] sm:$0xff]  ;;  %vm5453_vm6 = vmmov %vm5452_vm0 }
 0x8f0   :  { %vm5454_vm3 = vmmov %vm5452_vm0 }
 0x8f1   :  { %v1842_v43 = vmul.f32 %v3088_v4, %v1841_v22  ;;  %vm5455_vm1 = vmmov %vm5436_vm13 }
 0x8f2   :  { %1903 = vmatpush.bf16.msrb.mxu1 %v2905_v38  ;;  %vm5456_vm10 = vmmov %vm5452_vm0 }
 0x8f3   :  { %v1843_v16 = vadd.f32 %v3088_v4, %v1842_v43 }
 0x8f5   :  { %v1847_v19 = vsel %vm1846_vm8, %v3088_v4, %v1843_v16  ;;  %v2911_v4 = vld [vmem:[#allocation8 + $0x38] sm:$0xff]  ;;  %vm5466_vm8 = vmmov %vm5455_vm1 }
 0x8f6   :  { %v1852_v48 = vsel %vm1849_vm14, %v1851_v37, %v1847_v19  ;;  %1904 = vmatpush.bf16.msrb.mxu1 %v2904_v9  ;;  %v5442_v9 = vunpack.c.h.bf16 %v4740_v7  ;;  %v5445_v7 = vunpack.c.l.bf16 %v4784_v0  ;;  %vm5469_vm14 = vmmov %vm5455_vm1 }
 0x8f7   :  { %v1853_v10 = vmul.f32 %v3084_v54, %v1852_v48 }
 0x8f9   :  { %v1854_v6 = vpack.c.bf16 %v1853_v10, %v1838_v31 }
 0x8fa   :  { %1978 = vmatpush.bf16.msra.mxu1 %v2911_v4 }
 0x8fb   :  { %1863 = vmatmul.bf16.vlgmr.msrb.gmra.mxu0 %v1854_v6 }
 0x8fe   :  { %1979 = vmatpush.bf16.msra.mxu1 %v2910_v45 }
 0x978   :  { %v1864_v54 = vpop.f32.mrf.mxu0 }
 0x980   :  { %v1866_v46 = vpop.f32.mrf.mxu0 }
 0x981   :  { %v1869_v13 = vpack.c.bf16 %v1866_v46, %v1864_v54  ;;  %v5443_v46 = vunpack.c.l.bf16 %v4750_v34 }
 0x983   :  { %2789 = vmatmul.msk.bf16.vlgmr.msrb.gmra.mxu1 %vm5435_vm7, %v1869_v13  ;;  %vm5472_vm7 = vmmov %vm5455_vm1 }
 0x993   :  { %2815 = vmatmul.msk.bf16.vlgmr.msra.gmra.mxu1 %vm5436_vm13, %v4662_v52  ;;  %v4936_v52 = vpop.f32.mrf.mxu2  ;;  %vm5475_vm13 = vmmov %vm5455_vm1 }
 0xa00   :  { %v4914_v11 = vpop.f32.mrf.mxu1 }
 0xa08   :  { %v4916_v22 = vpop.f32.mrf.mxu1 }
 0xa09   :  { %v2378_v18 = vpack.c.bf16 %v4916_v22, %v4914_v11 }
 0xa10   :  { %v1981_v42 = vpop.f32.mrf.mxu1 }
 0xa18   :  { %v1983_v43 = vpop.f32.mrf.mxu1 }
 0xa19   :  { %v1986_v24 = vpack.c.bf16 %v1983_v43, %v1981_v42  ;;  %v5444_v42 = vunpack.c.h.bf16 %v4750_v34 }
 0xa1b   :  { %1994 = vmatpush.bf16.msrb.mxu2 %v1986_v24 }
 0xa1e   :  { %2816 = vmatmul.msk.bf16.vlgmr.msrb.gmra.mxu2 %vm1607_vm15, %v4684_v33  ;;  %v4938_v33 = vpop.f32.mrf.mxu2 }
 0xa2e   :  { %2817 = vmatmul.msk.bf16.gmra.mxu2 %vm1607_vm15, %v4688_v59 }
 0xa3e   :  { %2818 = vmatmul.msk.bf16.gmra.mxu2 %vm1607_vm15, %v4692_v40 }
 0xa4e   :  { %2819 = vmatmul.msk.bf16.gmra.mxu2 %vm1607_vm15, %v4696_v1  ;;  %v5437_v1 = vunpack.c.l.bf16 %v4720_v61 }
 0xa5e   :  { %2820 = vmatmul.msk.bf16.gmra.mxu2 %vm1607_vm15, %v4700_v51  ;;  %v5438_v51 = vunpack.c.h.bf16 %v4720_v61 }
 0xa6e   :  { %2821 = vmatmul.msk.bf16.gmra.mxu2 %vm1607_vm15, %v4704_v44 }
 0xa7e   :  { %2822 = vmatmul.msk.bf16.gmra.mxu2 %vm1607_vm15, %v4708_v17  ;;  %v5439_v17 = vunpack.c.l.bf16 %v4730_v26 }
 0xa8e   :  { %2823 = vmatmul.msk.bf16.gmra.mxu2 %vm1607_vm15, %v4712_v56  ;;  %v5440_v56 = vunpack.c.h.bf16 %v4730_v26 }
 0xaa1   :  { %v1996_v59 = vpop.f32.mrf.mxu2 }
 0xaa2   :  { %v2036_v23 = vmul.f32 %v1996_v59, %v5437_v1 }
 0xaa9   :  { %v1998_v40 = vpop.f32.mrf.mxu2 }
 0xaaa   :  { %v2037_v16 = vmul.f32 %v1998_v40, %v5438_v51 }
 0xaac   :  { %v4944_v57 = vpack.c.bf16 %v2037_v16, %v2036_v23 }
 0xab1   :  { %v2001_v44 = vpop.f32.mrf.mxu2 }
 0xab2   :  { %v2038_v19 = vmul.f32 %v2001_v44, %v5439_v17  ;;  %v5446_v17 = vunpack.c.h.bf16 %v4784_v0 }
 0xab9   :  { %v2003_v37 = vpop.f32.mrf.mxu2 }
 0xaba   :  { %v2039_v48 = vmul.f32 %v2003_v37, %v5440_v56 }
 0xabc   :  { %v2053_v31 = vpack.c.bf16 %v2039_v48, %v2038_v19  ;;  %v5447_v48 = vunpack.c.l.bf16 %v4788_v55 }
 0xac1   :  { %v2006_v10 = vpop.f32.mrf.mxu2 }
 0xac2   :  { %v2040_v38 = vmul.f32 %v2006_v10, %v5441_v8 }
 0xac9   :  { %v2008_v6 = vpop.f32.mrf.mxu2 }
 0xaca   :  { %v2041_v61 = vmul.f32 %v2008_v6, %v5442_v9 }
 0xacc   :  { %v2054_v4 = vpack.c.bf16 %v2041_v61, %v2040_v38 }
 0xace   :  { %v2071_v32 = vsel %vm5452_vm0, %v2054_v4, 0  ;;  %vm5493_vm0 = vmmov %vm5455_vm1 }
 0xad1   :  { %v2011_v45 = vpop.f32.mrf.mxu2 }
 0xad2   :  { %v2042_v13 = vmul.f32 %v2011_v45, %v5443_v46  ;;  %v2068_v46 = vsel %vm5453_vm6, %v2053_v31, 0  ;;  %vm5496_vm6 = vmmov %vm5493_vm0 }
 0xad9   :  { %v2013_v54 = vpop.f32.mrf.mxu2 }
 0xada   :  { %v2043_v43 = vmul.f32 %v2013_v54, %v5444_v42 }
 0xadc   :  { %v2055_v26 = vpack.c.bf16 %v2043_v43, %v2042_v13 }
 0xade   :  { %v2074_v14 = vsel %vm5451_vm9, %v2055_v26, 0  ;;  %vm5490_vm9 = vmmov %vm5455_vm1 }
 0xae1   :  { %v2016_v24 = vpop.f32.mrf.mxu2 }
 0xae2   :  { %v2044_v55 = vmul.f32 %v2016_v24, %v188_v30  ;;  %v2065_v24 = vsel %vm5454_vm3, %v4944_v57, 0  ;;  %vm5499_vm3 = vmmov %vm5493_vm0 }
 0xae9   :  { %v2018_v59 = vpop.f32.mrf.mxu2 }
 0xaea   :  { %v2045_v0 = vmul.f32 %v2018_v59, %v189_v49  ;;  %v2939_v49 = vpop.permute.xlu2 %2938 }
 0xaeb   :  { %v2941_v30 = vunpack.i.h.bf16 %v2939_v49  ;;  %v2940_v54 = vunpack.i.l.bf16 %v2939_v49 }
 0xaec   :  { %v2056_v45 = vpack.c.bf16 %v2045_v0, %v2044_v55  ;;  %v5464_v0 = vld [vmem:[#allocation42_spill] sm:$0xff] }
 0xaed   :  { %v2297_v13 = vadd.f32 %v2941_v30, %v4613_v27  ;;  %v2296_v42 = vadd.f32 %v2940_v54, %v4611_v50 }
 0xaef   :  { %v2305_v43 = vpack.c.bf16 %v2297_v13, %v2296_v42 }
 0xaf1   :  { %v2021_v40 = vpop.f32.mrf.mxu2 }
 0xaf2   :  { %v2046_v9 = vmul.f32 %v2021_v40, %v190_v35  ;;  %v2077_v35 = vsel %vm5450_vm12, %v2056_v45, 0  ;;  %vm5487_vm12 = vmmov %vm5455_vm1 }
 0xaf9   :  { %v2023_v1 = vpop.f32.mrf.mxu2 }
 0xafa   :  { %v2047_v8 = vmul.f32 %v2023_v1, %v191_v29 }
 0xb01   :  { %v2026_v23 = vpop.f32.mrf.mxu2 }
 0xb02   :  { %v2048_v10 = vmul.f32 %v2026_v23, %v5447_v48 }
 0xb09   :  { %v2028_v51 = vpop.f32.mrf.mxu2 }
 0xb0a   :  { %v2049_v56 = vmul.f32 %v2028_v51, %v193_v5  ;;  %v2057_v5 = vpack.c.bf16 %v2047_v8, %v2046_v9 }
 0xb0c   :  { %v2058_v38 = vpack.c.bf16 %v2049_v56, %v2048_v10  ;;  %v2080_v29 = vsel %vm5449_vm11, %v2057_v5, 0  ;;  %v2954_v56 = vpop.permute.xlu2 %2953  ;;  %vm5484_vm11 = vmmov %vm5455_vm1 }
 0xb0d   :  { %v2955_v8 = vunpack.i.l.bf16 %v2954_v56 }
 0xb0e   :  { %v2083_v61 = vsel %vm5418_vm2, %v2058_v38, 0  ;;  %vm5481_vm2 = vmmov %vm5455_vm1 }
 0xb11   :  { %v2031_v16 = vpop.f32.mrf.mxu2 }
 0xb12   :  { %v2050_v37 = vmul.f32 %v2031_v16, %v5445_v7 }
 0xb14   :  { %v2969_v13 = vpop.permute.xlu2 %2968 }
 0xb19   :  { %v2033_v44 = vpop.f32.mrf.mxu2 }
 0xb1a   :  { %v2051_v19 = vmul.f32 %v2033_v44, %v5446_v17 }
 0xb1c   :  { %v2059_v34 = vpack.c.bf16 %v2051_v19, %v2050_v37  ;;  %v5462_v19 = vmov 1.0|1.0  }
 0xb1e   :  { %2162 = vmatpush.bf16.msrb.mxu1 %v2059_v34  ;;  %v2086_v6 = vsel %vm5448_vm5, %v2059_v34, 0  ;;  %vm5478_vm5 = vmmov %vm5455_vm1 }
 0xb1f   :  { %2088 = vmatpush.bf16.xpose.msra.mxu3 %v2086_v6  ;;  %v2956_v6 = vunpack.i.h.bf16 %v2954_v56 }
 0xb21   :  { %v2367_v20 = vadd.f32 %v2956_v6, %v4173_v3 }
 0xb22   :  { %2163 = vmatpush.bf16.msrb.mxu1 %v2058_v38  ;;  %v5463_v38 = vld [vmem:[#allocation46_spill] sm:$0xff] }
 0xb26   :  { %2164 = vmatpush.bf16.msrb.mxu1 %v2057_v5 }
 0xb27   :  { %2089 = vmatpush.bf16.xpose.msra.mxu3 %v2083_v61 }
 0xb2a   :  { %2165 = vmatpush.bf16.msrb.mxu1 %v2056_v45 }
 0xb2e   :  { %2166 = vmatpush.bf16.msrb.mxu1 %v2055_v26  ;;  %v2446_v26 = vsel %vm5455_vm1, %v2305_v43, 0 }
 0xb2f   :  { %2090 = vmatpush.bf16.xpose.msra.mxu3 %v2080_v29 }
 0xb32   :  { %2167 = vmatpush.bf16.msrb.mxu1 %v2054_v4  ;;  %v2060_v4 = vpack.c.bf16 %v4938_v33, %v4936_v52  ;;  %v5457_v52 = vld [vmem:[#allocation55_spill] sm:$0xff] }
 0xb33   :  { %v5458_v33 = vunpack.c.l.bf16 %v5457_v52  ;;  %v5459_v1 = vunpack.c.h.bf16 %v5457_v52 }
 0xb35   :  { %v2962_v23 = vpack.i.bf16 %v5459_v1, %v5458_v33  ;;  %v5470_v33 = vld [vmem:[#allocation23_spill] sm:$0xff] }
 0xb36   :  { %2168 = vmatpush.bf16.msrb.mxu1 %v2053_v31 }
 0xb37   :  { %2091 = vmatpush.bf16.xpose.msra.mxu3 %v2077_v35 }
 0xb3a   :  { %2169 = vmatpush.bf16.msrb.mxu1 %v4944_v57 }
 0xb3f   :  { %2092 = vmatpush.bf16.xpose.msra.mxu3 %v2074_v14 }
 0xb47   :  { %2093 = vmatpush.bf16.xpose.msra.mxu3 %v2071_v32  ;;  %v2366_v32 = vadd.f32 %v2955_v8, %v4070_v21 }
 0xb4f   :  { %2094 = vmatpush.bf16.xpose.msra.mxu3 %v2068_v46 }
 0xb57   :  { %2095 = vmatpush.bf16.xpose.msra.mxu3 %v2065_v24 }
 0xb5e   :  { %2824 = vmatmul.msk.bf16.vlgmr.msra.gmra.mxu3 %vm5456_vm10, %v2060_v4  ;;  %vm5501_vm10 = vmmov %vm5493_vm0 }
 0xb5f   :  { %2448 = vmatpush.bf16.xpose.msrb.mxu3 %v2446_v26  ;;  %v2376_v26 = vpack.c.bf16 %v2367_v20, %v2366_v32  ;;  %v5482_v32 = vld [vmem:[#allocation50_spill] sm:$0xff] }
 0xbe1   :  { %v2097_v59 = vpop.f32.mrf.mxu3 }
 0xbe2   :  { %v2102_v31 = vmul.f32 0.5, %v2097_v59  ;;  %v2970_v59 = vunpack.i.l.bf16 %v2969_v13 }
 0xbe4   :  { %v2104_v27 = vadd.f32 %v2918_v58, %v2102_v31  ;;  %v5461_v58 = vunpack.c.h.bf16 %v3960_v62  ;;  %v2914_v62 = vld [vmem:[%s5110_s6 + $0x30] sm:$0xff]  ;;  %v5467_v31 = vld [vmem:[#allocation37_spill] sm:$0xff] }
 0xbe6   :  { %2106 = vmax.xlane.f32.xlu1 %v2104_v27 }
 0xbe9   :  { %v2099_v50 = vpop.f32.mrf.mxu3 }
 0xbea   :  { %v2103_v40 = vmul.f32 0.5, %v2099_v50  ;;  %v5468_v50 = vld [vmem:[#allocation36_spill] sm:$0xff] }
 0xbec   :  { %v2105_v57 = vadd.f32 %v2919_v39, %v2103_v40  ;;  %v2992_v39 = vpack.i.bf16 %v5461_v58, %v5460_v25 }
 0xbee   :  { %2108 = vmax.xlane.f32.xlu0 %v2105_v57 }
 0xbff   :  { %2943 = vrot.lane.b32.xlu1 %v4847_v2, %s3269_s4  ;;  %v2915_v2 = vld [vmem:[%s5110_s6 + $0x38] sm:$0xff] }
 0xc00   :  { %2208 = vmatpush.bf16.msrb.mxu0 %v2915_v2 }
 0xc02   :  { %2948 = vrot.lane.b32.xlu0 %v4855_v12, %s3260_s17  ;;  %v2913_v12 = vld [vmem:[%s5110_s6 + $0x28] sm:$0xff] }
 0xc04   :  { %2209 = vmatpush.bf16.msrb.mxu0 %v2914_v62 }
 0xc07   :  { %2963 = vrot.lane.b32.xlu1 %v2962_v23, %s3269_s4 }
 0xc08   :  { %2210 = vmatpush.bf16.msrb.mxu0 %v2913_v12 }
 0xc0a   :  { %2958 = vrot.lane.b32.xlu0 %v2962_v23, %s3260_s17  ;;  %v5471_v23 = vld [vmem:[#allocation49_spill] sm:$0xff] }
 0xc0b   :  { %v2290_v25 = vadd.f32 %v2970_v59, %v5471_v23 }
 0xc0f   :  { %2978 = vrot.lane.b32.xlu1 %v4871_v53, %s3260_s17 }
 0xc12   :  { %2973 = vrot.lane.b32.xlu0 %v4863_v60, %s3269_s4  ;;  %v2912_v60 = vld [vmem:[%s5110_s6 + $0x20] sm:$0xff] }
 0xc13   :  { %2211 = vmatpush.bf16.msrb.mxu0 %v2912_v60 }
 0xc17   :  { %2993 = vrot.lane.b32.xlu1 %v2992_v39, %s3269_s4 }
 0xc1a   :  { %2988 = vrot.lane.b32.xlu0 %v2992_v39, %s3260_s17 }
 0xc1f   :  { %3008 = vrot.lane.b32.xlu1 %v4887_v15, %s3260_s17 }
 0xc22   :  { %3003 = vrot.lane.b32.xlu0 %v4879_v63, %s3269_s4 }
 0xc59   :  { %v2107_v53 = vpop.xlane.xlu1 %2106 }
 0xc5a   :  { %v2110_v63 = vsub.f32 %v2104_v27, %v2107_v53 }
 0xc5c   :  { %v2112_v15 = vmul.f32 1.442695, %v2110_v63  ;;  %v5473_v63 = vld [vmem:[#allocation24_spill] sm:$0xff] }
 0xc5e   :  { %3089 = vpow2.f32 %v2112_v15 }
 0xc61   :  { %v2109_v51 = vpop.xlane.xlu0 %2108 }
 0xc62   :  { %v2111_v16 = vsub.f32 %v2105_v57, %v2109_v51  ;;  %v2402_v57 = vsel %vm5469_vm14, %v2376_v26, 0  ;;  %v5474_v51 = vld [vmem:[#allocation38_spill] sm:$0xff] }
 0xc64   :  { %v2114_v44 = vmul.f32 1.442695, %v2111_v16  ;;  %v5030_v7 = vpop.eup %3089 }
 0xc66   :  { %3091 = vpow2.f32 %v2114_v44 }
 0xc6c   :  { %v5032_v37 = vpop.eup %3091 }
 0xc6d   :  { %v2116_v17 = vpack.c.bf16 %v5032_v37, %v5030_v7 }
 0xc6f   :  { %2125 = vmatmul.bf16.vlgmr.msra.gmra.mxu0 %v2116_v17  ;;  %v2984_v17 = vpop.permute.xlu2 %2983 }
 0xc70   :  { %2849 = vmatpush.bf16.msk.msra.mxu0 %vm3610_vm4, %v5462_v19  ;;  %vm5465_vm4 = vmmov %vm5455_vm1  ;;  %v5476_v19 = vld [vmem:[#allocation43_spill] sm:$0xff]  ;;  %v2986_v6 = vunpack.i.h.bf16 %v2984_v17  ;;  %v2985_v8 = vunpack.i.l.bf16 %v2984_v17 }
 0xc71   :  { %v2944_v34 = vpop.permute.xlu1 %2943  ;;  %vm5500_vm1 = vmmov %vm5493_vm0 }
 0xc72   :  { %v2946_v48 = vunpack.i.h.bf16 %v2944_v34  ;;  %v2945_v10 = vunpack.i.l.bf16 %v2944_v34  ;;  %v5477_v34 = vld [vmem:[#allocation48_spill] sm:$0xff] }
 0xc74   :  { %v2369_v9 = vadd.f32 %v2946_v48, %v5463_v38  ;;  %v2368_v5 = vadd.f32 %v2945_v10, %v5464_v0  ;;  %v2949_v55 = vpop.permute.xlu0 %2948 }
 0xc75   :  { %v2951_v61 = vunpack.i.h.bf16 %v2949_v55  ;;  %v2950_v45 = vunpack.i.l.bf16 %v2949_v55 }
 0xc76   :  { %v2377_v29 = vpack.c.bf16 %v2369_v9, %v2368_v5 }
 0xc77   :  { %v2295_v35 = vadd.f32 %v2951_v61, %v4615_v47  ;;  %v2294_v14 = vadd.f32 %v2950_v45, %v4619_v36  ;;  %v2971_v36 = vunpack.i.h.bf16 %v2969_v13  ;;  %v5479_v61 = vld [vmem:[#allocation41_spill] sm:$0xff]  ;;  %v2999_v13 = vpop.permute.xlu2 %2998 }
 0xc78   :  { %v2405_v49 = vsel %vm5465_vm4, %v2377_v29, 0  ;;  %v2361_v45 = vadd.f32 %v2986_v6, %v5479_v61  ;;  %v5480_v29 = vld [vmem:[#allocation45_spill] sm:$0xff]  ;;  %v3001_v26 = vunpack.i.h.bf16 %v2999_v13  ;;  %vm5502_vm4 = vmmov %vm5493_vm0 }
 0xc79   :  { %v2964_v30 = vpop.permute.xlu1 %2963  ;;  %2407 = vmatpush.bf16.xpose.msra.mxu1 %v2405_v49  ;;  %v2304_v54 = vpack.c.bf16 %v2295_v35, %v2294_v14  ;;  %v2291_v1 = vadd.f32 %v2971_v36, %v5470_v33  ;;  %v2360_v35 = vadd.f32 %v2985_v8, %v5480_v29  ;;  %v5485_v36 = vld [vmem:[#allocation25_spill] sm:$0xff]  ;;  %v5498_v8 = vld [vmem:[#allocation22_spill] sm:$0xff] }
 0xc7a   :  { %v2966_v42 = vunpack.i.h.bf16 %v2964_v30  ;;  %v2965_v43 = vunpack.i.l.bf16 %v2964_v30  ;;  %v5483_v30 = vld [vmem:[#allocation52_spill] sm:$0xff] }
 0xc7b   :  { %v2443_v46 = vsel %vm5466_vm8, %v2304_v54, 0  ;;  %v2302_v53 = vpack.c.bf16 %v2291_v1, %v2290_v25 }
 0xc7c   :  { %v2959_v24 = vpop.permute.xlu0 %2958  ;;  %2449 = vmatpush.bf16.xpose.msrb.mxu3 %v2443_v46  ;;  %v2365_v27 = vadd.f32 %v2966_v42, %v5467_v31  ;;  %v2364_v40 = vadd.f32 %v2965_v43, %v5468_v50  ;;  %v5488_v50 = vld [vmem:[#allocation32_spill] sm:$0xff] }
 0xc7d   :  { %v2961_v47 = vunpack.i.h.bf16 %v2959_v24  ;;  %v2960_v4 = vunpack.i.l.bf16 %v2959_v24  ;;  %v2437_v10 = vsel %vm5478_vm5, %v2302_v53, 0  ;;  %v2373_v24 = vpack.c.bf16 %v2361_v45, %v2360_v35 }
 0xc7f   :  { %v2293_v3 = vadd.f32 %v2961_v47, %v4621_v28  ;;  %v2292_v21 = vadd.f32 %v2960_v4, %v4625_v41  ;;  %v2375_v28 = vpack.c.bf16 %v2365_v27, %v2364_v40  ;;  %v3000_v47 = vunpack.i.l.bf16 %v2999_v13 }
 0xc80   :  { %v2393_v31 = vsel %vm5487_vm12, %v2373_v24, 0  ;;  %v2285_v40 = vadd.f32 %v3001_v26, %v5488_v50 }
 0xc81   :  { %2408 = vmatpush.bf16.xpose.msra.mxu1 %v2402_v57  ;;  %v2303_v52 = vpack.c.bf16 %v2293_v3, %v2292_v21  ;;  %v2979_v39 = vpop.permute.xlu1 %2978  ;;  %v2399_v44 = vsel %vm5475_vm13, %v2375_v28, 0  ;;  %v5486_v3 = vld [vmem:[#allocation44_spill] sm:$0xff] }
 0xc82   :  { %v2981_v12 = vunpack.i.h.bf16 %v2979_v39  ;;  %v2980_v60 = vunpack.i.l.bf16 %v2979_v39  ;;  %v5489_v57 = vld [vmem:[#allocation20_spill] sm:$0xff] }
 0xc83   :  { %v2440_v58 = vsel %vm5472_vm7, %v2303_v52, 0  ;;  %v2284_v52 = vadd.f32 %v3000_v47, %v5489_v57 }
 0xc84   :  { %v2974_v2 = vpop.permute.xlu0 %2973  ;;  %2450 = vmatpush.bf16.xpose.msrb.mxu3 %v2440_v58  ;;  %v2289_v56 = vadd.f32 %v2981_v12, %v5476_v19  ;;  %v2288_v48 = vadd.f32 %v2980_v60, %v5477_v34  ;;  %v5492_v12 = vld [vmem:[#allocation35_spill] sm:$0xff] }
 0xc85   :  { %v2976_v62 = vunpack.i.h.bf16 %v2974_v2  ;;  %v2975_v41 = vunpack.i.l.bf16 %v2974_v2  ;;  %v2299_v28 = vpack.c.bf16 %v2285_v40, %v2284_v52  ;;  %v2883_v40 = vld [vmem:[#allocation10 + $0x88] sm:$0xff] }
 0xc86   :  { %v2301_v55 = vpack.c.bf16 %v2289_v56, %v2288_v48 }
 0xc87   :  { %v2363_v15 = vadd.f32 %v2976_v62, %v5473_v63  ;;  %v2362_v16 = vadd.f32 %v2975_v41, %v5474_v51  ;;  %v5491_v62 = vld [vmem:[#allocation34_spill] sm:$0xff]  ;;  %v3014_v63 = vpop.permute.xlu2 %3013  ;;  %v2428_v17 = vsel %vm5496_vm6, %v2299_v28, 0 }
 0xc88   :  { %v2434_v46 = vsel %vm5484_vm11, %v2301_v55, 0  ;;  %v3016_v19 = vunpack.i.h.bf16 %v3014_v63  ;;  %v3015_v56 = vunpack.i.l.bf16 %v3014_v63 }
 0xc89   :  { %2409 = vmatpush.bf16.xpose.msra.mxu1 %v2399_v44  ;;  %v2374_v9 = vpack.c.bf16 %v2363_v15, %v2362_v16  ;;  %v2994_v20 = vpop.permute.xlu1 %2993  ;;  %v5494_v15 = vld [vmem:[#allocation33_spill] sm:$0xff] }
 0xc8a   :  { %v2996_v42 = vunpack.i.h.bf16 %v2994_v20  ;;  %v2995_v43 = vunpack.i.l.bf16 %v2994_v20  ;;  %v5495_v16 = vld [vmem:[#allocation21_spill] sm:$0xff] }
 0xc8b   :  { %v2396_v14 = vsel %vm5481_vm2, %v2374_v9, 0 }
 0xc8c   :  { %v2989_v38 = vpop.permute.xlu0 %2988  ;;  %2451 = vmatpush.bf16.xpose.msrb.mxu3 %v2437_v10  ;;  %v2359_v59 = vadd.f32 %v2996_v42, %v5485_v36  ;;  %v2358_v21 = vadd.f32 %v2995_v43, %v5486_v3  ;;  %v5497_v10 = vld [vmem:[#allocation47_spill] sm:$0xff] }
 0xc8d   :  { %v2991_v0 = vunpack.i.h.bf16 %v2989_v38  ;;  %v2990_v5 = vunpack.i.l.bf16 %v2989_v38  ;;  %v2355_v6 = vadd.f32 %v3016_v19, %v5497_v10  ;;  %v2354_v38 = vadd.f32 %v3015_v56, %v5498_v8 }
 0xc8e   :  { %v2372_v58 = vpack.c.bf16 %v2359_v59, %v2358_v21 }
 0xc8f   :  { %v2287_v49 = vadd.f32 %v2991_v0, %v5482_v32  ;;  %v2286_v54 = vadd.f32 %v2990_v5, %v5483_v30  ;;  %v2370_v5 = vpack.c.bf16 %v2355_v6, %v2354_v38 }
 0xc90   :  { %v2390_v53 = vsel %vm5493_vm0, %v2372_v58, 0 }
 0xc91   :  { %2410 = vmatpush.bf16.xpose.msra.mxu1 %v2396_v14  ;;  %v2300_v4 = vpack.c.bf16 %v2287_v49, %v2286_v54  ;;  %v3009_v1 = vpop.permute.xlu1 %3008  ;;  %v2384_v55 = vsel %vm5501_vm10, %v2370_v5, 0 }
 0xc92   :  { %v3011_v39 = vunpack.i.h.bf16 %v3009_v1  ;;  %v3010_v2 = vunpack.i.l.bf16 %v3009_v1 }
 0xc93   :  { %v2431_v33 = vsel %vm5490_vm9, %v2300_v4, 0  ;;  %vm5503_vm9 = vcmask 523264  }
 0xc94   :  { %2452 = vmatpush.bf16.xpose.msrb.mxu3 %v2434_v46  ;;  %v3004_v27 = vpop.permute.xlu0 %3003  ;;  %v2283_v51 = vadd.f32 %v3011_v39, %v5494_v15  ;;  %v2282_v44 = vadd.f32 %v3010_v2, %v5495_v16  ;;  %v3270_v2 = vmov 0.0  }
 0xc95   :  { %v3006_v23 = vunpack.i.h.bf16 %v3004_v27  ;;  %v3005_v25 = vunpack.i.l.bf16 %v3004_v27 }
 0xc96   :  { %v2298_v48 = vpack.c.bf16 %v2283_v51, %v2282_v44 }
 0xc97   :  { %v2357_v41 = vadd.f32 %v3006_v23, %v5491_v62  ;;  %v2356_v60 = vadd.f32 %v3005_v25, %v5492_v12  ;;  %v3106_v23 = vld [vmem:[%s5111_s7] sm:$0xff]  ;;  %s3271_s7 = smov [#allocation11]  }
 0xc98   :  { %v2425_v0 = vsel %vm5500_vm1, %v2298_v48, 0  ;;  %v2462_v25 = vperm.slane %v3106_v23, 3  ;;  %s2502_s24 = sshll.u32 %s3271_s7, 4  ;;  %s2503_s24 = int_to_ptr.vmem [resolvable:$true] %s2502_s24 }
 0xc99   :  { %2411 = vmatpush.bf16.xpose.msra.mxu1 %v2393_v31  ;;  %v2371_v34 = vpack.c.bf16 %v2357_v41, %v2356_v60 }
 0xc9b   :  { %v2387_v9 = vsel %vm5499_vm3, %v2371_v34, 0 }
 0xc9c   :  { %2453 = vmatpush.bf16.xpose.msrb.mxu3 %v2431_v33 }
 0xca1   :  { %2412 = vmatpush.bf16.xpose.msra.mxu1 %v2390_v53 }
 0xca4   :  { %2454 = vmatpush.bf16.xpose.msrb.mxu3 %v2428_v17 }
 0xca9   :  { %2413 = vmatpush.bf16.xpose.msra.mxu1 %v2387_v9 }
 0xcac   :  { %2455 = vmatpush.bf16.xpose.msrb.mxu3 %v2425_v0 }
 0xcb1   :  { %2414 = vmatpush.bf16.xpose.msra.mxu1 %v2384_v55 }
 0xcb3   :  { %2843 = vmatmul.msk.bf16.vlgmr.msrb.gmra.mxu3 %vm5502_vm4, %v2378_v18 }
 0xcec   :  { %v2126_v61 = vpop.f32.mrf.mxu0 }
 0xced   :  { %3093 = vrcp.f32 %v2126_v61  ;;  %v2142_v54 = vand.u32 2147483648, %v2126_v61  ;;  %vm2136_vm14 = vweird.f32 %v2126_v61  ;;  %v2140_v46 = vand.u32 2147483647, %v2126_v61 }
 0xcef   :  { %v2143_v43 = vor.u32 1.1754944e-38, %v2142_v54  ;;  %vm2141_vm5 = vcmp.eq.f32.partialorder %v2140_v46, 8.507059e+37 }
 0xcf3   :  { %v3094_v45 = vpop.eup %3093 }
 0xcf4   :  { %v2132_v29 = vmul.f32 %v3094_v45, %v2126_v61  ;;  %v2128_v35 = vpop.f32.mrf.mxu0  ;;  %vm2137_vm8 = vweird.f32 %v3094_v45 }
 0xcf5   :  { %3095 = vrcp.f32 %v2128_v35  ;;  %vm2138_vm7 = vmor %vm2136_vm14, %vm2137_vm8  ;;  %v2157_v11 = vand.u32 2147483648, %v2128_v35  ;;  %v2155_v42 = vand.u32 2147483647, %v2128_v35  ;;  %vm2151_vm2 = vweird.f32 %v2128_v35 }
 0xcf6   :  { %v2133_v14 = vsub.f32 1.0, %v2132_v29 }
 0xcf7   :  { %v2158_v47 = vor.u32 1.1754944e-38, %v2157_v11  ;;  %vm2156_vm12 = vcmp.eq.f32.partialorder %v2155_v42, 8.507059e+37 }
 0xcf8   :  { %v2134_v20 = vmul.f32 %v3094_v45, %v2133_v14 }
 0xcfa   :  { %v2135_v49 = vadd.f32 %v3094_v45, %v2134_v20 }
 0xcfb   :  { %v3096_v32 = vpop.eup %3095 }
 0xcfc   :  { %v2147_v30 = vmul.f32 %v3096_v32, %v2128_v35  ;;  %v2139_v22 = vsel %vm2138_vm7, %v3094_v45, %v2135_v49  ;;  %vm2152_vm13 = vweird.f32 %v3096_v32 }
 0xcfd   :  { %v2144_v26 = vsel %vm2141_vm5, %v2143_v43, %v2139_v22  ;;  %vm2153_vm11 = vmor %vm2151_vm2, %vm2152_vm13 }
 0xcfe   :  { %v2148_v13 = vsub.f32 1.0, %v2147_v30  ;;  %v2145_v59 = vmul.f32 %v5030_v7, %v2144_v26  ;;  %v5504_v7 = vld [vmem:[#allocation39_spill] sm:$0xff] }
 0xcff   :  { %vm2489_vm3 = vcmp.eq.s32.totalorder %v5504_v7, 0 }
 0xd00   :  { %v2149_v18 = vmul.f32 %v3096_v32, %v2148_v13 }
 0xd02   :  { %v2150_v24 = vadd.f32 %v3096_v32, %v2149_v18 }
 0xd04   :  { %v2154_v4 = vsel %vm2153_vm11, %v3096_v32, %v2150_v24 }
 0xd05   :  { %v2159_v36 = vsel %vm2156_vm12, %v2158_v47, %v2154_v4 }
 0xd06   :  { %v2160_v3 = vmul.f32 %v5032_v37, %v2159_v36 }
 0xd08   :  { %v2161_v21 = vpack.c.bf16 %v2160_v3, %v2145_v59 }
 0xd0a   :  { %2170 = vmatmul.bf16.vlgmr.msrb.gmra.mxu1 %v2161_v21 }
 0xd36   :  { %v2457_v37 = vpop.f32.mrf.mxu3 }
 0xd3e   :  { %v2459_v60 = vpop.f32.mrf.mxu3 }
 0xd87   :  { %v2171_v31 = vpop.f32.mrf.mxu1 }
 0xd8f   :  { %v2173_v27 = vpop.f32.mrf.mxu1 }
 0xd90   :  { %v2176_v50 = vpack.c.bf16 %v2173_v27, %v2171_v31 }
 0xd92   :  { %2841 = vmatmul.msk.bf16.vlgmr.msrb.gmra.mxu0 %vm5503_vm9, %v2176_v50 }
 0xda2   :  { %2850 = vmatmul.msk.bf16.vlgmr.msra.gmra.mxu0 %vm1607_vm15, %v2883_v40 }
 0xe0f   :  { %v2213_v57 = vpop.f32.mrf.mxu0 }
 0xe17   :  { %v2215_v52 = vpop.f32.mrf.mxu0 }
 0xe18   :  { %v2379_v33 = vpack.c.bf16 %v2215_v52, %v2213_v57 }
 0xe1a   :  { %2842 = vmatmul.msk.bf16.vlgmr.msra.gmra.mxu1 %vm5493_vm0, %v2379_v33 }
 0xe1f   :  { %v2482_v1 = vpop.f32.mrf.mxu0 }
 0xe20   :  { %vm2487_vm6 = vcmp.gt.f32.partialorder %v2482_v1, 0.0 }
 0xe21   :  { %vm2490_vm1 = vmor %vm2487_vm6, %vm2489_vm3 }
 0xe22   :  { %v2492_v28 = vsel %vm2490_vm1, -inf, %v3270_v2 }
 0xe27   :  { %v2484_v41 = vpop.f32.mrf.mxu0 }
 0xe28   :  { %vm2488_vm15 = vcmp.gt.f32.partialorder %v2484_v41, 0.0 }
 0xe29   :  { %vm2491_vm10 = vmor %vm2488_vm15, %vm2489_vm3 }
 0xe2a   :  { %v2493_v51 = vsel %vm2491_vm10, -inf, %v3270_v2 }
 0xe97   :  { %v2416_v58 = vpop.f32.mrf.mxu1 }
 0xe98   :  { %v2458_v39 = vadd.f32 %v2457_v37, %v2416_v58 }
 0xe9a   :  { %v2463_v62 = vadd.f32 %v2462_v25, %v2458_v39 }
 0xe9c   :  { %v2494_v12 = vadd.f32 %v2492_v28, %v2463_v62 }
 0xe9e   :  { %2496 = vst [vmem:[#allocation11] sm:$0xff] %v2494_v12 }
 0xe9f   :  { %v2418_v53 = vpop.f32.mrf.mxu1 }
 0xea0   :  { %v2460_v63 = vadd.f32 %v2459_v60, %v2418_v53 }
 0xea2   :  { %v2464_v15 = vadd.f32 %v2462_v25, %v2460_v63 }
 0xea4   :  { %v2495_v16 = vadd.f32 %v2493_v51, %v2464_v15 }
 0xea6   :  { %2497 = vst [vmem:[#allocation11 + $0x8] sm:$0xff] %v2495_v16 }
 0xea7   :  { %2510 = dma.vmem_to_hbm [thread:$0]  %s2503_s24, 256, %s2505_s26, [#allocation4], %s3272_s27, %s3272_s27, %s3273_s28  }
 0xea8   :  { %3257 = dma.done.wait [#allocation4], 256  }
 0xea9   :  { %3258 = vsyncadd [#allocation4], 4294967040 }
 0xeaa   :  { %2515 = vsyncpa [#allocation3], 1 }
 0xeab   :  { %2516 = vsyncpa [#allocation6], 1 }
 0xeac   :  { %2517 = vsyncpa [#allocation9], 1 }
 0xead   :  { %2518 = vsyncpa [#allocation4], 1 }

</bundles_post_ra>
